<compile_context>
chip_gen: v5e
topology: v5e:2x2
jax: 0.10.0
libtpu: 0.0.40
codegen_flags: <defaults>
</compile_context>

<pallas_src>
import jax
import jax.numpy as jnp
from jax.experimental import pallas as pl
from jax.experimental.pallas import tpu as pltpu

# ---- small synthetic config standing in for e5-base-v2 ----
VOCAB = 97
HIDDEN = 32
HEADS = 2
HEAD_DIM = HIDDEN // HEADS
FFN = 64
LAYERS = 2
MAX_POS = 16
LN_EPS = 1e-12


# ----------------------------- fused encoder kernel -----------------------------

def _encoder_kernel(x_ref, mask_ref, emb_g_ref, emb_b_ref,
                    wqkv_ref, bqkv_ref, wo_ref, bo_ref,
                    ln1_g_ref, ln1_b_ref, w1_ref, b1_ref,
                    w2_ref, b2_ref, ln2_g_ref, ln2_b_ref, o_ref):
    nb, L, K = x_ref.shape                 # (sequences in this block, seq, hidden)
    M = nb * L
    n_layers = wqkv_ref.shape[0]
    scale = 1.0 / float(HEAD_DIM) ** 0.5

    x = x_ref[...].astype(jnp.float32).reshape(M, K)
    # additive attention-mask bias built in-kernel: 0 where keep, -1e9 where pad
    bias = (mask_ref[...].astype(jnp.float32) - 1.0) * 1e9     # (nb, 1, L)

    def ln(v, g, b):
        mu = jnp.mean(v, axis=-1, keepdims=True)
        var = jnp.mean((v - mu) ** 2, axis=-1, keepdims=True)
        return (v - mu) * jax.lax.rsqrt(var + LN_EPS) * g + b

    h = ln(x, emb_g_ref[...], emb_b_ref[...])                  # embedding LayerNorm

    for l in range(n_layers):
        # --- fused QKV projection (bf16 operands, f32 accumulation) ---
        qkv = jnp.dot(h.astype(jnp.bfloat16), wqkv_ref[l],
                      preferred_element_type=jnp.float32) + bqkv_ref[l]   # (M, 3K)
        q3 = qkv[:, 0 * K:1 * K].reshape(nb, L, K)
        k3 = qkv[:, 1 * K:2 * K].reshape(nb, L, K)
        v3 = qkv[:, 2 * K:3 * K].reshape(nb, L, K)

        # --- per-head attention (softmax in f32, reciprocal on the EUP) ---
        ctx_heads = []
        for hh in range(HEADS):
            sl = slice(hh * HEAD_DIM, (hh + 1) * HEAD_DIM)
            qh = q3[:, :, sl].astype(jnp.bfloat16)
            kh = k3[:, :, sl].astype(jnp.bfloat16)
            vh = v3[:, :, sl].astype(jnp.bfloat16)
            s = jnp.einsum('bqd,bkd->bqk', qh, kh,
                           preferred_element_type=jnp.float32) * scale
            s = s + bias
            m = jnp.max(s, axis=-1, keepdims=True)
            p = jnp.exp(s - m)
            attn = p * pl.reciprocal(jnp.sum(p, axis=-1, keepdims=True), approx=True)
            ctx_heads.append(
                jnp.einsum('bqk,bkd->bqd', attn.astype(jnp.bfloat16), vh,
                           preferred_element_type=jnp.float32))
        ctx = jnp.concatenate(ctx_heads, axis=-1).reshape(M, K)

        # --- output projection + residual + LayerNorm (fused epilogue) ---
        attn_out = jnp.dot(ctx.astype(jnp.bfloat16), wo_ref[l],
                           preferred_element_type=jnp.float32) + bo_ref[l]
        h = ln(h + attn_out, ln1_g_ref[l], ln1_b_ref[l])

        # --- FFN: bias+GELU fused with both matmuls, residual + LayerNorm ---
        ff = jnp.dot(h.astype(jnp.bfloat16), w1_ref[l],
                     preferred_element_type=jnp.float32) + b1_ref[l]
        # TODO(synk): HF BERT / e5-base-v2 uses exact erf-GELU; tanh approximation used here.
        ff = jax.nn.gelu(ff, approximate=True)
        ff = jnp.dot(ff.astype(jnp.bfloat16), w2_ref[l],
                     preferred_element_type=jnp.float32) + b2_ref[l]
        h = ln(h + ff, ln2_g_ref[l], ln2_b_ref[l])

    o_ref[...] = h.reshape(nb, L, K).astype(o_ref.dtype)


def encode(params, x_emb, masks):
    """x_emb: (B+N, L, HIDDEN) embedded tokens; masks: (B+N, L) -> (B+N, L, HIDDEN)."""
    BN, L, K = x_emb.shape
    # 2-wide parallel grid over sequences (v7x megacore); fall back to 1 block if odd.
    nblk = 2 if BN % 2 == 0 else 1
    nb = BN // nblk
    mask3 = masks.astype(jnp.float32).reshape(BN, 1, L)

    def full(shape):
        return pl.BlockSpec(shape, lambda i, _n=len(shape): (0,) * _n)

    return pl.pallas_call(
        _encoder_kernel,
        out_shape=jax.ShapeDtypeStruct((BN, L, K), jnp.float32),
        grid=(nblk,),
        in_specs=[
            pl.BlockSpec((nb, L, K), lambda i: (i, 0, 0)),     # x
            pl.BlockSpec((nb, 1, L), lambda i: (i, 0, 0)),     # mask
            full((1, K)), full((1, K)),                        # emb LN gamma/beta
            full((LAYERS, K, 3 * K)), full((LAYERS, 1, 3 * K)),  # fused QKV w/b
            full((LAYERS, K, K)), full((LAYERS, 1, K)),          # attn out w/b
            full((LAYERS, 1, K)), full((LAYERS, 1, K)),          # LN1 gamma/beta
            full((LAYERS, K, FFN)), full((LAYERS, 1, FFN)),      # FFN w1/b1
            full((LAYERS, FFN, K)), full((LAYERS, 1, K)),        # FFN w2/b2
            full((LAYERS, 1, K)), full((LAYERS, 1, K)),          # LN2 gamma/beta
        ],
        out_specs=pl.BlockSpec((nb, L, K), lambda i: (i, 0, 0)),
        compiler_params=pltpu.CompilerParams(
            dimension_semantics=("parallel",)),
    )(x_emb, mask3,
      params["emb_ln_g"], params["emb_ln_b"],
      params["wqkv"], params["bqkv"], params["wo"], params["bo"],
      params["ln1_g"], params["ln1_b"], params["w1"], params["b1"],
      params["w2"], params["b2"], params["ln2_g"], params["ln2_b"])


# ----------------------------- pool + score kernel -----------------------------

def _pool_score_kernel(h_ref, qm_ref, dm_ref, o_ref):
    h = h_ref[...].astype(jnp.float32)          # (B+N, L, K)
    qm = qm_ref[...]                            # (B, L) float 0/1
    dm = dm_ref[...]                            # (N, L)
    nq = qm_ref.shape[0]
    qh = h[:nq]                                 # (B, L, K)
    dh = h[nq:]                                 # (N, L, K)
    # masked_fill(~mask, 0).sum(1) / mask.sum(1)   (same NaN-on-empty-mask semantics as PyTorch)
    q_emb = jnp.sum(qh * qm[..., None], axis=1) / jnp.sum(qm, axis=-1, keepdims=True)
    d_emb = jnp.sum(dh * dm[..., None], axis=1) / jnp.sum(dm, axis=-1, keepdims=True)
    # F.normalize(dim=-1), eps=1e-12
    q_n = q_emb / jnp.maximum(
        jnp.sqrt(jnp.sum(q_emb * q_emb, axis=-1, keepdims=True)), 1e-12)
    d_n = d_emb / jnp.maximum(
        jnp.sqrt(jnp.sum(d_emb * d_emb, axis=-1, keepdims=True)), 1e-12)
    # cosine_similarity of already unit-norm vectors == plain dot product
    # (redundant re-normalization from the previous version dropped).
    o_ref[...] = jax.lax.dot_general(
        q_n, d_n, (((1,), (1,)), ((), ())),
        preferred_element_type=jnp.float32).astype(o_ref.dtype)


def pool_and_score(hidden, q_masks, d_masks):
    BN, L, K = hidden.shape
    B = q_masks.shape[0]
    N = d_masks.shape[0]
    return pl.pallas_call(
        _pool_score_kernel,
        out_shape=jax.ShapeDtypeStruct((B, N), jnp.float32),
        grid=(1,),
        in_specs=[pl.BlockSpec((BN, L, K), lambda i: (0, 0, 0)),
                  pl.BlockSpec((B, L), lambda i: (0, 0)),
                  pl.BlockSpec((N, L), lambda i: (0, 0))],
        out_specs=pl.BlockSpec((B, N), lambda i: (0, 0)),
    )(hidden, q_masks, d_masks)


# ----------------------------- params + forward -----------------------------

def init_params(key):
    def nrm(k, shape, scale=0.02):
        return scale * jax.random.normal(k, shape, dtype=jnp.float32)

    ks = jax.random.split(key, 7)
    return {
        "word_emb": nrm(ks[0], (VOCAB, HIDDEN)),
        "pos_emb": nrm(ks[1], (MAX_POS, HIDDEN)),
        "type_emb": nrm(ks[2], (2, HIDDEN)),
        "emb_ln_g": jnp.ones((1, HIDDEN), jnp.float32),
        "emb_ln_b": jnp.zeros((1, HIDDEN), jnp.float32),
        # fused QKV weight; matmul weights stored bf16 (MXU-native), biases/LN in f32
        "wqkv": nrm(ks[3], (LAYERS, HIDDEN, 3 * HIDDEN)).astype(jnp.bfloat16),
        "bqkv": jnp.zeros((LAYERS, 1, 3 * HIDDEN), jnp.float32),
        "wo": nrm(ks[4], (LAYERS, HIDDEN, HIDDEN)).astype(jnp.bfloat16),
        "bo": jnp.zeros((LAYERS, 1, HIDDEN), jnp.float32),
        "ln1_g": jnp.ones((LAYERS, 1, HIDDEN), jnp.float32),
        "ln1_b": jnp.zeros((LAYERS, 1, HIDDEN), jnp.float32),
        "w1": nrm(ks[5], (LAYERS, HIDDEN, FFN)).astype(jnp.bfloat16),
        "b1": jnp.zeros((LAYERS, 1, FFN), jnp.float32),
        "w2": nrm(ks[6], (LAYERS, FFN, HIDDEN)).astype(jnp.bfloat16),
        "b2": jnp.zeros((LAYERS, 1, HIDDEN), jnp.float32),
        "ln2_g": jnp.ones((LAYERS, 1, HIDDEN), jnp.float32),
        "ln2_b": jnp.zeros((LAYERS, 1, HIDDEN), jnp.float32),
    }


@jax.jit
def e5_forward(params, q_ids, q_masks, d_ids, d_masks):
    """q_ids/q_masks: (B, L); d_ids/d_masks: (N, L) -> scores (B, N)."""
    B, L = q_ids.shape
    # batch queries + documents into ONE encoder call (shared weights, one launch)
    ids = jnp.concatenate([q_ids, d_ids], axis=0)          # (B+N, L)
    masks = jnp.concatenate([q_masks, d_masks], axis=0)    # (B+N, L)
    # embedding lookup (gather) stays in plain-JAX glue
    x = (jnp.take(params["word_emb"], ids, axis=0)
         + params["pos_emb"][None, :L, :]
         + params["type_emb"][0][None, None, :])
    hidden = encode(params, x, masks)                      # (B+N, L, HIDDEN)
    return pool_and_score(hidden,
                          q_masks.astype(jnp.float32),
                          d_masks.astype(jnp.float32))


if __name__ == "__main__":
    key = jax.random.PRNGKey(0)
    k_params, k_q, k_d = jax.random.split(key, 3)
    params = init_params(k_params)

    B, N, L = 2, 4, 8
    q_ids = jax.random.randint(k_q, (B, L), 0, VOCAB, dtype=jnp.int32)
    d_ids = jax.random.randint(k_d, (N, L), 0, VOCAB, dtype=jnp.int32)
    q_masks = jnp.array([[1, 1, 1, 1, 1, 1, 1, 1],
                         [1, 1, 1, 1, 1, 0, 0, 0]], dtype=jnp.int32)
    d_masks = jnp.array([[1, 1, 1, 1, 1, 1, 1, 1],
                         [1, 1, 1, 1, 1, 1, 0, 0],
                         [1, 1, 1, 1, 0, 0, 0, 0],
                         [1, 1, 1, 1, 1, 1, 1, 0]], dtype=jnp.int32)

    scores = e5_forward(params, q_ids, q_masks, d_ids, d_masks)
    jax.block_until_ready(scores)
    assert scores.shape == (B, N), scores.shape
    assert bool(jnp.all(jnp.isfinite(scores)))
    assert bool(jnp.all(jnp.abs(scores) <= 1.0 + 1e-5))  # cosine range
    print("KERNEL_OK")
</pallas_src>

<mosaic_0001>
module attributes {stable_mosaic.version = 11 : i64} {
  func.func @_pool_score_kernel(%arg0: i32, %arg1: memref<6x8x32xf32, #tpu.memory_space<vmem>>, %arg2: memref<2x8xf32, #tpu.memory_space<vmem>>, %arg3: memref<4x8xf32, #tpu.memory_space<vmem>>, %arg4: memref<2x4xf32, #tpu.memory_space<vmem>>) attributes {dimension_semantics = [#tpu.dimension_semantics<arbitrary>], iteration_bounds = array<i64: 1>, scalar_prefetch = 0 : i64, scratch_operands = 0 : i64, tpu.core_type = #tpu.core_type<tc>, window_params = [{pipeline_mode = #tpu.pipeline_mode<synchronous>, transform_indices = @transform_0, window_bounds = array<i64: 6, 8, 32>}, {pipeline_mode = #tpu.pipeline_mode<synchronous>, transform_indices = @transform_1, window_bounds = array<i64: 2, 8>}, {pipeline_mode = #tpu.pipeline_mode<synchronous>, transform_indices = @transform_2, window_bounds = array<i64: 4, 8>}, {pipeline_mode = #tpu.pipeline_mode<synchronous>, transform_indices = @transform_3, window_bounds = array<i64: 2, 4>}]} {
    %c0 = arith.constant 0 : index
    %c0_0 = arith.constant 0 : index
    %c0_1 = arith.constant 0 : index
    %0 = vector.load %arg1[%c0, %c0_0, %c0_1] : memref<6x8x32xf32, #tpu.memory_space<vmem>>, vector<6x8x32xf32>
    %c0_2 = arith.constant 0 : index
    %c0_3 = arith.constant 0 : index
    %1 = vector.load %arg2[%c0_2, %c0_3] : memref<2x8xf32, #tpu.memory_space<vmem>>, vector<2x8xf32>
    %c0_4 = arith.constant 0 : index
    %c0_5 = arith.constant 0 : index
    %2 = vector.load %arg3[%c0_4, %c0_5] : memref<4x8xf32, #tpu.memory_space<vmem>>, vector<4x8xf32>
    %3 = vector.extract_strided_slice %0 {offsets = [0, 0, 0], sizes = [2, 8, 32], strides = [1, 1, 1]} : vector<6x8x32xf32> to vector<2x8x32xf32>
    %4 = vector.extract_strided_slice %0 {offsets = [2, 0, 0], sizes = [4, 8, 32], strides = [1, 1, 1]} : vector<6x8x32xf32> to vector<4x8x32xf32>
    %5 = vector.shape_cast %1 : vector<2x8xf32> to vector<2x8x1xf32>
    %6 = vector.broadcast %5 : vector<2x8x1xf32> to vector<2x8x32xf32>
    %7 = arith.mulf %3, %6 : vector<2x8x32xf32>
    %cst = arith.constant dense<0.000000e+00> : vector<2x32xf32>
    %8 = vector.multi_reduction <add>, %7, %cst [1] : vector<2x8x32xf32> to vector<2x32xf32>
    %cst_6 = arith.constant dense<0.000000e+00> : vector<2xf32>
    %9 = vector.multi_reduction <add>, %1, %cst_6 [1] : vector<2x8xf32> to vector<2xf32>
    %10 = vector.shape_cast %9 : vector<2xf32> to vector<2x1xf32>
    %11 = vector.broadcast %10 : vector<2x1xf32> to vector<2x32xf32>
    %12 = arith.divf %8, %11 : vector<2x32xf32>
    %13 = vector.shape_cast %2 : vector<4x8xf32> to vector<4x8x1xf32>
    %14 = vector.broadcast %13 : vector<4x8x1xf32> to vector<4x8x32xf32>
    %15 = arith.mulf %4, %14 : vector<4x8x32xf32>
    %cst_7 = arith.constant dense<0.000000e+00> : vector<4x32xf32>
    %16 = vector.multi_reduction <add>, %15, %cst_7 [1] : vector<4x8x32xf32> to vector<4x32xf32>
    %cst_8 = arith.constant dense<0.000000e+00> : vector<4xf32>
    %17 = vector.multi_reduction <add>, %2, %cst_8 [1] : vector<4x8xf32> to vector<4xf32>
    %18 = vector.shape_cast %17 : vector<4xf32> to vector<4x1xf32>
    %19 = vector.broadcast %18 : vector<4x1xf32> to vector<4x32xf32>
    %20 = arith.divf %16, %19 : vector<4x32xf32>
    %21 = arith.mulf %12, %12 : vector<2x32xf32>
    %cst_9 = arith.constant dense<0.000000e+00> : vector<2xf32>
    %22 = vector.multi_reduction <add>, %21, %cst_9 [1] : vector<2x32xf32> to vector<2xf32>
    %23 = vector.shape_cast %22 : vector<2xf32> to vector<2x1xf32>
    %24 = math.sqrt %23 : vector<2x1xf32>
    %cst_10 = arith.constant 9.99999996E-13 : f32
    %25 = vector.broadcast %cst_10 : f32 to vector<2x1xf32>
    %26 = arith.maximumf %24, %25 : vector<2x1xf32>
    %27 = vector.broadcast %26 : vector<2x1xf32> to vector<2x32xf32>
    %28 = arith.divf %12, %27 : vector<2x32xf32>
    %29 = arith.mulf %20, %20 : vector<4x32xf32>
    %cst_11 = arith.constant dense<0.000000e+00> : vector<4xf32>
    %30 = vector.multi_reduction <add>, %29, %cst_11 [1] : vector<4x32xf32> to vector<4xf32>
    %31 = vector.shape_cast %30 : vector<4xf32> to vector<4x1xf32>
    %32 = math.sqrt %31 : vector<4x1xf32>
    %cst_12 = arith.constant 9.99999996E-13 : f32
    %33 = vector.broadcast %cst_12 : f32 to vector<4x1xf32>
    %34 = arith.maximumf %32, %33 : vector<4x1xf32>
    %35 = vector.broadcast %34 : vector<4x1xf32> to vector<4x32xf32>
    %36 = arith.divf %20, %35 : vector<4x32xf32>
    %cst_13 = arith.constant dense<0.000000e+00> : vector<2x4xf32>
    %37 = tpu.matmul %28, %36, %cst_13 {dimension_numbers = #tpu.dot_dimension_numbers<[1], [1], [0], [0], [0, 0, 1, 0], [], []>} : vector<2x32xf32>, vector<4x32xf32>, vector<2x4xf32> -> vector<2x4xf32>
    %c0_14 = arith.constant 0 : index
    %c0_15 = arith.constant 0 : index
    %38 = vector.load %arg4[%c0_14, %c0_15] : memref<2x4xf32, #tpu.memory_space<vmem>>, vector<2x4xf32>
    tpu.vector_store %arg4[%c0_14, %c0_15], %37 {strides = array<i32>} : memref<2x4xf32, #tpu.memory_space<vmem>>, vector<2x4xf32>,
    return
  }
  func.func @transform_0(%arg0: i32) -> (i32, i32, i32) {
    %c0_i32 = arith.constant 0 : i32
    %c0_i32_0 = arith.constant 0 : i32
    %c0_i32_1 = arith.constant 0 : i32
    %c0_i32_2 = arith.constant 0 : i32
    return %c0_i32, %c0_i32_0, %c0_i32_1 : i32, i32, i32
  }
  func.func @transform_1(%arg0: i32) -> (i32, i32) {
    %c0_i32 = arith.constant 0 : i32
    %c0_i32_0 = arith.constant 0 : i32
    %c0_i32_1 = arith.constant 0 : i32
    return %c0_i32, %c0_i32_0 : i32, i32
  }
  func.func @transform_2(%arg0: i32) -> (i32, i32) {
    %c0_i32 = arith.constant 0 : i32
    %c0_i32_0 = arith.constant 0 : i32
    %c0_i32_1 = arith.constant 0 : i32
    return %c0_i32, %c0_i32_0 : i32, i32
  }
  func.func @transform_3(%arg0: i32) -> (i32, i32) {
    %c0_i32 = arith.constant 0 : i32
    %c0_i32_0 = arith.constant 0 : i32
    %c0_i32_1 = arith.constant 0 : i32
    return %c0_i32, %c0_i32_0 : i32, i32
  }
}

module attributes {stable_mosaic.version = 11 : i64} {
  func.func @_encoder_kernel(%arg0: i32, %arg1: memref<3x8x32xf32, #tpu.memory_space<vmem>>, %arg2: memref<3x1x8xf32, #tpu.memory_space<vmem>>, %arg3: memref<1x32xf32, #tpu.memory_space<vmem>>, %arg4: memref<1x32xf32, #tpu.memory_space<vmem>>, %arg5: memref<2x32x96xbf16, #tpu.memory_space<vmem>>, %arg6: memref<2x1x96xf32, #tpu.memory_space<vmem>>, %arg7: memref<2x32x32xbf16, #tpu.memory_space<vmem>>, %arg8: memref<2x1x32xf32, #tpu.memory_space<vmem>>, %arg9: memref<2x1x32xf32, #tpu.memory_space<vmem>>, %arg10: memref<2x1x32xf32, #tpu.memory_space<vmem>>, %arg11: memref<2x32x64xbf16, #tpu.memory_space<vmem>>, %arg12: memref<2x1x64xf32, #tpu.memory_space<vmem>>, %arg13: memref<2x64x32xbf16, #tpu.memory_space<vmem>>, %arg14: memref<2x1x32xf32, #tpu.memory_space<vmem>>, %arg15: memref<2x1x32xf32, #tpu.memory_space<vmem>>, %arg16: memref<2x1x32xf32, #tpu.memory_space<vmem>>, %arg17: memref<3x8x32xf32, #tpu.memory_space<vmem>>) attributes {dimension_semantics = [#tpu.dimension_semantics<parallel>], iteration_bounds = array<i64: 2>, scalar_prefetch = 0 : i64, scratch_operands = 0 : i64, tpu.core_type = #tpu.core_type<tc>, window_params = [{transform_indices = @transform_0, window_bounds = array<i64: 3, 8, 32>}, {transform_indices = @transform_1, window_bounds = array<i64: 3, 1, 8>}, {pipeline_mode = #tpu.pipeline_mode<synchronous>, transform_indices = @transform_2, window_bounds = array<i64: 1, 32>}, {pipeline_mode = #tpu.pipeline_mode<synchronous>, transform_indices = @transform_3, window_bounds = array<i64: 1, 32>}, {pipeline_mode = #tpu.pipeline_mode<synchronous>, transform_indices = @transform_4, window_bounds = array<i64: 2, 32, 96>}, {pipeline_mode = #tpu.pipeline_mode<synchronous>, transform_indices = @transform_5, window_bounds = array<i64: 2, 1, 96>}, {pipeline_mode = #tpu.pipeline_mode<synchronous>, transform_indices = @transform_6, window_bounds = array<i64: 2, 32, 32>}, {pipeline_mode = #tpu.pipeline_mode<synchronous>, transform_indices = @transform_7, window_bounds = array<i64: 2, 1, 32>}, {pipeline_mode = #tpu.pipeline_mode<synchronous>, transform_indices = @transform_8, window_bounds = array<i64: 2, 1, 32>}, {pipeline_mode = #tpu.pipeline_mode<synchronous>, transform_indices = @transform_9, window_bounds = array<i64: 2, 1, 32>}, {pipeline_mode = #tpu.pipeline_mode<synchronous>, transform_indices = @transform_10, window_bounds = array<i64: 2, 32, 64>}, {pipeline_mode = #tpu.pipeline_mode<synchronous>, transform_indices = @transform_11, window_bounds = array<i64: 2, 1, 64>}, {pipeline_mode = #tpu.pipeline_mode<synchronous>, transform_indices = @transform_12, window_bounds = array<i64: 2, 64, 32>}, {pipeline_mode = #tpu.pipeline_mode<synchronous>, transform_indices = @transform_13, window_bounds = array<i64: 2, 1, 32>}, {pipeline_mode = #tpu.pipeline_mode<synchronous>, transform_indices = @transform_14, window_bounds = array<i64: 2, 1, 32>}, {pipeline_mode = #tpu.pipeline_mode<synchronous>, transform_indices = @transform_15, window_bounds = array<i64: 2, 1, 32>}, {transform_indices = @transform_16, window_bounds = array<i64: 3, 8, 32>}]} {
    %c0 = arith.constant 0 : index
    %c0_0 = arith.constant 0 : index
    %c0_1 = arith.constant 0 : index
    %0 = vector.load %arg1[%c0, %c0_0, %c0_1] : memref<3x8x32xf32, #tpu.memory_space<vmem>>, vector<3x8x32xf32>
    %1 = vector.shape_cast %0 : vector<3x8x32xf32> to vector<24x32xf32>
    %c0_2 = arith.constant 0 : index
    %c0_3 = arith.constant 0 : index
    %c0_4 = arith.constant 0 : index
    %2 = vector.load %arg2[%c0_2, %c0_3, %c0_4] : memref<3x1x8xf32, #tpu.memory_space<vmem>>, vector<3x1x8xf32>
    %cst = arith.constant 1.000000e+00 : f32
    %3 = vector.broadcast %cst : f32 to vector<3x1x8xf32>
    %4 = arith.subf %2, %3 : vector<3x1x8xf32>
    %cst_5 = arith.constant 1.000000e+09 : f32
    %5 = vector.broadcast %cst_5 : f32 to vector<3x1x8xf32>
    %6 = arith.mulf %4, %5 : vector<3x1x8xf32>
    %c0_6 = arith.constant 0 : index
    %c0_7 = arith.constant 0 : index
    %7 = vector.load %arg3[%c0_6, %c0_7] : memref<1x32xf32, #tpu.memory_space<vmem>>, vector<1x32xf32>
    %c0_8 = arith.constant 0 : index
    %c0_9 = arith.constant 0 : index
    %8 = vector.load %arg4[%c0_8, %c0_9] : memref<1x32xf32, #tpu.memory_space<vmem>>, vector<1x32xf32>
    %cst_10 = arith.constant dense<0.000000e+00> : vector<24xf32>
    %9 = vector.multi_reduction <add>, %1, %cst_10 [1] : vector<24x32xf32> to vector<24xf32>
    %10 = vector.shape_cast %9 : vector<24xf32> to vector<24x1xf32>
    %cst_11 = arith.constant 3.200000e+01 : f32
    %11 = vector.broadcast %cst_11 : f32 to vector<24x1xf32>
    %12 = arith.divf %10, %11 : vector<24x1xf32>
    %13 = vector.broadcast %12 : vector<24x1xf32> to vector<24x32xf32>
    %14 = arith.subf %1, %13 : vector<24x32xf32>
    %15 = arith.mulf %14, %14 : vector<24x32xf32>
    %cst_12 = arith.constant dense<0.000000e+00> : vector<24xf32>
    %16 = vector.multi_reduction <add>, %15, %cst_12 [1] : vector<24x32xf32> to vector<24xf32>
    %17 = vector.shape_cast %16 : vector<24xf32> to vector<24x1xf32>
    %cst_13 = arith.constant 3.200000e+01 : f32
    %18 = vector.broadcast %cst_13 : f32 to vector<24x1xf32>
    %19 = arith.divf %17, %18 : vector<24x1xf32>
    %20 = vector.broadcast %12 : vector<24x1xf32> to vector<24x32xf32>
    %21 = arith.subf %1, %20 : vector<24x32xf32>
    %cst_14 = arith.constant 9.99999996E-13 : f32
    %22 = vector.broadcast %cst_14 : f32 to vector<24x1xf32>
    %23 = arith.addf %19, %22 : vector<24x1xf32>
    %24 = math.rsqrt %23 : vector<24x1xf32>
    %25 = vector.broadcast %24 : vector<24x1xf32> to vector<24x32xf32>
    %26 = arith.mulf %21, %25 : vector<24x32xf32>
    %27 = vector.broadcast %7 : vector<1x32xf32> to vector<24x32xf32>
    %28 = arith.mulf %26, %27 : vector<24x32xf32>
    %29 = vector.broadcast %8 : vector<1x32xf32> to vector<24x32xf32>
    %30 = arith.addf %28, %29 : vector<24x32xf32>
    %31 = arith.truncf %30 : vector<24x32xf32> to vector<24x32xbf16>
    %c0_15 = arith.constant 0 : index
    %c0_16 = arith.constant 0 : index
    %c0_17 = arith.constant 0 : index
    %32 = vector.load %arg5[%c0_15, %c0_16, %c0_17] : memref<2x32x96xbf16, #tpu.memory_space<vmem>>, vector<1x32x96xbf16>
    %33 = vector.shape_cast %32 : vector<1x32x96xbf16> to vector<32x96xbf16>
    %cst_18 = arith.constant dense<0.000000e+00> : vector<24x96xf32>
    %34 = tpu.matmul %31, %33, %cst_18 {dimension_numbers = #tpu.dot_dimension_numbers<[1], [0], [0], [1], [0, 0, 1, 1], [], []>} : vector<24x32xbf16>, vector<32x96xbf16>, vector<24x96xf32> -> vector<24x96xf32>
    %c0_19 = arith.constant 0 : index
    %c0_20 = arith.constant 0 : index
    %c0_21 = arith.constant 0 : index
    %35 = vector.load %arg6[%c0_19, %c0_20, %c0_21] : memref<2x1x96xf32, #tpu.memory_space<vmem>>, vector<1x1x96xf32>
    %36 = vector.shape_cast %35 : vector<1x1x96xf32> to vector<1x96xf32>
    %37 = vector.broadcast %36 : vector<1x96xf32> to vector<24x96xf32>
    %38 = arith.addf %34, %37 : vector<24x96xf32>
    %39 = vector.extract_strided_slice %38 {offsets = [0, 0], sizes = [24, 32], strides = [1, 1]} : vector<24x96xf32> to vector<24x32xf32>
    %40 = vector.shape_cast %39 : vector<24x32xf32> to vector<3x8x32xf32>
    %41 = vector.extract_strided_slice %38 {offsets = [0, 32], sizes = [24, 32], strides = [1, 1]} : vector<24x96xf32> to vector<24x32xf32>
    %42 = vector.shape_cast %41 : vector<24x32xf32> to vector<3x8x32xf32>
    %43 = vector.extract_strided_slice %38 {offsets = [0, 64], sizes = [24, 32], strides = [1, 1]} : vector<24x96xf32> to vector<24x32xf32>
    %44 = vector.shape_cast %43 : vector<24x32xf32> to vector<3x8x32xf32>
    %45 = vector.extract_strided_slice %40 {offsets = [0, 0, 0], sizes = [3, 8, 16], strides = [1, 1, 1]} : vector<3x8x32xf32> to vector<3x8x16xf32>
    %46 = arith.truncf %45 : vector<3x8x16xf32> to vector<3x8x16xbf16>
    %47 = vector.extract_strided_slice %42 {offsets = [0, 0, 0], sizes = [3, 8, 16], strides = [1, 1, 1]} : vector<3x8x32xf32> to vector<3x8x16xf32>
    %48 = arith.truncf %47 : vector<3x8x16xf32> to vector<3x8x16xbf16>
    %49 = vector.extract_strided_slice %44 {offsets = [0, 0, 0], sizes = [3, 8, 16], strides = [1, 1, 1]} : vector<3x8x32xf32> to vector<3x8x16xf32>
    %50 = arith.truncf %49 : vector<3x8x16xf32> to vector<3x8x16xbf16>
    "tpu.trace_start"() <{level = 10 : i32, message = "bqd,bkd->bqk"}> : () -> ()
    %cst_22 = arith.constant dense<0.000000e+00> : vector<3x8x8xf32>
    %51 = tpu.matmul %46, %48, %cst_22 {dimension_numbers = #tpu.dot_dimension_numbers<[2], [2], [1], [1], [0, 0, 0, 1, 1, 1], [0], [0]>} : vector<3x8x16xbf16>, vector<3x8x16xbf16>, vector<3x8x8xf32> -> vector<3x8x8xf32>
    "tpu.trace_stop"() : () -> ()
    %cst_23 = arith.constant 2.500000e-01 : f32
    %52 = vector.broadcast %cst_23 : f32 to vector<3x8x8xf32>
    %53 = arith.mulf %51, %52 : vector<3x8x8xf32>
    %54 = vector.broadcast %6 : vector<3x1x8xf32> to vector<3x8x8xf32>
    %55 = arith.addf %53, %54 : vector<3x8x8xf32>
    %cst_24 = arith.constant dense<0xFF800000> : vector<3x8xf32>
    %56 = vector.multi_reduction <maximumf>, %55, %cst_24 [2] : vector<3x8x8xf32> to vector<3x8xf32>
    %57 = vector.shape_cast %56 : vector<3x8xf32> to vector<3x8x1xf32>
    %58 = vector.broadcast %57 : vector<3x8x1xf32> to vector<3x8x8xf32>
    %59 = arith.subf %55, %58 : vector<3x8x8xf32>
    %60 = math.exp %59 : vector<3x8x8xf32>
    %cst_25 = arith.constant dense<0.000000e+00> : vector<3x8xf32>
    %61 = vector.multi_reduction <add>, %60, %cst_25 [2] : vector<3x8x8xf32> to vector<3x8xf32>
    %62 = vector.shape_cast %61 : vector<3x8xf32> to vector<3x8x1xf32>
    %63 = tpu.reciprocal %62 {approx = true} : vector<3x8x1xf32> -> vector<3x8x1xf32>
    %64 = vector.broadcast %63 : vector<3x8x1xf32> to vector<3x8x8xf32>
    %65 = arith.mulf %60, %64 : vector<3x8x8xf32>
    %66 = arith.truncf %65 : vector<3x8x8xf32> to vector<3x8x8xbf16>
    "tpu.trace_start"() <{level = 10 : i32, message = "bqk,bkd->bqd"}> : () -> ()
    %cst_26 = arith.constant dense<0.000000e+00> : vector<3x8x16xf32>
    %67 = tpu.matmul %66, %50, %cst_26 {dimension_numbers = #tpu.dot_dimension_numbers<[2], [1], [1], [2], [0, 0, 0, 1, 1, 2], [0], [0]>} : vector<3x8x8xbf16>, vector<3x8x16xbf16>, vector<3x8x16xf32> -> vector<3x8x16xf32>
    "tpu.trace_stop"() : () -> ()
    %68 = vector.extract_strided_slice %40 {offsets = [0, 0, 16], sizes = [3, 8, 16], strides = [1, 1, 1]} : vector<3x8x32xf32> to vector<3x8x16xf32>
    %69 = arith.truncf %68 : vector<3x8x16xf32> to vector<3x8x16xbf16>
    %70 = vector.extract_strided_slice %42 {offsets = [0, 0, 16], sizes = [3, 8, 16], strides = [1, 1, 1]} : vector<3x8x32xf32> to vector<3x8x16xf32>
    %71 = arith.truncf %70 : vector<3x8x16xf32> to vector<3x8x16xbf16>
    %72 = vector.extract_strided_slice %44 {offsets = [0, 0, 16], sizes = [3, 8, 16], strides = [1, 1, 1]} : vector<3x8x32xf32> to vector<3x8x16xf32>
    %73 = arith.truncf %72 : vector<3x8x16xf32> to vector<3x8x16xbf16>
    "tpu.trace_start"() <{level = 10 : i32, message = "bqd,bkd->bqk"}> : () -> ()
    %cst_27 = arith.constant dense<0.000000e+00> : vector<3x8x8xf32>
    %74 = tpu.matmul %69, %71, %cst_27 {dimension_numbers = #tpu.dot_dimension_numbers<[2], [2], [1], [1], [0, 0, 0, 1, 1, 1], [0], [0]>} : vector<3x8x16xbf16>, vector<3x8x16xbf16>, vector<3x8x8xf32> -> vector<3x8x8xf32>
    "tpu.trace_stop"() : () -> ()
    %cst_28 = arith.constant 2.500000e-01 : f32
    %75 = vector.broadcast %cst_28 : f32 to vector<3x8x8xf32>
    %76 = arith.mulf %74, %75 : vector<3x8x8xf32>
    %77 = vector.broadcast %6 : vector<3x1x8xf32> to vector<3x8x8xf32>
    %78 = arith.addf %76, %77 : vector<3x8x8xf32>
    %cst_29 = arith.constant dense<0xFF800000> : vector<3x8xf32>
    %79 = vector.multi_reduction <maximumf>, %78, %cst_29 [2] : vector<3x8x8xf32> to vector<3x8xf32>
    %80 = vector.shape_cast %79 : vector<3x8xf32> to vector<3x8x1xf32>
    %81 = vector.broadcast %80 : vector<3x8x1xf32> to vector<3x8x8xf32>
    %82 = arith.subf %78, %81 : vector<3x8x8xf32>
    %83 = math.exp %82 : vector<3x8x8xf32>
    %cst_30 = arith.constant dense<0.000000e+00> : vector<3x8xf32>
    %84 = vector.multi_reduction <add>, %83, %cst_30 [2] : vector<3x8x8xf32> to vector<3x8xf32>
    %85 = vector.shape_cast %84 : vector<3x8xf32> to vector<3x8x1xf32>
    %86 = tpu.reciprocal %85 {approx = true} : vector<3x8x1xf32> -> vector<3x8x1xf32>
    %87 = vector.broadcast %86 : vector<3x8x1xf32> to vector<3x8x8xf32>
    %88 = arith.mulf %83, %87 : vector<3x8x8xf32>
    %89 = arith.truncf %88 : vector<3x8x8xf32> to vector<3x8x8xbf16>
    "tpu.trace_start"() <{level = 10 : i32, message = "bqk,bkd->bqd"}> : () -> ()
    %cst_31 = arith.constant dense<0.000000e+00> : vector<3x8x16xf32>
    %90 = tpu.matmul %89, %73, %cst_31 {dimension_numbers = #tpu.dot_dimension_numbers<[2], [1], [1], [2], [0, 0, 0, 1, 1, 2], [0], [0]>} : vector<3x8x8xbf16>, vector<3x8x16xbf16>, vector<3x8x16xf32> -> vector<3x8x16xf32>
    "tpu.trace_stop"() : () -> ()
    %91 = tpu.concatenate %67, %90 in 2 : vector<3x8x16xf32>, vector<3x8x16xf32> -> vector<3x8x32xf32>
    %92 = vector.shape_cast %91 : vector<3x8x32xf32> to vector<24x32xf32>
    %93 = arith.truncf %92 : vector<24x32xf32> to vector<24x32xbf16>
    %c0_32 = arith.constant 0 : index
    %c0_33 = arith.constant 0 : index
    %c0_34 = arith.constant 0 : index
    %94 = vector.load %arg7[%c0_32, %c0_33, %c0_34] : memref<2x32x32xbf16, #tpu.memory_space<vmem>>, vector<1x32x32xbf16>
    %95 = vector.shape_cast %94 : vector<1x32x32xbf16> to vector<32x32xbf16>
    %cst_35 = arith.constant dense<0.000000e+00> : vector<24x32xf32>
    %96 = tpu.matmul %93, %95, %cst_35 {dimension_numbers = #tpu.dot_dimension_numbers<[1], [0], [0], [1], [0, 0, 1, 1], [], []>} : vector<24x32xbf16>, vector<32x32xbf16>, vector<24x32xf32> -> vector<24x32xf32>
    %c0_36 = arith.constant 0 : index
    %c0_37 = arith.constant 0 : index
    %c0_38 = arith.constant 0 : index
    %97 = vector.load %arg8[%c0_36, %c0_37, %c0_38] : memref<2x1x32xf32, #tpu.memory_space<vmem>>, vector<1x1x32xf32>
    %98 = vector.shape_cast %97 : vector<1x1x32xf32> to vector<1x32xf32>
    %99 = vector.broadcast %98 : vector<1x32xf32> to vector<24x32xf32>
    %100 = arith.addf %96, %99 : vector<24x32xf32>
    %101 = arith.addf %30, %100 : vector<24x32xf32>
    %c0_39 = arith.constant 0 : index
    %c0_40 = arith.constant 0 : index
    %c0_41 = arith.constant 0 : index
    %102 = vector.load %arg9[%c0_39, %c0_40, %c0_41] : memref<2x1x32xf32, #tpu.memory_space<vmem>>, vector<1x1x32xf32>
    %103 = vector.shape_cast %102 : vector<1x1x32xf32> to vector<1x32xf32>
    %c0_42 = arith.constant 0 : index
    %c0_43 = arith.constant 0 : index
    %c0_44 = arith.constant 0 : index
    %104 = vector.load %arg10[%c0_42, %c0_43, %c0_44] : memref<2x1x32xf32, #tpu.memory_space<vmem>>, vector<1x1x32xf32>
    %105 = vector.shape_cast %104 : vector<1x1x32xf32> to vector<1x32xf32>
    %cst_45 = arith.constant dense<0.000000e+00> : vector<24xf32>
    %106 = vector.multi_reduction <add>, %101, %cst_45 [1] : vector<24x32xf32> to vector<24xf32>
    %107 = vector.shape_cast %106 : vector<24xf32> to vector<24x1xf32>
    %cst_46 = arith.constant 3.200000e+01 : f32
    %108 = vector.broadcast %cst_46 : f32 to vector<24x1xf32>
    %109 = arith.divf %107, %108 : vector<24x1xf32>
    %110 = vector.broadcast %109 : vector<24x1xf32> to vector<24x32xf32>
    %111 = arith.subf %101, %110 : vector<24x32xf32>
    %112 = arith.mulf %111, %111 : vector<24x32xf32>
    %cst_47 = arith.constant dense<0.000000e+00> : vector<24xf32>
    %113 = vector.multi_reduction <add>, %112, %cst_47 [1] : vector<24x32xf32> to vector<24xf32>
    %114 = vector.shape_cast %113 : vector<24xf32> to vector<24x1xf32>
    %cst_48 = arith.constant 3.200000e+01 : f32
    %115 = vector.broadcast %cst_48 : f32 to vector<24x1xf32>
    %116 = arith.divf %114, %115 : vector<24x1xf32>
    %117 = vector.broadcast %109 : vector<24x1xf32> to vector<24x32xf32>
    %118 = arith.subf %101, %117 : vector<24x32xf32>
    %cst_49 = arith.constant 9.99999996E-13 : f32
    %119 = vector.broadcast %cst_49 : f32 to vector<24x1xf32>
    %120 = arith.addf %116, %119 : vector<24x1xf32>
    %121 = math.rsqrt %120 : vector<24x1xf32>
    %122 = vector.broadcast %121 : vector<24x1xf32> to vector<24x32xf32>
    %123 = arith.mulf %118, %122 : vector<24x32xf32>
    %124 = vector.broadcast %103 : vector<1x32xf32> to vector<24x32xf32>
    %125 = arith.mulf %123, %124 : vector<24x32xf32>
    %126 = vector.broadcast %105 : vector<1x32xf32> to vector<24x32xf32>
    %127 = arith.addf %125, %126 : vector<24x32xf32>
    %128 = arith.truncf %127 : vector<24x32xf32> to vector<24x32xbf16>
    %c0_50 = arith.constant 0 : index
    %c0_51 = arith.constant 0 : index
    %c0_52 = arith.constant 0 : index
    %129 = vector.load %arg11[%c0_50, %c0_51, %c0_52] : memref<2x32x64xbf16, #tpu.memory_space<vmem>>, vector<1x32x64xbf16>
    %130 = vector.shape_cast %129 : vector<1x32x64xbf16> to vector<32x64xbf16>
    %cst_53 = arith.constant dense<0.000000e+00> : vector<24x64xf32>
    %131 = tpu.matmul %128, %130, %cst_53 {dimension_numbers = #tpu.dot_dimension_numbers<[1], [0], [0], [1], [0, 0, 1, 1], [], []>} : vector<24x32xbf16>, vector<32x64xbf16>, vector<24x64xf32> -> vector<24x64xf32>
    %c0_54 = arith.constant 0 : index
    %c0_55 = arith.constant 0 : index
    %c0_56 = arith.constant 0 : index
    %132 = vector.load %arg12[%c0_54, %c0_55, %c0_56] : memref<2x1x64xf32, #tpu.memory_space<vmem>>, vector<1x1x64xf32>
    %133 = vector.shape_cast %132 : vector<1x1x64xf32> to vector<1x64xf32>
    %134 = vector.broadcast %133 : vector<1x64xf32> to vector<24x64xf32>
    %135 = arith.addf %131, %134 : vector<24x64xf32>
    %136 = arith.mulf %135, %135 : vector<24x64xf32>
    %137 = arith.mulf %135, %136 : vector<24x64xf32>
    %cst_57 = arith.constant 4.471500e-02 : f32
    %138 = vector.broadcast %cst_57 : f32 to vector<24x64xf32>
    %139 = arith.mulf %138, %137 : vector<24x64xf32>
    %140 = arith.addf %135, %139 : vector<24x64xf32>
    %cst_58 = arith.constant 0.797884583 : f32
    %141 = vector.broadcast %cst_58 : f32 to vector<24x64xf32>
    %142 = arith.mulf %141, %140 : vector<24x64xf32>
    %143 = math.tanh %142 : vector<24x64xf32>
    %cst_59 = arith.constant 1.000000e+00 : f32
    %144 = vector.broadcast %cst_59 : f32 to vector<24x64xf32>
    %145 = arith.addf %144, %143 : vector<24x64xf32>
    %cst_60 = arith.constant 5.000000e-01 : f32
    %146 = vector.broadcast %cst_60 : f32 to vector<24x64xf32>
    %147 = arith.mulf %146, %145 : vector<24x64xf32>
    %148 = arith.mulf %135, %147 : vector<24x64xf32>
    %149 = arith.truncf %148 : vector<24x64xf32> to vector<24x64xbf16>
    %c0_61 = arith.constant 0 : index
    %c0_62 = arith.constant 0 : index
    %c0_63 = arith.constant 0 : index
    %150 = vector.load %arg13[%c0_61, %c0_62, %c0_63] : memref<2x64x32xbf16, #tpu.memory_space<vmem>>, vector<1x64x32xbf16>
    %151 = vector.shape_cast %150 : vector<1x64x32xbf16> to vector<64x32xbf16>
    %cst_64 = arith.constant dense<0.000000e+00> : vector<24x32xf32>
    %152 = tpu.matmul %149, %151, %cst_64 {dimension_numbers = #tpu.dot_dimension_numbers<[1], [0], [0], [1], [0, 0, 1, 1], [], []>} : vector<24x64xbf16>, vector<64x32xbf16>, vector<24x32xf32> -> vector<24x32xf32>
    %c0_65 = arith.constant 0 : index
    %c0_66 = arith.constant 0 : index
    %c0_67 = arith.constant 0 : index
    %153 = vector.load %arg14[%c0_65, %c0_66, %c0_67] : memref<2x1x32xf32, #tpu.memory_space<vmem>>, vector<1x1x32xf32>
    %154 = vector.shape_cast %153 : vector<1x1x32xf32> to vector<1x32xf32>
    %155 = vector.broadcast %154 : vector<1x32xf32> to vector<24x32xf32>
    %156 = arith.addf %152, %155 : vector<24x32xf32>
    %157 = arith.addf %127, %156 : vector<24x32xf32>
    %c0_68 = arith.constant 0 : index
    %c0_69 = arith.constant 0 : index
    %c0_70 = arith.constant 0 : index
    %158 = vector.load %arg15[%c0_68, %c0_69, %c0_70] : memref<2x1x32xf32, #tpu.memory_space<vmem>>, vector<1x1x32xf32>
    %159 = vector.shape_cast %158 : vector<1x1x32xf32> to vector<1x32xf32>
    %c0_71 = arith.constant 0 : index
    %c0_72 = arith.constant 0 : index
    %c0_73 = arith.constant 0 : index
    %160 = vector.load %arg16[%c0_71, %c0_72, %c0_73] : memref<2x1x32xf32, #tpu.memory_space<vmem>>, vector<1x1x32xf32>
    %161 = vector.shape_cast %160 : vector<1x1x32xf32> to vector<1x32xf32>
    %cst_74 = arith.constant dense<0.000000e+00> : vector<24xf32>
    %162 = vector.multi_reduction <add>, %157, %cst_74 [1] : vector<24x32xf32> to vector<24xf32>
    %163 = vector.shape_cast %162 : vector<24xf32> to vector<24x1xf32>
    %cst_75 = arith.constant 3.200000e+01 : f32
    %164 = vector.broadcast %cst_75 : f32 to vector<24x1xf32>
    %165 = arith.divf %163, %164 : vector<24x1xf32>
    %166 = vector.broadcast %165 : vector<24x1xf32> to vector<24x32xf32>
    %167 = arith.subf %157, %166 : vector<24x32xf32>
    %168 = arith.mulf %167, %167 : vector<24x32xf32>
    %cst_76 = arith.constant dense<0.000000e+00> : vector<24xf32>
    %169 = vector.multi_reduction <add>, %168, %cst_76 [1] : vector<24x32xf32> to vector<24xf32>
    %170 = vector.shape_cast %169 : vector<24xf32> to vector<24x1xf32>
    %cst_77 = arith.constant 3.200000e+01 : f32
    %171 = vector.broadcast %cst_77 : f32 to vector<24x1xf32>
    %172 = arith.divf %170, %171 : vector<24x1xf32>
    %173 = vector.broadcast %165 : vector<24x1xf32> to vector<24x32xf32>
    %174 = arith.subf %157, %173 : vector<24x32xf32>
    %cst_78 = arith.constant 9.99999996E-13 : f32
    %175 = vector.broadcast %cst_78 : f32 to vector<24x1xf32>
    %176 = arith.addf %172, %175 : vector<24x1xf32>
    %177 = math.rsqrt %176 : vector<24x1xf32>
    %178 = vector.broadcast %177 : vector<24x1xf32> to vector<24x32xf32>
    %179 = arith.mulf %174, %178 : vector<24x32xf32>
    %180 = vector.broadcast %159 : vector<1x32xf32> to vector<24x32xf32>
    %181 = arith.mulf %179, %180 : vector<24x32xf32>
    %182 = vector.broadcast %161 : vector<1x32xf32> to vector<24x32xf32>
    %183 = arith.addf %181, %182 : vector<24x32xf32>
    %184 = arith.truncf %183 : vector<24x32xf32> to vector<24x32xbf16>
    %c1 = arith.constant 1 : index
    %c0_79 = arith.constant 0 : index
    %c0_80 = arith.constant 0 : index
    %185 = vector.load %arg5[%c1, %c0_79, %c0_80] : memref<2x32x96xbf16, #tpu.memory_space<vmem>>, vector<1x32x96xbf16>
    %186 = vector.shape_cast %185 : vector<1x32x96xbf16> to vector<32x96xbf16>
    %cst_81 = arith.constant dense<0.000000e+00> : vector<24x96xf32>
    %187 = tpu.matmul %184, %186, %cst_81 {dimension_numbers = #tpu.dot_dimension_numbers<[1], [0], [0], [1], [0, 0, 1, 1], [], []>} : vector<24x32xbf16>, vector<32x96xbf16>, vector<24x96xf32> -> vector<24x96xf32>
    %c1_82 = arith.constant 1 : index
    %c0_83 = arith.constant 0 : index
    %c0_84 = arith.constant 0 : index
    %188 = vector.load %arg6[%c1_82, %c0_83, %c0_84] : memref<2x1x96xf32, #tpu.memory_space<vmem>>, vector<1x1x96xf32>
    %189 = vector.shape_cast %188 : vector<1x1x96xf32> to vector<1x96xf32>
    %190 = vector.broadcast %189 : vector<1x96xf32> to vector<24x96xf32>
    %191 = arith.addf %187, %190 : vector<24x96xf32>
    %192 = vector.extract_strided_slice %191 {offsets = [0, 0], sizes = [24, 32], strides = [1, 1]} : vector<24x96xf32> to vector<24x32xf32>
    %193 = vector.shape_cast %192 : vector<24x32xf32> to vector<3x8x32xf32>
    %194 = vector.extract_strided_slice %191 {offsets = [0, 32], sizes = [24, 32], strides = [1, 1]} : vector<24x96xf32> to vector<24x32xf32>
    %195 = vector.shape_cast %194 : vector<24x32xf32> to vector<3x8x32xf32>
    %196 = vector.extract_strided_slice %191 {offsets = [0, 64], sizes = [24, 32], strides = [1, 1]} : vector<24x96xf32> to vector<24x32xf32>
    %197 = vector.shape_cast %196 : vector<24x32xf32> to vector<3x8x32xf32>
    %198 = vector.extract_strided_slice %193 {offsets = [0, 0, 0], sizes = [3, 8, 16], strides = [1, 1, 1]} : vector<3x8x32xf32> to vector<3x8x16xf32>
    %199 = arith.truncf %198 : vector<3x8x16xf32> to vector<3x8x16xbf16>
    %200 = vector.extract_strided_slice %195 {offsets = [0, 0, 0], sizes = [3, 8, 16], strides = [1, 1, 1]} : vector<3x8x32xf32> to vector<3x8x16xf32>
    %201 = arith.truncf %200 : vector<3x8x16xf32> to vector<3x8x16xbf16>
    %202 = vector.extract_strided_slice %197 {offsets = [0, 0, 0], sizes = [3, 8, 16], strides = [1, 1, 1]} : vector<3x8x32xf32> to vector<3x8x16xf32>
    %203 = arith.truncf %202 : vector<3x8x16xf32> to vector<3x8x16xbf16>
    "tpu.trace_start"() <{level = 10 : i32, message = "bqd,bkd->bqk"}> : () -> ()
    %cst_85 = arith.constant dense<0.000000e+00> : vector<3x8x8xf32>
    %204 = tpu.matmul %199, %201, %cst_85 {dimension_numbers = #tpu.dot_dimension_numbers<[2], [2], [1], [1], [0, 0, 0, 1, 1, 1], [0], [0]>} : vector<3x8x16xbf16>, vector<3x8x16xbf16>, vector<3x8x8xf32> -> vector<3x8x8xf32>
    "tpu.trace_stop"() : () -> ()
    %cst_86 = arith.constant 2.500000e-01 : f32
    %205 = vector.broadcast %cst_86 : f32 to vector<3x8x8xf32>
    %206 = arith.mulf %204, %205 : vector<3x8x8xf32>
    %207 = vector.broadcast %6 : vector<3x1x8xf32> to vector<3x8x8xf32>
    %208 = arith.addf %206, %207 : vector<3x8x8xf32>
    %cst_87 = arith.constant dense<0xFF800000> : vector<3x8xf32>
    %209 = vector.multi_reduction <maximumf>, %208, %cst_87 [2] : vector<3x8x8xf32> to vector<3x8xf32>
    %210 = vector.shape_cast %209 : vector<3x8xf32> to vector<3x8x1xf32>
    %211 = vector.broadcast %210 : vector<3x8x1xf32> to vector<3x8x8xf32>
    %212 = arith.subf %208, %211 : vector<3x8x8xf32>
    %213 = math.exp %212 : vector<3x8x8xf32>
    %cst_88 = arith.constant dense<0.000000e+00> : vector<3x8xf32>
    %214 = vector.multi_reduction <add>, %213, %cst_88 [2] : vector<3x8x8xf32> to vector<3x8xf32>
    %215 = vector.shape_cast %214 : vector<3x8xf32> to vector<3x8x1xf32>
    %216 = tpu.reciprocal %215 {approx = true} : vector<3x8x1xf32> -> vector<3x8x1xf32>
    %217 = vector.broadcast %216 : vector<3x8x1xf32> to vector<3x8x8xf32>
    %218 = arith.mulf %213, %217 : vector<3x8x8xf32>
    %219 = arith.truncf %218 : vector<3x8x8xf32> to vector<3x8x8xbf16>
    "tpu.trace_start"() <{level = 10 : i32, message = "bqk,bkd->bqd"}> : () -> ()
    %cst_89 = arith.constant dense<0.000000e+00> : vector<3x8x16xf32>
    %220 = tpu.matmul %219, %203, %cst_89 {dimension_numbers = #tpu.dot_dimension_numbers<[2], [1], [1], [2], [0, 0, 0, 1, 1, 2], [0], [0]>} : vector<3x8x8xbf16>, vector<3x8x16xbf16>, vector<3x8x16xf32> -> vector<3x8x16xf32>
    "tpu.trace_stop"() : () -> ()
    %221 = vector.extract_strided_slice %193 {offsets = [0, 0, 16], sizes = [3, 8, 16], strides = [1, 1, 1]} : vector<3x8x32xf32> to vector<3x8x16xf32>
    %222 = arith.truncf %221 : vector<3x8x16xf32> to vector<3x8x16xbf16>
    %223 = vector.extract_strided_slice %195 {offsets = [0, 0, 16], sizes = [3, 8, 16], strides = [1, 1, 1]} : vector<3x8x32xf32> to vector<3x8x16xf32>
    %224 = arith.truncf %223 : vector<3x8x16xf32> to vector<3x8x16xbf16>
    %225 = vector.extract_strided_slice %197 {offsets = [0, 0, 16], sizes = [3, 8, 16], strides = [1, 1, 1]} : vector<3x8x32xf32> to vector<3x8x16xf32>
    %226 = arith.truncf %225 : vector<3x8x16xf32> to vector<3x8x16xbf16>
    "tpu.trace_start"() <{level = 10 : i32, message = "bqd,bkd->bqk"}> : () -> ()
    %cst_90 = arith.constant dense<0.000000e+00> : vector<3x8x8xf32>
    %227 = tpu.matmul %222, %224, %cst_90 {dimension_numbers = #tpu.dot_dimension_numbers<[2], [2], [1], [1], [0, 0, 0, 1, 1, 1], [0], [0]>} : vector<3x8x16xbf16>, vector<3x8x16xbf16>, vector<3x8x8xf32> -> vector<3x8x8xf32>
    "tpu.trace_stop"() : () -> ()
    %cst_91 = arith.constant 2.500000e-01 : f32
    %228 = vector.broadcast %cst_91 : f32 to vector<3x8x8xf32>
    %229 = arith.mulf %227, %228 : vector<3x8x8xf32>
    %230 = vector.broadcast %6 : vector<3x1x8xf32> to vector<3x8x8xf32>
    %231 = arith.addf %229, %230 : vector<3x8x8xf32>
    %cst_92 = arith.constant dense<0xFF800000> : vector<3x8xf32>
    %232 = vector.multi_reduction <maximumf>, %231, %cst_92 [2] : vector<3x8x8xf32> to vector<3x8xf32>
    %233 = vector.shape_cast %232 : vector<3x8xf32> to vector<3x8x1xf32>
    %234 = vector.broadcast %233 : vector<3x8x1xf32> to vector<3x8x8xf32>
    %235 = arith.subf %231, %234 : vector<3x8x8xf32>
    %236 = math.exp %235 : vector<3x8x8xf32>
    %cst_93 = arith.constant dense<0.000000e+00> : vector<3x8xf32>
    %237 = vector.multi_reduction <add>, %236, %cst_93 [2] : vector<3x8x8xf32> to vector<3x8xf32>
    %238 = vector.shape_cast %237 : vector<3x8xf32> to vector<3x8x1xf32>
    %239 = tpu.reciprocal %238 {approx = true} : vector<3x8x1xf32> -> vector<3x8x1xf32>
    %240 = vector.broadcast %239 : vector<3x8x1xf32> to vector<3x8x8xf32>
    %241 = arith.mulf %236, %240 : vector<3x8x8xf32>
    %242 = arith.truncf %241 : vector<3x8x8xf32> to vector<3x8x8xbf16>
    "tpu.trace_start"() <{level = 10 : i32, message = "bqk,bkd->bqd"}> : () -> ()
    %cst_94 = arith.constant dense<0.000000e+00> : vector<3x8x16xf32>
    %243 = tpu.matmul %242, %226, %cst_94 {dimension_numbers = #tpu.dot_dimension_numbers<[2], [1], [1], [2], [0, 0, 0, 1, 1, 2], [0], [0]>} : vector<3x8x8xbf16>, vector<3x8x16xbf16>, vector<3x8x16xf32> -> vector<3x8x16xf32>
    "tpu.trace_stop"() : () -> ()
    %244 = tpu.concatenate %220, %243 in 2 : vector<3x8x16xf32>, vector<3x8x16xf32> -> vector<3x8x32xf32>
    %245 = vector.shape_cast %244 : vector<3x8x32xf32> to vector<24x32xf32>
    %246 = arith.truncf %245 : vector<24x32xf32> to vector<24x32xbf16>
    %c1_95 = arith.constant 1 : index
    %c0_96 = arith.constant 0 : index
    %c0_97 = arith.constant 0 : index
    %247 = vector.load %arg7[%c1_95, %c0_96, %c0_97] : memref<2x32x32xbf16, #tpu.memory_space<vmem>>, vector<1x32x32xbf16>
    %248 = vector.shape_cast %247 : vector<1x32x32xbf16> to vector<32x32xbf16>
    %cst_98 = arith.constant dense<0.000000e+00> : vector<24x32xf32>
    %249 = tpu.matmul %246, %248, %cst_98 {dimension_numbers = #tpu.dot_dimension_numbers<[1], [0], [0], [1], [0, 0, 1, 1], [], []>} : vector<24x32xbf16>, vector<32x32xbf16>, vector<24x32xf32> -> vector<24x32xf32>
    %c1_99 = arith.constant 1 : index
    %c0_100 = arith.constant 0 : index
    %c0_101 = arith.constant 0 : index
    %250 = vector.load %arg8[%c1_99, %c0_100, %c0_101] : memref<2x1x32xf32, #tpu.memory_space<vmem>>, vector<1x1x32xf32>
    %251 = vector.shape_cast %250 : vector<1x1x32xf32> to vector<1x32xf32>
    %252 = vector.broadcast %251 : vector<1x32xf32> to vector<24x32xf32>
    %253 = arith.addf %249, %252 : vector<24x32xf32>
    %254 = arith.addf %183, %253 : vector<24x32xf32>
    %c1_102 = arith.constant 1 : index
    %c0_103 = arith.constant 0 : index
    %c0_104 = arith.constant 0 : index
    %255 = vector.load %arg9[%c1_102, %c0_103, %c0_104] : memref<2x1x32xf32, #tpu.memory_space<vmem>>, vector<1x1x32xf32>
    %256 = vector.shape_cast %255 : vector<1x1x32xf32> to vector<1x32xf32>
    %c1_105 = arith.constant 1 : index
    %c0_106 = arith.constant 0 : index
    %c0_107 = arith.constant 0 : index
    %257 = vector.load %arg10[%c1_105, %c0_106, %c0_107] : memref<2x1x32xf32, #tpu.memory_space<vmem>>, vector<1x1x32xf32>
    %258 = vector.shape_cast %257 : vector<1x1x32xf32> to vector<1x32xf32>
    %cst_108 = arith.constant dense<0.000000e+00> : vector<24xf32>
    %259 = vector.multi_reduction <add>, %254, %cst_108 [1] : vector<24x32xf32> to vector<24xf32>
    %260 = vector.shape_cast %259 : vector<24xf32> to vector<24x1xf32>
    %cst_109 = arith.constant 3.200000e+01 : f32
    %261 = vector.broadcast %cst_109 : f32 to vector<24x1xf32>
    %262 = arith.divf %260, %261 : vector<24x1xf32>
    %263 = vector.broadcast %262 : vector<24x1xf32> to vector<24x32xf32>
    %264 = arith.subf %254, %263 : vector<24x32xf32>
    %265 = arith.mulf %264, %264 : vector<24x32xf32>
    %cst_110 = arith.constant dense<0.000000e+00> : vector<24xf32>
    %266 = vector.multi_reduction <add>, %265, %cst_110 [1] : vector<24x32xf32> to vector<24xf32>
    %267 = vector.shape_cast %266 : vector<24xf32> to vector<24x1xf32>
    %cst_111 = arith.constant 3.200000e+01 : f32
    %268 = vector.broadcast %cst_111 : f32 to vector<24x1xf32>
    %269 = arith.divf %267, %268 : vector<24x1xf32>
    %270 = vector.broadcast %262 : vector<24x1xf32> to vector<24x32xf32>
    %271 = arith.subf %254, %270 : vector<24x32xf32>
    %cst_112 = arith.constant 9.99999996E-13 : f32
    %272 = vector.broadcast %cst_112 : f32 to vector<24x1xf32>
    %273 = arith.addf %269, %272 : vector<24x1xf32>
    %274 = math.rsqrt %273 : vector<24x1xf32>
    %275 = vector.broadcast %274 : vector<24x1xf32> to vector<24x32xf32>
    %276 = arith.mulf %271, %275 : vector<24x32xf32>
    %277 = vector.broadcast %256 : vector<1x32xf32> to vector<24x32xf32>
    %278 = arith.mulf %276, %277 : vector<24x32xf32>
    %279 = vector.broadcast %258 : vector<1x32xf32> to vector<24x32xf32>
    %280 = arith.addf %278, %279 : vector<24x32xf32>
    %281 = arith.truncf %280 : vector<24x32xf32> to vector<24x32xbf16>
    %c1_113 = arith.constant 1 : index
    %c0_114 = arith.constant 0 : index
    %c0_115 = arith.constant 0 : index
    %282 = vector.load %arg11[%c1_113, %c0_114, %c0_115] : memref<2x32x64xbf16, #tpu.memory_space<vmem>>, vector<1x32x64xbf16>
    %283 = vector.shape_cast %282 : vector<1x32x64xbf16> to vector<32x64xbf16>
    %cst_116 = arith.constant dense<0.000000e+00> : vector<24x64xf32>
    %284 = tpu.matmul %281, %283, %cst_116 {dimension_numbers = #tpu.dot_dimension_numbers<[1], [0], [0], [1], [0, 0, 1, 1], [], []>} : vector<24x32xbf16>, vector<32x64xbf16>, vector<24x64xf32> -> vector<24x64xf32>
    %c1_117 = arith.constant 1 : index
    %c0_118 = arith.constant 0 : index
    %c0_119 = arith.constant 0 : index
    %285 = vector.load %arg12[%c1_117, %c0_118, %c0_119] : memref<2x1x64xf32, #tpu.memory_space<vmem>>, vector<1x1x64xf32>
    %286 = vector.shape_cast %285 : vector<1x1x64xf32> to vector<1x64xf32>
    %287 = vector.broadcast %286 : vector<1x64xf32> to vector<24x64xf32>
    %288 = arith.addf %284, %287 : vector<24x64xf32>
    %289 = arith.mulf %288, %288 : vector<24x64xf32>
    %290 = arith.mulf %288, %289 : vector<24x64xf32>
    %cst_120 = arith.constant 4.471500e-02 : f32
    %291 = vector.broadcast %cst_120 : f32 to vector<24x64xf32>
    %292 = arith.mulf %291, %290 : vector<24x64xf32>
    %293 = arith.addf %288, %292 : vector<24x64xf32>
    %cst_121 = arith.constant 0.797884583 : f32
    %294 = vector.broadcast %cst_121 : f32 to vector<24x64xf32>
    %295 = arith.mulf %294, %293 : vector<24x64xf32>
    %296 = math.tanh %295 : vector<24x64xf32>
    %cst_122 = arith.constant 1.000000e+00 : f32
    %297 = vector.broadcast %cst_122 : f32 to vector<24x64xf32>
    %298 = arith.addf %297, %296 : vector<24x64xf32>
    %cst_123 = arith.constant 5.000000e-01 : f32
    %299 = vector.broadcast %cst_123 : f32 to vector<24x64xf32>
    %300 = arith.mulf %299, %298 : vector<24x64xf32>
    %301 = arith.mulf %288, %300 : vector<24x64xf32>
    %302 = arith.truncf %301 : vector<24x64xf32> to vector<24x64xbf16>
    %c1_124 = arith.constant 1 : index
    %c0_125 = arith.constant 0 : index
    %c0_126 = arith.constant 0 : index
    %303 = vector.load %arg13[%c1_124, %c0_125, %c0_126] : memref<2x64x32xbf16, #tpu.memory_space<vmem>>, vector<1x64x32xbf16>
    %304 = vector.shape_cast %303 : vector<1x64x32xbf16> to vector<64x32xbf16>
    %cst_127 = arith.constant dense<0.000000e+00> : vector<24x32xf32>
    %305 = tpu.matmul %302, %304, %cst_127 {dimension_numbers = #tpu.dot_dimension_numbers<[1], [0], [0], [1], [0, 0, 1, 1], [], []>} : vector<24x64xbf16>, vector<64x32xbf16>, vector<24x32xf32> -> vector<24x32xf32>
    %c1_128 = arith.constant 1 : index
    %c0_129 = arith.constant 0 : index
    %c0_130 = arith.constant 0 : index
    %306 = vector.load %arg14[%c1_128, %c0_129, %c0_130] : memref<2x1x32xf32, #tpu.memory_space<vmem>>, vector<1x1x32xf32>
    %307 = vector.shape_cast %306 : vector<1x1x32xf32> to vector<1x32xf32>
    %308 = vector.broadcast %307 : vector<1x32xf32> to vector<24x32xf32>
    %309 = arith.addf %305, %308 : vector<24x32xf32>
    %310 = arith.addf %280, %309 : vector<24x32xf32>
    %c1_131 = arith.constant 1 : index
    %c0_132 = arith.constant 0 : index
    %c0_133 = arith.constant 0 : index
    %311 = vector.load %arg15[%c1_131, %c0_132, %c0_133] : memref<2x1x32xf32, #tpu.memory_space<vmem>>, vector<1x1x32xf32>
    %312 = vector.shape_cast %311 : vector<1x1x32xf32> to vector<1x32xf32>
    %c1_134 = arith.constant 1 : index
    %c0_135 = arith.constant 0 : index
    %c0_136 = arith.constant 0 : index
    %313 = vector.load %arg16[%c1_134, %c0_135, %c0_136] : memref<2x1x32xf32, #tpu.memory_space<vmem>>, vector<1x1x32xf32>
    %314 = vector.shape_cast %313 : vector<1x1x32xf32> to vector<1x32xf32>
    %cst_137 = arith.constant dense<0.000000e+00> : vector<24xf32>
    %315 = vector.multi_reduction <add>, %310, %cst_137 [1] : vector<24x32xf32> to vector<24xf32>
    %316 = vector.shape_cast %315 : vector<24xf32> to vector<24x1xf32>
    %cst_138 = arith.constant 3.200000e+01 : f32
    %317 = vector.broadcast %cst_138 : f32 to vector<24x1xf32>
    %318 = arith.divf %316, %317 : vector<24x1xf32>
    %319 = vector.broadcast %318 : vector<24x1xf32> to vector<24x32xf32>
    %320 = arith.subf %310, %319 : vector<24x32xf32>
    %321 = arith.mulf %320, %320 : vector<24x32xf32>
    %cst_139 = arith.constant dense<0.000000e+00> : vector<24xf32>
    %322 = vector.multi_reduction <add>, %321, %cst_139 [1] : vector<24x32xf32> to vector<24xf32>
    %323 = vector.shape_cast %322 : vector<24xf32> to vector<24x1xf32>
    %cst_140 = arith.constant 3.200000e+01 : f32
    %324 = vector.broadcast %cst_140 : f32 to vector<24x1xf32>
    %325 = arith.divf %323, %324 : vector<24x1xf32>
    %326 = vector.broadcast %318 : vector<24x1xf32> to vector<24x32xf32>
    %327 = arith.subf %310, %326 : vector<24x32xf32>
    %cst_141 = arith.constant 9.99999996E-13 : f32
    %328 = vector.broadcast %cst_141 : f32 to vector<24x1xf32>
    %329 = arith.addf %325, %328 : vector<24x1xf32>
    %330 = math.rsqrt %329 : vector<24x1xf32>
    %331 = vector.broadcast %330 : vector<24x1xf32> to vector<24x32xf32>
    %332 = arith.mulf %327, %331 : vector<24x32xf32>
    %333 = vector.broadcast %312 : vector<1x32xf32> to vector<24x32xf32>
    %334 = arith.mulf %332, %333 : vector<24x32xf32>
    %335 = vector.broadcast %314 : vector<1x32xf32> to vector<24x32xf32>
    %336 = arith.addf %334, %335 : vector<24x32xf32>
    %337 = vector.shape_cast %336 : vector<24x32xf32> to vector<3x8x32xf32>
    %c0_142 = arith.constant 0 : index
    %c0_143 = arith.constant 0 : index
    %c0_144 = arith.constant 0 : index
    %338 = vector.load %arg17[%c0_142, %c0_143, %c0_144] : memref<3x8x32xf32, #tpu.memory_space<vmem>>, vector<3x8x32xf32>
    tpu.vector_store %arg17[%c0_142, %c0_143, %c0_144], %337 {strides = array<i32>} : memref<3x8x32xf32, #tpu.memory_space<vmem>>, vector<3x8x32xf32>,
    return
  }
  func.func @transform_0(%arg0: i32) -> (i32, i32, i32) {
    %c0_i32 = arith.constant 0 : i32
    %c0_i32_0 = arith.constant 0 : i32
    %c0_i32_1 = arith.constant 0 : i32
    return %arg0, %c0_i32, %c0_i32_0 : i32, i32, i32
  }
  func.func @transform_1(%arg0: i32) -> (i32, i32, i32) {
    %c0_i32 = arith.constant 0 : i32
    %c0_i32_0 = arith.constant 0 : i32
    %c0_i32_1 = arith.constant 0 : i32
    return %arg0, %c0_i32, %c0_i32_0 : i32, i32, i32
  }
  func.func @transform_2(%arg0: i32) -> (i32, i32) {
    %c0_i32 = arith.constant 0 : i32
    %c0_i32_0 = arith.constant 0 : i32
    %c0_i32_1 = arith.constant 0 : i32
    return %c0_i32, %c0_i32_0 : i32, i32
  }
  func.func @transform_3(%arg0: i32) -> (i32, i32) {
    %c0_i32 = arith.constant 0 : i32
    %c0_i32_0 = arith.constant 0 : i32
    %c0_i32_1 = arith.constant 0 : i32
    return %c0_i32, %c0_i32_0 : i32, i32
  }
  func.func @transform_4(%arg0: i32) -> (i32, i32, i32) {
    %c0_i32 = arith.constant 0 : i32
    %c0_i32_0 = arith.constant 0 : i32
    %c0_i32_1 = arith.constant 0 : i32
    %c0_i32_2 = arith.constant 0 : i32
    return %c0_i32, %c0_i32_0, %c0_i32_1 : i32, i32, i32
  }
  func.func @transform_5(%arg0: i32) -> (i32, i32, i32) {
    %c0_i32 = arith.constant 0 : i32
    %c0_i32_0 = arith.constant 0 : i32
    %c0_i32_1 = arith.constant 0 : i32
    %c0_i32_2 = arith.constant 0 : i32
    return %c0_i32, %c0_i32_0, %c0_i32_1 : i32, i32, i32
  }
  func.func @transform_6(%arg0: i32) -> (i32, i32, i32) {
    %c0_i32 = arith.constant 0 : i32
    %c0_i32_0 = arith.constant 0 : i32
    %c0_i32_1 = arith.constant 0 : i32
    %c0_i32_2 = arith.constant 0 : i32
    return %c0_i32, %c0_i32_0, %c0_i32_1 : i32, i32, i32
  }
  func.func @transform_7(%arg0: i32) -> (i32, i32, i32) {
    %c0_i32 = arith.constant 0 : i32
    %c0_i32_0 = arith.constant 0 : i32
    %c0_i32_1 = arith.constant 0 : i32
    %c0_i32_2 = arith.constant 0 : i32
    return %c0_i32, %c0_i32_0, %c0_i32_1 : i32, i32, i32
  }
  func.func @transform_8(%arg0: i32) -> (i32, i32, i32) {
    %c0_i32 = arith.constant 0 : i32
    %c0_i32_0 = arith.constant 0 : i32
    %c0_i32_1 = arith.constant 0 : i32
    %c0_i32_2 = arith.constant 0 : i32
    return %c0_i32, %c0_i32_0, %c0_i32_1 : i32, i32, i32
  }
  func.func @transform_9(%arg0: i32) -> (i32, i32, i32) {
    %c0_i32 = arith.constant 0 : i32
    %c0_i32_0 = arith.constant 0 : i32
    %c0_i32_1 = arith.constant 0 : i32
    %c0_i32_2 = arith.constant 0 : i32
    return %c0_i32, %c0_i32_0, %c0_i32_1 : i32, i32, i32
  }
  func.func @transform_10(%arg0: i32) -> (i32, i32, i32) {
    %c0_i32 = arith.constant 0 : i32
    %c0_i32_0 = arith.constant 0 : i32
    %c0_i32_1 = arith.constant 0 : i32
    %c0_i32_2 = arith.constant 0 : i32
    return %c0_i32, %c0_i32_0, %c0_i32_1 : i32, i32, i32
  }
  func.func @transform_11(%arg0: i32) -> (i32, i32, i32) {
    %c0_i32 = arith.constant 0 : i32
    %c0_i32_0 = arith.constant 0 : i32
    %c0_i32_1 = arith.constant 0 : i32
    %c0_i32_2 = arith.constant 0 : i32
    return %c0_i32, %c0_i32_0, %c0_i32_1 : i32, i32, i32
  }
  func.func @transform_12(%arg0: i32) -> (i32, i32, i32) {
    %c0_i32 = arith.constant 0 : i32
    %c0_i32_0 = arith.constant 0 : i32
    %c0_i32_1 = arith.constant 0 : i32
    %c0_i32_2 = arith.constant 0 : i32
    return %c0_i32, %c0_i32_0, %c0_i32_1 : i32, i32, i32
  }
  func.func @transform_13(%arg0: i32) -> (i32, i32, i32) {
    %c0_i32 = arith.constant 0 : i32
    %c0_i32_0 = arith.constant 0 : i32
    %c0_i32_1 = arith.constant 0 : i32
    %c0_i32_2 = arith.constant 0 : i32
    return %c0_i32, %c0_i32_0, %c0_i32_1 : i32, i32, i32
  }
  func.func @transform_14(%arg0: i32) -> (i32, i32, i32) {
    %c0_i32 = arith.constant 0 : i32
    %c0_i32_0 = arith.constant 0 : i32
    %c0_i32_1 = arith.constant 0 : i32
    %c0_i32_2 = arith.constant 0 : i32
    return %c0_i32, %c0_i32_0, %c0_i32_1 : i32, i32, i32
  }
  func.func @transform_15(%arg0: i32) -> (i32, i32, i32) {
    %c0_i32 = arith.constant 0 : i32
    %c0_i32_0 = arith.constant 0 : i32
    %c0_i32_1 = arith.constant 0 : i32
    %c0_i32_2 = arith.constant 0 : i32
    return %c0_i32, %c0_i32_0, %c0_i32_1 : i32, i32, i32
  }
  func.func @transform_16(%arg0: i32) -> (i32, i32, i32) {
    %c0_i32 = arith.constant 0 : i32
    %c0_i32_0 = arith.constant 0 : i32
    %c0_i32_1 = arith.constant 0 : i32
    return %arg0, %c0_i32, %c0_i32_0 : i32, i32, i32
  }
}

</mosaic_0001>

<bundles_post_ra>
// kernel: e5_forward.3
= control target key start
LH: loop header
LB: loop body
LE: loop exit
PB: predicated region body
PF: predicated region fallthrough
CT: control target
= control target key end

     0   :  { %vm152_vm0 = vcmask 60416   ;;  %v24_v1 = vlaneseq  ;;  %s736_s0 = inlined_call_operand.vmem [shape: f32[6,8,32], index: 0, kind: input, shape index: {}]   ;;  %s737_s1 = inlined_call_operand.vmem [shape: f32[2,8], index: 1, kind: input, shape index: {}]   ;;  %s738_s2 = inlined_call_operand.vmem [shape: f32[4,8], index: 2, kind: input, shape index: {}]   ;;  %s739_s3 = inlined_call_operand.hbm [shape: f32[2,4], index: 3, kind: output, shape index: {}]  }
   0x1   :  { %v22_v0 = vld [vmem:[%s738_s2] sm:$0xf] }
   0x2   :  { %v153_v2 = vsel %vm152_vm0, %v22_v0, 0.0 }
   0x3   :  { %8 = vsyncpa [#allocation3], 0  ;;  %154 = vadd.xlane.f32.xlu0 %v153_v2  ;;  %v25_v3 = vshrl.u32 %v24_v1, 7  ;;  %v106_v4 = vperm.slane %v22_v0, 2  ;;  %v92_v5 = vperm.slane %v22_v0, 0  ;;  %v113_v6 = vperm.slane %v22_v0, 3 }
   0x4   :  { %v99_v7 = vperm.slane %v22_v0, 1  ;;  %v21_v8 = vld [vmem:[%s737_s1] sm:$0x3]  ;;  %vm54_vm1 = vcmask 58368   ;;  %v17_v13 = vld [vmem:[%s736_s0 + $0x10] sm:$0xff]  ;;  %v20_v15 = vld [vmem:[%s736_s0 + $0x28] sm:$0xff] }
   0x5   :  { %445 = vset.pattern.permute.xlu1 %v25_v3  ;;  %444 = vset.pattern.permute.xlu0 %v25_v3  ;;  %v30_v9 = vperm.slane %v21_v8, 1  ;;  %v23_v10 = vperm.slane %v21_v8, 0  ;;  %v55_v11 = vsel %vm54_vm1, %v21_v8, 0.0  ;;  %vm39_vm2 = vcmask 261120   ;;  %v19_v25 = vld [vmem:[%s736_s0 + $0x20] sm:$0xff]  ;;  %v18_v52 = vld [vmem:[%s736_s0 + $0x18] sm:$0xff] }
   0x6   :  { %446 = vset.pattern.permute.xlu2 %v25_v3  ;;  %s432_s29 = sshll.u32 %s739_s3, 4  ;;  %s433_s29 = int_to_ptr.hbm [resolvable:$true] %s432_s29 }
   0xd   :  { %111 = vperm.xlu1 %445, %v106_v4  }
   0xe   :  { %97 = vperm.xlu2 %446, %v92_v5  }
  0x16   :  { %118 = vperm.xlu2 %446, %v113_v6  }
  0x17   :  { %104 = vperm.xlu0 %444, %v99_v7  }
  0x1e   :  { %35 = vperm.xlu2 %446, %v30_v9  }
  0x26   :  { %28 = vperm.xlu2 %446, %v23_v10  }
  0x37   :  { %56 = vadd.xlane.f32.xlu1 %v55_v11 }
  0x68   :  { %v98_v12 = vpop.permute.xlu2 %97 }
  0x69   :  { %v120_v14 = vmul.f32 %v98_v12, %v17_v13 }
  0x6b   :  { %v124_v19 = vsel %vm39_vm2, %v120_v14, 0.0 }
  0x6c   :  { %v125_v23 = vrot.slane %v124_v19, 4 }
  0x6e   :  { %v126_v28 = vadd.f32 %v125_v23, %v124_v19 }
  0x70   :  { %v119_v16 = vpop.permute.xlu2 %118  ;;  %v127_v36 = vrot.slane %v126_v28, 2 }
  0x71   :  { %v123_v18 = vmul.f32 %v119_v16, %v20_v15 }
  0x72   :  { %v571_v46 = vadd.f32 %v127_v36, %v126_v28 }
  0x73   :  { %v145_v24 = vsel %vm39_vm2, %v123_v18, 0.0 }
  0x74   :  { %v146_v26 = vrot.slane %v145_v24, 4 }
  0x76   :  { %v534_v17 = vpop.xlane.xlu0 %154  ;;  %v147_v35 = vadd.f32 %v146_v26, %v145_v24 }
  0x77   :  { %v538_v20 = vrot.slane %v534_v17, 1  ;;  %v541_v21 = vrot.slane %v534_v17, 2  ;;  %v544_v22 = vrot.slane %v534_v17, 3  ;;  %447 = vrcp.f32 %v534_v17 }
  0x78   :  { %v148_v45 = vrot.slane %v147_v35, 2  ;;  %vm169_vm3 = vweird.f32 %v534_v17  ;;  %v173_v47 = vand.u32 2147483647, %v534_v17  ;;  %v175_v48 = vand.u32 2147483648, %v534_v17 }
  0x79   :  { %449 = vrcp.f32 %v538_v20  ;;  %vm199_vm4 = vweird.f32 %v541_v21  ;;  %v203_v55 = vand.u32 2147483647, %v541_v21  ;;  %v205_v56 = vand.u32 2147483648, %v541_v21 }
  0x7a   :  { %451 = vrcp.f32 %v541_v21  ;;  %v149_v57 = vadd.f32 %v148_v45, %v147_v35  ;;  %vm214_vm5 = vweird.f32 %v544_v22  ;;  %v218_v59 = vand.u32 2147483647, %v544_v22 }
  0x7b   :  { %453 = vrcp.f32 %v544_v22  ;;  %v220_v62 = vand.u32 2147483648, %v544_v22  ;;  %vm184_vm8 = vweird.f32 %v538_v20  ;;  %v188_v3 = vand.u32 2147483647, %v538_v20 }
  0x7c   :  { %v206_v7 = vor.u32 1.1754944e-38, %v205_v56  ;;  %v150_v8 = vrot.slane %v149_v57, 1  ;;  %v190_v11 = vand.u32 2147483648, %v538_v20  ;;  %vm611_vm13 = vcmp.eq.f32.partialorder %v218_v59, 8.507059e+37 }
  0x7d   :  { %v554_v27 = vpop.eup %447  ;;  %v221_v13 = vor.u32 1.1754944e-38, %v220_v62  ;;  %vm204_vm15 = vcmp.eq.f32.partialorder %v203_v55, 8.507059e+37  ;;  %vm636_vm1 = vcmp.eq.f32.partialorder %v188_v3, 8.507059e+37 }
  0x7e   :  { %v165_v39 = vmul.f32 %v554_v27, %v534_v17  ;;  %vm170_vm9 = vweird.f32 %v554_v27  ;;  %v151_v17 = vadd.f32 %v150_v8, %v149_v57  ;;  %v191_v28 = vor.u32 1.1754944e-38, %v190_v11 }
  0x7f   :  { %v556_v29 = vpop.eup %449  ;;  %v112_v30 = vpop.permute.xlu1 %111  ;;  %vm619_vm14 = vmor %vm169_vm3, %vm170_vm9  ;;  %vm174_vm3 = vcmp.eq.f32.partialorder %v173_v47, 8.507059e+37 }
  0x80   :  { %v558_v31 = vpop.eup %451  ;;  %v122_v32 = vmul.f32 %v112_v30, %v19_v25  ;;  %v180_v41 = vmul.f32 %v556_v29, %v538_v20  ;;  %v166_v49 = vsub.f32 1.0, %v165_v39  ;;  %vm185_vm12 = vweird.f32 %v556_v29 }
  0x81   :  { %v560_v33 = vpop.eup %453  ;;  %v195_v34 = vmul.f32 %v558_v31, %v541_v21  ;;  %vm200_vm7 = vweird.f32 %v558_v31  ;;  %v129_v21 = vrot.slane %v571_v46, 1  ;;  %vm632_vm0 = vmor %vm184_vm8, %vm185_vm12  ;;  %v176_v30 = vor.u32 1.1754944e-38, %v175_v48  ;;  %v15_v48 = vld [vmem:[%s736_s0] sm:$0xff] }
  0x82   :  { %v138_v37 = vsel %vm39_vm2, %v122_v32, 0.0  ;;  %v210_v38 = vmul.f32 %v560_v33, %v544_v22  ;;  %v181_v51 = vsub.f32 1.0, %v180_v41  ;;  %vm215_vm6 = vweird.f32 %v560_v33  ;;  %vm605_vm11 = vmor %vm199_vm4, %vm200_vm7 }
  0x83   :  { %v139_v40 = vrot.slane %v138_v37, 4  ;;  %v196_v42 = vsub.f32 1.0, %v195_v34  ;;  %v167_v0 = vmul.f32 %v554_v27, %v166_v49  ;;  %vm599_vm10 = vmor %vm214_vm5, %vm215_vm6  ;;  %v36_v34 = vpop.permute.xlu2 %35  ;;  %v130_v36 = vadd.f32 %v129_v21, %v571_v46  ;;  %v16_v46 = vld [vmem:[%s736_s0 + $0x8] sm:$0xff]  ;;  %s501_s0 = smov [#allocation2]  }
  0x84   :  { %v211_v43 = vsub.f32 1.0, %v210_v38  ;;  %v182_v63 = vmul.f32 %v556_v29, %v181_v51  ;;  %vm229_vm4 = vcmask 1041409   ;;  %vm294_vm5 = vcmask 1042434   ;;  %s430_s26 = sshll.u32 %s501_s0, 4  ;;  %s431_s26 = int_to_ptr.vmem [resolvable:$true] %s430_s26 }
  0x85   :  { %v140_v44 = vadd.f32 %v139_v40, %v138_v37  ;;  %v197_v54 = vmul.f32 %v558_v31, %v196_v42  ;;  %v168_v16 = vadd.f32 %v554_v27, %v167_v0  ;;  %vm297_vm6 = vcmask 1043459  }
  0x86   :  { %v212_v53 = vmul.f32 %v560_v33, %v211_v43  ;;  %v183_v14 = vadd.f32 %v556_v29, %v182_v63  ;;  %vm300_vm7 = vcmask 257024  }
  0x87   :  { %v141_v50 = vrot.slane %v140_v44, 2  ;;  %v198_v2 = vadd.f32 %v558_v31, %v197_v54  ;;  %v172_v35 = vsel %vm619_vm14, %v554_v27, %v168_v16  ;;  %v38_v54 = vmul.f32 %v36_v34, %v16_v46 }
  0x88   :  { %v213_v1 = vadd.f32 %v560_v33, %v212_v53  ;;  %v187_v20 = vsel %vm632_vm0, %v556_v29, %v183_v14  ;;  %v177_v41 = vsel %vm174_vm3, %v176_v30, %v172_v35  ;;  %vm232_vm0 = vcmask 254976  }
  0x89   :  { %v105_v58 = vpop.permute.xlu0 %104  ;;  %v142_v60 = vadd.f32 %v141_v50, %v140_v44  ;;  %v202_v22 = vsel %vm605_vm11, %v558_v31, %v198_v2  ;;  %v192_v40 = vsel %vm636_vm1, %v191_v28, %v187_v20  ;;  %v657_v29 = vmul.f32 %v177_v41, %v130_v36 }
  0x8a   :  { %v121_v61 = vmul.f32 %v105_v58, %v18_v52  ;;  %v217_v19 = vsel %vm599_vm10, %v560_v33, %v213_v1  ;;  %v207_v32 = vsel %vm204_vm15, %v206_v7, %v202_v22  ;;  %v47_v59 = vsel %vm39_vm2, %v38_v54, 0.0 }
  0x8b   :  { %v143_v10 = vrot.slane %v142_v60, 1  ;;  %v222_v31 = vsel %vm611_vm13, %v221_v13, %v217_v19  ;;  %v29_v47 = vpop.permute.xlu2 %28  ;;  %v283_v49 = vmul.f32 %v657_v29, %v657_v29 }
  0x8c   :  { %v131_v4 = vsel %vm39_vm2, %v121_v61, 0.0  ;;  %v649_v38 = vmul.f32 %v222_v31, %v151_v17  ;;  %v37_v55 = vmul.f32 %v29_v47, %v15_v48  ;;  %v48_v61 = vrot.slane %v47_v59, 4 }
  0x8d   :  { %v132_v9 = vrot.slane %v131_v4, 4  ;;  %v144_v26 = vadd.f32 %v143_v10, %v142_v60 }
  0x8e   :  { %v286_v44 = vmul.f32 %v649_v38, %v649_v38  ;;  %v40_v60 = vsel %vm39_vm2, %v37_v55, 0.0  ;;  %v49_v0 = vadd.f32 %v48_v61, %v47_v59 }
  0x8f   :  { %v133_v15 = vadd.f32 %v132_v9, %v131_v4  ;;  %v651_v39 = vmul.f32 %v207_v32, %v144_v26  ;;  %v41_v62 = vrot.slane %v40_v60, 4 }
  0x90   :  { %v296_v51 = vrot.slane %v286_v44, 5  ;;  %v50_v3 = vrot.slane %v49_v0, 2 }
  0x91   :  { %v134_v25 = vrot.slane %v133_v15, 2  ;;  %v285_v27 = vmul.f32 %v651_v39, %v651_v39  ;;  %v42_v1 = vadd.f32 %v41_v62, %v40_v60 }
  0x92   :  { %v51_v8 = vadd.f32 %v50_v3, %v49_v0 }
  0x93   :  { %v135_v33 = vadd.f32 %v134_v25, %v133_v15  ;;  %v293_v52 = vrot.slane %v285_v27, 6  ;;  %v43_v4 = vrot.slane %v42_v1, 2 }
  0x94   :  { %v52_v16 = vrot.slane %v51_v8, 1 }
  0x95   :  { %v136_v37 = vrot.slane %v135_v33, 1  ;;  %v44_v9 = vadd.f32 %v43_v4, %v42_v1 }
  0x96   :  { %v53_v30 = vadd.f32 %v52_v16, %v51_v8 }
  0x97   :  { %v137_v42 = vadd.f32 %v136_v37, %v135_v33  ;;  %v45_v18 = vrot.slane %v44_v9, 1 }
  0x99   :  { %v655_v43 = vmul.f32 %v192_v40, %v137_v42  ;;  %v46_v31 = vadd.f32 %v45_v18, %v44_v9 }
  0x9b   :  { %v284_v45 = vmul.f32 %v655_v43, %v655_v43 }
  0x9d   :  { %v291_v50 = vrot.slane %v284_v45, 7 }
  0x9f   :  { %v292_v53 = vsel %vm229_vm4, %v291_v50, %v283_v49 }
  0xa0   :  { %v295_v56 = vsel %vm294_vm5, %v293_v52, %v292_v53 }
  0xa1   :  { %v298_v57 = vsel %vm297_vm6, %v296_v51, %v295_v56 }
  0xa2   :  { %v301_v58 = vsel %vm300_vm7, %v298_v57, 0.0 }
  0xa3   :  { %302 = vadd.xlane.f32.xlu2 %v301_v58 }
  0xaa   :  { %v57_v63 = vpop.xlane.xlu1 %56 }
  0xab   :  { %v59_v2 = vrot.slane %v57_v63, 1  ;;  %455 = vrcp.f32 %v57_v63  ;;  %v73_v12 = vand.u32 2147483648, %v57_v63  ;;  %v71_v14 = vand.u32 2147483647, %v57_v63 }
  0xac   :  { %vm67_vm9 = vweird.f32 %v57_v63 }
  0xad   :  { %457 = vrcp.f32 %v59_v2  ;;  %v88_v19 = vand.u32 2147483648, %v59_v2  ;;  %v86_v23 = vand.u32 2147483647, %v59_v2  ;;  %v74_v17 = vor.u32 1.1754944e-38, %v73_v12 }
  0xae   :  { %vm72_vm12 = vcmp.eq.f32.partialorder %v71_v14, 8.507059e+37  ;;  %vm82_vm13 = vweird.f32 %v59_v2 }
  0xaf   :  { %v89_v28 = vor.u32 1.1754944e-38, %v88_v19  ;;  %vm87_vm15 = vcmp.eq.f32.partialorder %v86_v23, 8.507059e+37 }
  0xb1   :  { %v456_v5 = vpop.eup %455 }
  0xb2   :  { %v63_v6 = vmul.f32 %v456_v5, %v57_v63  ;;  %vm68_vm8 = vweird.f32 %v456_v5 }
  0xb3   :  { %v458_v7 = vpop.eup %457  ;;  %vm69_vm11 = vmor %vm67_vm9, %vm68_vm8 }
  0xb4   :  { %v64_v10 = vsub.f32 1.0, %v63_v6  ;;  %v78_v11 = vmul.f32 %v458_v7, %v59_v2  ;;  %vm83_vm10 = vweird.f32 %v458_v7 }
  0xb5   :  { %vm84_vm14 = vmor %vm82_vm13, %vm83_vm10 }
  0xb6   :  { %v65_v13 = vmul.f32 %v456_v5, %v64_v10  ;;  %v79_v15 = vsub.f32 1.0, %v78_v11 }
  0xb8   :  { %v66_v21 = vadd.f32 %v456_v5, %v65_v13  ;;  %v80_v22 = vmul.f32 %v458_v7, %v79_v15 }
  0xba   :  { %v70_v24 = vsel %vm69_vm11, %v456_v5, %v66_v21  ;;  %v81_v25 = vadd.f32 %v458_v7, %v80_v22 }
  0xbb   :  { %v75_v26 = vsel %vm72_vm12, %v74_v17, %v70_v24 }
  0xbc   :  { %v85_v32 = vsel %vm84_vm14, %v458_v7, %v81_v25  ;;  %v678_v33 = vmul.f32 %v75_v26, %v46_v31 }
  0xbd   :  { %v90_v20 = vsel %vm87_vm15, %v89_v28, %v85_v32 }
  0xbe   :  { %v680_v34 = vmul.f32 %v90_v20, %v53_v30  ;;  %v224_v36 = vmul.f32 %v678_v33, %v678_v33 }
  0xc0   :  { %v225_v35 = vmul.f32 %v680_v34, %v680_v34 }
  0xc2   :  { %v228_v37 = vrot.slane %v225_v35, 7 }
  0xc4   :  { %v230_v40 = vsel %vm229_vm4, %v228_v37, %v224_v36 }
  0xc5   :  { %v233_v41 = vsel %vm232_vm0, %v230_v40, 0.0 }
  0xc6   :  { %234 = vadd.xlane.f32.xlu0 %v233_v41 }
 0x116   :  { %v303_v42 = vpop.xlane.xlu2 %302 }
 0x117   :  { %459 = vrsqrt.f32 %v303_v42  ;;  %vm311_vm1 = vcmp.eq.f32.partialorder %v303_v42, inf  ;;  %v314_v50 = vand.u32 2147483648, %v303_v42  ;;  %vm313_vm3 = vcmp.eq.f32.partialorder %v303_v42, 0.0 }
 0x11d   :  { %v460_v44 = vpop.eup %459 }
 0x11e   :  { %v305_v27 = vmul.f32 %v460_v44, %v303_v42 }
 0x120   :  { %v306_v45 = vmul.f32 %v460_v44, %v305_v27 }
 0x122   :  { %v307_v46 = vmul.f32 0.5, %v306_v45 }
 0x124   :  { %v308_v47 = vsub.f32 1.5, %v307_v46 }
 0x126   :  { %v309_v48 = vmul.f32 %v460_v44, %v308_v47 }
 0x128   :  { %v310_v49 = vmul.f32 %v309_v48, %v303_v42 }
 0x12a   :  { %v312_v51 = vsel %vm311_vm1, %v303_v42, %v310_v49 }
 0x12b   :  { %v315_v52 = vsel %vm313_vm3, %v314_v50, %v312_v51 }
 0x12c   :  { %v316_v53 = vmax.f32 %v315_v52, 1e-12 }
 0x12e   :  { %461 = vrcp.f32 %v316_v53  ;;  %v318_v54 = vrot.slane %v316_v53, 1  ;;  %v319_v55 = vrot.slane %v316_v53, 2  ;;  %v687_v56 = vrot.slane %v316_v53, 3 }
 0x12f   :  { %v334_v59 = vand.u32 2147483647, %v316_v53  ;;  %v336_v61 = vand.u32 2147483648, %v316_v53  ;;  %vm330_vm7 = vweird.f32 %v316_v53 }
 0x130   :  { %463 = vrcp.f32 %v318_v54  ;;  %vm345_vm8 = vweird.f32 %v318_v54  ;;  %v349_v1 = vand.u32 2147483647, %v318_v54  ;;  %v351_v2 = vand.u32 2147483648, %v318_v54 }
 0x131   :  { %465 = vrcp.f32 %v319_v55  ;;  %vm692_vm10 = vcmp.eq.f32.partialorder %v334_v59, 8.507059e+37  ;;  %v337_v9 = vor.u32 1.1754944e-38, %v336_v61  ;;  %vm360_vm12 = vweird.f32 %v319_v55 }
 0x132   :  { %467 = vrcp.f32 %v687_v56  ;;  %vm699_vm14 = vcmp.eq.f32.partialorder %v349_v1, 8.507059e+37  ;;  %v364_v15 = vand.u32 2147483647, %v319_v55  ;;  %v366_v16 = vand.u32 2147483648, %v319_v55 }
 0x133   :  { %v352_v23 = vor.u32 1.1754944e-38, %v351_v2  ;;  %v379_v17 = vand.u32 2147483647, %v687_v56  ;;  %v381_v24 = vand.u32 2147483648, %v687_v56 }
 0x134   :  { %v462_v57 = vpop.eup %461  ;;  %v367_v20 = vor.u32 1.1754944e-38, %v366_v16 }
 0x135   :  { %v326_v58 = vmul.f32 %v462_v57, %v316_v53  ;;  %vm331_vm9 = vweird.f32 %v462_v57  ;;  %v382_v44 = vor.u32 1.1754944e-38, %v381_v24 }
 0x136   :  { %v464_v60 = vpop.eup %463  ;;  %vm332_vm13 = vmor %vm330_vm7, %vm331_vm9  ;;  %vm365_vm7 = vcmp.eq.f32.partialorder %v364_v15, 8.507059e+37 }
 0x137   :  { %v466_v62 = vpop.eup %465  ;;  %v327_v63 = vsub.f32 1.0, %v326_v58  ;;  %v341_v0 = vmul.f32 %v464_v60, %v318_v54  ;;  %vm346_vm11 = vweird.f32 %v464_v60 }
 0x138   :  { %v356_v3 = vmul.f32 %v466_v62, %v319_v55  ;;  %v468_v4 = vpop.eup %467  ;;  %vm361_vm15 = vweird.f32 %v466_v62  ;;  %vm347_vm0 = vmor %vm345_vm8, %vm346_vm11  ;;  %vm375_vm8 = vweird.f32 %v687_v56 }
 0x139   :  { %v690_v5 = vpop.xlane.xlu0 %234  ;;  %v328_v6 = vmul.f32 %v462_v57, %v327_v63  ;;  %v342_v8 = vsub.f32 1.0, %v341_v0  ;;  %v371_v13 = vmul.f32 %v468_v4, %v687_v56  ;;  %vm376_vm1 = vweird.f32 %v468_v4  ;;  %vm362_vm3 = vmor %vm360_vm12, %vm361_vm15 }
 0x13a   :  { %469 = vrsqrt.f32 %v690_v5  ;;  %v357_v12 = vsub.f32 1.0, %v356_v3  ;;  %vm377_vm9 = vmor %vm375_vm8, %vm376_vm1  ;;  %vm243_vm11 = vcmp.eq.f32.partialorder %v690_v5, inf  ;;  %v246_v56 = vand.u32 2147483648, %v690_v5 }
 0x13b   :  { %v329_v10 = vadd.f32 %v462_v57, %v328_v6  ;;  %v343_v11 = vmul.f32 %v464_v60, %v342_v8  ;;  %v372_v22 = vsub.f32 1.0, %v371_v13  ;;  %vm245_vm12 = vcmp.eq.f32.partialorder %v690_v5, 0.0 }
 0x13c   :  { %v358_v21 = vmul.f32 %v466_v62, %v357_v12 }
 0x13d   :  { %v333_v18 = vsel %vm332_vm13, %v462_v57, %v329_v10  ;;  %v344_v19 = vadd.f32 %v464_v60, %v343_v11  ;;  %v373_v30 = vmul.f32 %v468_v4, %v372_v22 }
 0x13e   :  { %v338_v25 = vsel %vm692_vm10, %v337_v9, %v333_v18  ;;  %v359_v28 = vadd.f32 %v466_v62, %v358_v21  ;;  %vm380_vm10 = vcmp.eq.f32.partialorder %v379_v17, 8.507059e+37 }
 0x13f   :  { %v348_v26 = vsel %vm347_vm0, %v464_v60, %v344_v19  ;;  %v374_v40 = vadd.f32 %v468_v4, %v373_v30  ;;  %v339_v41 = vmul.f32 %v338_v25, %v657_v29 }
 0x140   :  { %v470_v31 = vpop.eup %469  ;;  %v353_v32 = vsel %vm699_vm14, %v352_v23, %v348_v26  ;;  %v363_v37 = vsel %vm362_vm3, %v466_v62, %v359_v28 }
 0x141   :  { %v237_v35 = vmul.f32 %v470_v31, %v690_v5  ;;  %v354_v36 = vmul.f32 %v353_v32, %v655_v43  ;;  %v368_v42 = vsel %vm365_vm7, %v367_v20, %v363_v37  ;;  %v378_v46 = vsel %vm377_vm9, %v468_v4, %v374_v40 }
 0x142   :  { %v369_v45 = vmul.f32 %v368_v42, %v651_v39  ;;  %v383_v48 = vsel %vm380_vm10, %v382_v44, %v378_v46  ;;  %vm423_vm7 = vcmask 25600  }
 0x143   :  { %v238_v27 = vmul.f32 %v470_v31, %v237_v35  ;;  %v393_v47 = vrot.slane %v354_v36, 7  ;;  %v384_v50 = vmul.f32 %v383_v48, %v649_v38 }
 0x144   :  { %v395_v51 = vrot.slane %v369_v45, 6 }
 0x145   :  { %v239_v49 = vmul.f32 0.5, %v238_v27  ;;  %v394_v43 = vsel %vm229_vm4, %v393_v47, %v339_v41  ;;  %v397_v53 = vrot.slane %v384_v50, 5 }
 0x146   :  { %v396_v29 = vsel %vm294_vm5, %v395_v51, %v394_v43 }
 0x147   :  { %v240_v52 = vsub.f32 1.5, %v239_v49  ;;  %v398_v55 = vsel %vm297_vm6, %v397_v53, %v396_v29 }
 0x148   :  { %441 = vmatpush.xpose.msk.msra.mxu0 %vm39_vm2, %v398_v55 }
 0x149   :  { %v241_v54 = vmul.f32 %v470_v31, %v240_v52 }
 0x14b   :  { %v242_v39 = vmul.f32 %v241_v54, %v690_v5 }
 0x14d   :  { %v244_v38 = vsel %vm243_vm11, %v690_v5, %v242_v39 }
 0x14e   :  { %v247_v57 = vsel %vm245_vm12, %v246_v56, %v244_v38 }
 0x14f   :  { %v248_v58 = vmax.f32 %v247_v57, 1e-12 }
 0x151   :  { %471 = vrcp.f32 %v248_v58  ;;  %v250_v59 = vrot.slane %v248_v58, 1  ;;  %vm258_vm6 = vweird.f32 %v248_v58  ;;  %v262_v3 = vand.u32 2147483647, %v248_v58 }
 0x152   :  { %v264_v4 = vand.u32 2147483648, %v248_v58 }
 0x153   :  { %473 = vrcp.f32 %v250_v59  ;;  %v279_v6 = vand.u32 2147483648, %v250_v59  ;;  %v277_v5 = vand.u32 2147483647, %v250_v59  ;;  %vm273_vm15 = vweird.f32 %v250_v59 }
 0x154   :  { %v265_v11 = vor.u32 1.1754944e-38, %v264_v4  ;;  %vm263_vm1 = vcmp.eq.f32.partialorder %v262_v3, 8.507059e+37 }
 0x155   :  { %v280_v12 = vor.u32 1.1754944e-38, %v279_v6  ;;  %vm278_vm3 = vcmp.eq.f32.partialorder %v277_v5, 8.507059e+37 }
 0x157   :  { %v472_v60 = vpop.eup %471 }
 0x158   :  { %v254_v61 = vmul.f32 %v472_v60, %v248_v58  ;;  %vm259_vm5 = vweird.f32 %v472_v60 }
 0x159   :  { %v474_v62 = vpop.eup %473  ;;  %vm260_vm14 = vmor %vm258_vm6, %vm259_vm5 }
 0x15a   :  { %v255_v63 = vsub.f32 1.0, %v254_v61  ;;  %v269_v0 = vmul.f32 %v474_v62, %v250_v59  ;;  %vm274_vm13 = vweird.f32 %v474_v62 }
 0x15b   :  { %vm275_vm0 = vmor %vm273_vm15, %vm274_vm13 }
 0x15c   :  { %v256_v1 = vmul.f32 %v472_v60, %v255_v63  ;;  %v270_v2 = vsub.f32 1.0, %v269_v0 }
 0x15e   :  { %v257_v7 = vadd.f32 %v472_v60, %v256_v1  ;;  %v271_v8 = vmul.f32 %v474_v62, %v270_v2 }
 0x160   :  { %v261_v9 = vsel %vm260_vm14, %v472_v60, %v257_v7  ;;  %v272_v10 = vadd.f32 %v474_v62, %v271_v8 }
 0x161   :  { %v266_v14 = vsel %vm263_vm1, %v265_v11, %v261_v9 }
 0x162   :  { %v276_v13 = vsel %vm275_vm0, %v474_v62, %v272_v10  ;;  %v267_v18 = vmul.f32 %v266_v14, %v678_v33 }
 0x163   :  { %v281_v15 = vsel %vm278_vm3, %v280_v12, %v276_v13 }
 0x164   :  { %v282_v16 = vmul.f32 %v281_v15, %v680_v34 }
 0x166   :  { %v387_v19 = vrot.slane %v282_v16, 7 }
 0x168   :  { %v388_v21 = vsel %vm229_vm4, %v387_v19, %v267_v18 }
 0x169   :  { %442 = vmatmul.msk.f32.vlgmr.msra.gmra.mxu0 %vm39_vm2, %v388_v21 }
 0x1e6   :  { %v420_v22 = vpop.f32.mrf.mxu0 }
 0x1e7   :  { %424 = vst.msk [vmem:[#allocation2] sm:$0x3] %vm423_vm7, %v420_v22 }
 0x1e8   :  { %435 = dma.vmem_to_hbm [thread:$0]  %s431_s26, 32, %s433_s29, [#allocation3]  }
 0x1e9   :  { %499 = dma.done.wait [#allocation3], 32  }
 0x1ea   :  { %500 = vsyncadd [#allocation3], 4294967264 }
 0x1eb   :  { %440 = vsyncpa [#allocation3], 1 }

// kernel: e5_forward.2
= control target key start
LH: loop header
LB: loop body
LE: loop exit
PB: predicated region body
PF: predicated region fallthrough
CT: control target
= control target key end

     0   :  { %s2679_s21 = smov 0   ;;  %s3169_s0 = inlined_call_operand.vmem [shape: f32[6,8,32], index: 0, kind: input, shape index: {}]   ;;  %s3170_s1 = inlined_call_operand.vmem [shape: f32[6,1,8], index: 1, kind: input, shape index: {}]   ;;  %s3171_s2 = inlined_call_operand.vmem [shape: f32[1,32], index: 2, kind: input, shape index: {}]   ;;  %s3172_s3 = inlined_call_operand.vmem [shape: f32[1,32], index: 3, kind: input, shape index: {}]   ;;  %s3173_s4 = inlined_call_operand.vmem [shape: bf16[2,32,96], index: 4, kind: input, shape index: {}]   ;;  %s3174_s5 = inlined_call_operand.vmem [shape: f32[2,1,96], index: 5, kind: input, shape index: {}]   ;;  %s3175_s6 = inlined_call_operand.vmem [shape: bf16[2,32,32], index: 6, kind: input, shape index: {}]   ;;  %s3176_s7 = inlined_call_operand.vmem [shape: f32[2,1,32], index: 7, kind: input, shape index: {}]   ;;  %s3177_s8 = inlined_call_operand.vmem [shape: f32[2,1,32], index: 8, kind: input, shape index: {}]   ;;  %s3178_s9 = inlined_call_operand.vmem [shape: f32[2,1,32], index: 9, kind: input, shape index: {}]   ;;  %s3179_s10 = inlined_call_operand.vmem [shape: bf16[2,32,64], index: 10, kind: input, shape index: {}]   ;;  %s3180_s11 = inlined_call_operand.vmem [shape: f32[2,1,64], index: 11, kind: input, shape index: {}]   ;;  %s3181_s12 = inlined_call_operand.vmem [shape: bf16[2,64,32], index: 12, kind: input, shape index: {}]   ;;  %s3182_s13 = inlined_call_operand.vmem [shape: f32[2,1,32], index: 13, kind: input, shape index: {}]   ;;  %s3183_s14 = inlined_call_operand.vmem [shape: f32[2,1,32], index: 14, kind: input, shape index: {}]   ;;  %s3184_s15 = inlined_call_operand.vmem [shape: f32[2,1,32], index: 15, kind: input, shape index: {}]   ;;  %s3185_s16 = inlined_call_operand.vmem [shape: f32[6,8,32], index: 16, kind: output, shape index: {}]  }
   0x1   :  { %3189 = sst [smem:[#allocation2_spill]] %s3169_s0 }
   0x2 LB: > { %s2262_s22 = sadd.s32 4294967295, %s2585_s21   ;;  %p2266_p0 = scmp.ge.s32.totalorder %s2585_s21, 1  ;;  %s2585_s21 = sphi %s2679_s21, %s26_s21  }
   0x3   : > { %p473_p1 = scmp.lt.s32.totalorder %s2585_s21, 3 }
   0x5   : > { %p474_p2 = pnand %p2266_p0, %p473_p1 }
   0x6   : > { %s527_s23 = smul.u32 (!%p474_p2), 3, %s2262_s22  ;;  %s3190_s27 = sld [smem:[#allocation2_spill]] (!%p474_p2) }
   0x7   : > { %477 = sbr.rel (%p474_p2) target bundleno = 4989 (0x137d), region = 84  ;;  %s2590_s29 = smov (!%p474_p2), 112  }
   0x8   : > { %p528_p3 = scmp.lt.s32.totalorder (!%p474_p2), %s527_s23, 5  ;;  %s2591_s18 = smov (!%p474_p2), 64  }
   0x9   : > { %s2592_s19 = smov (!%p474_p2), 48   ;;  %s3187_s25 = smov (!%p474_p2), 16  }
   0xc   : > { %s3194_s23 = smov (!%p528_p3, %s527_s23), 5  ;;  %vm559_vm0 = vcmask 261120   ;;  %v2587_v6 = vmov 32.0   ;;  %v2423_v28 = vld [vmem:[%s3173_s4 + $0x8] sm:$0xff]  ;;  %v2422_v29 = vld [vmem:[%s3173_s4] sm:$0xff]  ;;  %vm699_vm11 = vcmask 130048  }
   0xd   : > { %s3186_s24 = sshll.u32 %s3194_s23, 3  ;;  %2487 = vrcp.f32 %v2587_v6  ;;  %2442 = vmatpush.bf16.msra.mxu1 %v2423_v28  ;;  %679 = vmatpush.bf16.msra.mxu0 %v2423_v28  ;;  %v2469_v53 = vld [vmem:[%s3171_s2] ss:$0 sm:$0xff]  ;;  %s536_s17 = scalar_lea.vmem %s3170_s1, %s3194_s23  ;;  %vm782_vm12 = vcmask 64512   ;;  %vm824_vm13 = vcmask 1043456  }
   0xe   : > { %s531_s28 = scalar_lea.vmem %s3190_s27, %s3186_s24  ;;  %v2470_v57 = vld [vmem:[%s3172_s3] ss:$0 sm:$0xff]  ;;  %s2588_s27 = smov 96  }
   0xf   : > { %v547_v0 = vld [vmem:[%s531_s28 + $0x10] sm:$0xff]  ;;  %v545_v1 = vld [vmem:[%s531_s28] sm:$0xff]  ;;  %v546_v4 = vld [vmem:[%s531_s28 + $0x8] sm:$0xff]  ;;  %s2589_s28 = smov 80   ;;  %s3192_s20 = sshll.u32 %s3194_s23, 3 }
  0x10   : > { %v566_v2 = vsel %vm559_vm0, %v547_v0, 0.0  ;;  %v560_v3 = vsel %vm559_vm0, %v545_v1, 0.0  ;;  %v563_v5 = vsel %vm559_vm0, %v546_v4, 0.0  ;;  %s542_s30 = scalar_lea.vmem %s3185_s16, %s3192_s20 }
  0x11   : > { %567 = vadd.xlane.f32.xlu2 %v566_v2  ;;  %561 = vadd.xlane.f32.xlu0 %v560_v3 }
  0x12   : > { %2443 = vmatpush.bf16.msra.mxu1 %v2422_v29  ;;  %680 = vmatpush.bf16.msra.mxu0 %v2422_v29 }
  0x13   : > { %v2488_v7 = vpop.eup %2487 }
  0x14   : > { %v570_v8 = vmul.f32 32.0, %v2488_v7  ;;  %vm574_vm1 = vweird.f32 %v2488_v7 }
  0x16   : > { %v571_v9 = vsub.f32 1.0, %v570_v8 }
  0x18   : > { %v572_v10 = vmul.f32 %v2488_v7, %v571_v9  ;;  %v2471_v9 = vld [vmem:[%s3174_s5] ss:$0 sm:$0xff] }
  0x19   : > { %564 = vadd.xlane.f32.xlu0 %v563_v5 }
  0x1a   : > { %v573_v11 = vadd.f32 %v2488_v7, %v572_v10 }
  0x1c   : > { %v2698_v12 = vsel %vm574_vm1, %v2488_v7, %v573_v11 }
  0x84   : > { %v568_v13 = vpop.xlane.xlu2 %567  ;;  %v562_v14 = vpop.xlane.xlu0 %561 }
  0x85   : > { %v578_v15 = vmul.f32 %v2698_v12, %v568_v13  ;;  %v576_v16 = vmul.f32 %v2698_v12, %v562_v14 }
  0x87   : > { %v581_v17 = vsub.f32 %v547_v0, %v578_v15  ;;  %v579_v18 = vsub.f32 %v545_v1, %v576_v16 }
  0x89   : > { %v584_v19 = vmul.f32 %v581_v17, %v581_v17  ;;  %v582_v20 = vmul.f32 %v579_v18, %v579_v18 }
  0x8b   : > { %v591_v21 = vsel %vm559_vm0, %v584_v19, 0.0  ;;  %v585_v22 = vsel %vm559_vm0, %v582_v20, 0.0 }
  0x8c   : > { %592 = vadd.xlane.f32.xlu2 %v591_v21  ;;  %586 = vadd.xlane.f32.xlu1 %v585_v22  ;;  %v565_v23 = vpop.xlane.xlu0 %564 }
  0x8d   : > { %v577_v24 = vmul.f32 %v2698_v12, %v565_v23 }
  0x8f   : > { %v580_v25 = vsub.f32 %v546_v4, %v577_v24 }
  0x91   : > { %v583_v26 = vmul.f32 %v580_v25, %v580_v25 }
  0x93   : > { %v588_v27 = vsel %vm559_vm0, %v583_v26, 0.0 }
  0x94   : > { %589 = vadd.xlane.f32.xlu1 %v588_v27 }
  0xff   : > { %v593_v30 = vpop.xlane.xlu2 %592  ;;  %v587_v31 = vpop.xlane.xlu1 %586 }
 0x100   : > { %v596_v32 = vmul.f32 %v593_v30, %v2698_v12  ;;  %v594_v33 = vmul.f32 %v587_v31, %v2698_v12 }
 0x102   : > { %v599_v34 = vadd.f32 1e-12, %v596_v32  ;;  %v597_v35 = vadd.f32 1e-12, %v594_v33 }
 0x104   : > { %2489 = vrsqrt.f32 %v599_v34  ;;  %vm626_vm2 = vweird.f32 %v599_v34  ;;  %vm606_vm6 = vweird.f32 %v597_v35 }
 0x105   : > { %2491 = vrsqrt.f32 %v597_v35 }
 0x107   : > { %v590_v36 = vpop.xlane.xlu1 %589 }
 0x108   : > { %v595_v37 = vmul.f32 %v590_v36, %v2698_v12  ;;  %v550_v36 = vld [vmem:[%s536_s17 + $0x2] sm:$0x1] }
 0x10a   : > { %v2490_v38 = vpop.eup %2489  ;;  %v598_v39 = vadd.f32 1e-12, %v595_v37  ;;  %v2271_v37 = vadd.f32 -1.0, %v550_v36 }
 0x10b   : > { %v2492_v40 = vpop.eup %2491  ;;  %v621_v41 = vmul.f32 %v2490_v38, %v599_v34  ;;  %vm627_vm3 = vweird.f32 %v2490_v38 }
 0x10c   : > { %v601_v42 = vmul.f32 %v2492_v40, %v597_v35  ;;  %2493 = vrsqrt.f32 %v598_v39  ;;  %vm628_vm4 = vmor %vm626_vm2, %vm627_vm3  ;;  %vm607_vm5 = vweird.f32 %v2492_v40  ;;  %vm616_vm9 = vweird.f32 %v598_v39 }
 0x10d   : > { %v622_v43 = vmul.f32 %v2490_v38, %v621_v41  ;;  %vm608_vm7 = vmor %vm606_vm6, %vm607_vm5  ;;  %vm1312_vm5 = vcmask 523264  }
 0x10e   : > { %v602_v44 = vmul.f32 %v2492_v40, %v601_v42 }
 0x10f   : > { %v623_v45 = vmul.f32 0.5, %v622_v43  ;;  %v549_v43 = vld [vmem:[%s536_s17 + $0x1] sm:$0x1] }
 0x110   : > { %v603_v46 = vmul.f32 0.5, %v602_v44 }
 0x111   : > { %v624_v47 = vsub.f32 1.5, %v623_v45  ;;  %v2270_v45 = vadd.f32 -1.0, %v549_v43 }
 0x112   : > { %v2494_v48 = vpop.eup %2493  ;;  %v604_v49 = vsub.f32 1.5, %v603_v46 }
 0x113   : > { %v625_v50 = vmul.f32 %v2490_v38, %v624_v47  ;;  %v611_v51 = vmul.f32 %v2494_v48, %v598_v39  ;;  %vm617_vm8 = vweird.f32 %v2494_v48  ;;  %v555_v47 = vmul.f32 1e+09, %v2270_v45 }
 0x114   : > { %v605_v52 = vmul.f32 %v2492_v40, %v604_v49  ;;  %vm618_vm10 = vmor %vm616_vm9, %vm617_vm8 }
 0x115   : > { %v629_v54 = vsel %vm628_vm4, %v2490_v38, %v625_v50  ;;  %v612_v55 = vmul.f32 %v2494_v48, %v611_v51  ;;  %v556_v38 = vmul.f32 1e+09, %v2271_v37  ;;  %v2772_v49 = vperm.slane %v555_v47, 0 }
 0x116   : > { %v632_v56 = vmul.f32 %v629_v54, %v581_v17  ;;  %v609_v58 = vsel %vm608_vm7, %v2492_v40, %v605_v52 }
 0x117   : > { %v613_v59 = vmul.f32 0.5, %v612_v55  ;;  %v630_v62 = vmul.f32 %v609_v58, %v579_v18  ;;  %v2768_v39 = vperm.slane %v556_v38, 0 }
 0x118   : > { %v638_v60 = vmul.f32 %v2469_v53, %v632_v56 }
 0x119   : > { %v614_v61 = vsub.f32 1.5, %v613_v59  ;;  %v636_v4 = vmul.f32 %v2469_v53, %v630_v62 }
 0x11a   : > { %v2721_v63 = vadd.f32 %v2470_v57, %v638_v60 }
 0x11b   : > { %v615_v0 = vmul.f32 %v2494_v48, %v614_v61  ;;  %v2726_v6 = vadd.f32 %v2470_v57, %v636_v4 }
 0x11c   : > { %v646_v1 = vpack.c.bf16 %v2721_v63, %v2721_v63 }
 0x11d   : > { %v619_v2 = vsel %vm618_vm10, %v2494_v48, %v615_v0  ;;  %v548_v48 = vld [vmem:[%s536_s17] sm:$0x1] }
 0x11e   : > { %v631_v3 = vmul.f32 %v619_v2, %v580_v25  ;;  %2281 = vmatmul.msk.bf16.vlgmr.msra.gmra.mxu1 %vm559_vm0, %v646_v1  ;;  %v2269_v51 = vadd.f32 -1.0, %v548_v48 }
 0x120   : > { %v637_v5 = vmul.f32 %v2469_v53, %v631_v3  ;;  %v554_v55 = vmul.f32 1e+09, %v2269_v51 }
 0x122   : > { %v2728_v7 = vadd.f32 %v2470_v57, %v637_v5  ;;  %v2776_v57 = vperm.slane %v554_v55, 0 }
 0x124   : > { %v645_v8 = vpack.c.bf16 %v2728_v7, %v2726_v6 }
 0x126   : > { %2280 = vmatmul.msk.bf16.vlgmr.msra.gmra.mxu0 %vm559_vm0, %v645_v8 }
 0x19b   : > { %v687_v10 = vpop.f32.mrf.mxu1 }
 0x19c   : > { %v688_v11 = vadd.f32 %v2471_v9, %v687_v10 }
 0x19e   : > { %v693_v13 = vpack.c.bf16 %v688_v11, %v688_v11 }
 0x1a0   : > { %v744_v14 = vunpack.c.l.b16 %v693_v13 }
 0x1a2   : > { %v2736_v15 = vpack.c.b16 %v744_v14, %v744_v14 }
 0x1a3   : > { %v682_v16 = vpop.f32.mrf.mxu0  ;;  %v689_v17 = vpop.f32.mrf.mxu1 }
 0x1a4   : > { %v683_v18 = vadd.f32 %v2471_v9, %v682_v16  ;;  %746 = vrot.lane.b32.xlu2 %v2736_v15, %s2588_s27 }
 0x1a6   : > { %v691_v19 = vpack.c.bf16 %v683_v18, %v683_v18 }
 0x1a8   : > { %v695_v20 = vunpack.c.l.b16 %v691_v19 }
 0x1aa   : > { %v2740_v21 = vpack.c.b16 %v695_v20, %v695_v20 }
 0x1ab   : > { %v684_v22 = vpop.f32.mrf.mxu0 }
 0x1ac   : > { %v685_v23 = vadd.f32 %v2471_v9, %v684_v22  ;;  %697 = vrot.lane.b32.xlu0 %v2740_v21, %s2588_s27 }
 0x1ae   : > { %v692_v24 = vpack.c.bf16 %v685_v23, %v685_v23 }
 0x1b0   : > { %v720_v25 = vunpack.c.l.b16 %v692_v24 }
 0x1b2   : > { %v2744_v26 = vpack.c.b16 %v720_v25, %v720_v25 }
 0x1b4   : > { %722 = vrot.lane.b32.xlu2 %v2744_v26, %s2588_s27  ;;  %885 = vrot.lane.b32.xlu0 %v2740_v21, %s2589_s28 }
 0x1bc   : > { %883 = vrot.lane.b32.xlu2 %v2740_v21, %s2590_s29  ;;  %908 = vrot.lane.b32.xlu0 %v2744_v26, %s2589_s28 }
 0x1c4   : > { %906 = vrot.lane.b32.xlu0 %v2744_v26, %s2590_s29 }
 0x1fe   : > { %v747_v27 = vpop.permute.xlu2 %746 }
 0x1ff   : > { %v752_v28 = vsel %vm699_vm11, %v747_v27, 0 }
 0x200   : > { %761 = vmatpush.bf16.xpose.msra.mxu3 %v752_v28 }
 0x207   : > { %2284 = vmatmul.msk.bf16.vlgmr.msra.gmra.mxu3 %vm699_vm11, %v693_v13 }
 0x20e   : > { %v723_v29 = vpop.permute.xlu2 %722 }
 0x20f   : > { %v728_v30 = vsel %vm699_vm11, %v723_v29, 0 }
 0x210   : > { %737 = vmatpush.bf16.xpose.msra.mxu2 %v728_v30 }
 0x216   : > { %v884_v35 = vpop.permute.xlu2 %883 }
 0x217   : > { %2283 = vmatmul.msk.bf16.vlgmr.msra.gmra.mxu2 %vm699_vm11, %v692_v24 }
 0x21e   : > { %v698_v31 = vpop.permute.xlu0 %697 }
 0x21f   : > { %v704_v32 = vsel %vm699_vm11, %v698_v31, 0 }
 0x220   : > { %713 = vmatpush.bf16.xpose.msrb.mxu1 %v704_v32 }
 0x226   : > { %v886_v33 = vpop.permute.xlu0 %885 }
 0x227   : > { %2282 = vmatmul.msk.bf16.vlgmr.msrb.gmra.mxu1 %vm699_vm11, %v691_v19  ;;  %v891_v34 = vsel %vm699_vm11, %v886_v33, 0 }
 0x228   : > { %900 = vmatpush.bf16.xpose.msrb.mxu0 %v891_v34 }
 0x22e   : > { %v909_v22 = vpop.permute.xlu0 %908 }
 0x22f   : > { %2288 = vmatmul.msk.bf16.vlgmr.msrb.gmra.mxu0 %vm699_vm11, %v884_v35  ;;  %v914_v27 = vsel %vm699_vm11, %v909_v22, 0 }
 0x236   : > { %v907_v29 = vpop.permute.xlu0 %906 }
 0x28a   : > { %v763_v40 = vpop.f32.mrf.mxu3 }
 0x28b   : > { %v769_v41 = vmul.f32 0.25, %v763_v40 }
 0x28d   : > { %v781_v42 = vadd.f32 %v2768_v39, %v769_v41 }
 0x28f   : > { %v789_v44 = vsel %vm782_vm12, %v781_v42, -inf }
 0x290   : > { %790 = vmax.xlane.f32.xlu2 %v789_v44 }
 0x292   : > { %v765_v46 = vpop.f32.mrf.mxu3 }
 0x29a   : > { %v739_v50 = vpop.f32.mrf.mxu2 }
 0x29b   : > { %v768_v52 = vmul.f32 0.25, %v739_v50 }
 0x29d   : > { %v780_v53 = vadd.f32 %v2772_v49, %v768_v52 }
 0x29f   : > { %v786_v54 = vsel %vm782_vm12, %v780_v53, -inf }
 0x2a0   : > { %787 = vmax.xlane.f32.xlu2 %v786_v54 }
 0x2a2   : > { %v741_v56 = vpop.f32.mrf.mxu2 }
 0x2a4   : > { %v715_v58 = vpop.f32.mrf.mxu1 }
 0x2a5   : > { %v767_v59 = vmul.f32 0.25, %v715_v58 }
 0x2a7   : > { %v779_v60 = vadd.f32 %v2776_v57, %v767_v59 }
 0x2a9   : > { %v783_v61 = vsel %vm782_vm12, %v779_v60, -inf }
 0x2aa   : > { %784 = vmax.xlane.f32.xlu1 %v783_v61 }
 0x2ac   : > { %v717_v62 = vpop.f32.mrf.mxu1  ;;  %v902_v0 = vpop.f32.mrf.mxu0 }
 0x2ad   : > { %v952_v11 = vmul.f32 0.25, %v902_v0 }
 0x2af   : > { %v955_v14 = vadd.f32 %v952_v11, %v2776_v57 }
 0x2b1   : > { %v958_v16 = vsel %vm782_vm12, %v955_v14, -inf }
 0x2b4   : > { %v904_v1 = vpop.f32.mrf.mxu0 }
 0x303   : > { %v791_v9 = vpop.xlane.xlu2 %790 }
 0x304   : > { %v794_v10 = vsub.f32 %v781_v42, %v791_v9 }
 0x306   : > { %v799_v13 = vmul.f32 1.442695, %v794_v10 }
 0x313   : > { %v788_v30 = vpop.xlane.xlu2 %787 }
 0x314   : > { %v793_v33 = vsub.f32 %v780_v53, %v788_v30 }
 0x316   : > { %v797_v35 = vmul.f32 1.442695, %v793_v33 }
 0x31d   : > { %v785_v2 = vpop.xlane.xlu1 %784 }
 0x31e   : > { %v792_v3 = vsub.f32 %v779_v60, %v785_v2 }
 0x320   : > { %v795_v4 = vmul.f32 1.442695, %v792_v3 }
 0x322   : > { %2495 = vpow2.f32 %v795_v4 }
 0x323   : > { %2497 = vpow2.f32 %v799_v13 }
 0x328   : > { %v2496_v5 = vpop.eup %2495 }
 0x329   : > { %v801_v8 = vsel %vm782_vm12, %v2496_v5, 0.0  ;;  %v2498_v17 = vpop.eup %2497 }
 0x32a   : > { %802 = vadd.xlane.f32.xlu1 %v801_v8  ;;  %v807_v18 = vsel %vm782_vm12, %v2498_v17, 0.0 }
 0x343   : > { %819 = vrot.lane.b32.xlu1 %v2740_v21, %s2591_s18 }
 0x36d   : > { %959 = vmax.xlane.f32.xlu1 %v958_v16 }
 0x375   : > { %808 = vadd.xlane.f32.xlu1 %v807_v18 }
 0x39d   : > { %v803_v19 = vpop.xlane.xlu1 %802 }
 0x39e   : > { %2499 = vrcp.f32 %v803_v19 }
 0x3a4   : > { %v2500_v20 = vpop.eup %2499 }
 0x3a5   : > { %v813_v23 = vmul.f32 %v2500_v20, %v2496_v5 }
 0x3a7   : > { %v816_v28 = vpack.c.bf16 %v813_v23, %v813_v23 }
 0x3b5   : > { %v820_v24 = vpop.permute.xlu1 %819 }
 0x3b6   : > { %v826_v25 = vsel %vm824_vm13, %v820_v24, 0 }
 0x3b7   : > { %835 = vmatpush.bf16.msra.mxu1 %v826_v25 }
 0x3ba   : > { %2285 = vmatmul.msk.bf16.vlgmr.msra.gmra.mxu1 %vm782_vm12, %v816_v28 }
 0x3bb   : > { %923 = vmatpush.bf16.xpose.msrb.mxu1 %v914_v27 }
 0x3ca   : > { %2289 = vmatmul.msk.bf16.vlgmr.msrb.gmra.mxu1 %vm699_vm11, %v907_v29 }
 0x3e0   : > { %v960_v31 = vpop.xlane.xlu1 %959 }
 0x3e1   : > { %v967_v32 = vsub.f32 %v955_v14, %v960_v31 }
 0x3e3   : > { %v970_v34 = vmul.f32 1.442695, %v967_v32 }
 0x3e5   : > { %2501 = vpow2.f32 %v970_v34  ;;  %v2425_v34 = vld [vmem:[%s3175_s6 + $0x8] sm:$0xff] }
 0x3e6   : > { %2503 = vpow2.f32 %v797_v35 }
 0x3e8   : > { %v809_v56 = vpop.xlane.xlu1 %808 }
 0x3eb   : > { %v2790_v36 = vpop.eup %2501 }
 0x3ec   : > { %v976_v37 = vsel %vm782_vm12, %v2790_v36, 0.0  ;;  %v2504_v38 = vpop.eup %2503 }
 0x3ed   : > { %977 = vadd.xlane.f32.xlu2 %v976_v37  ;;  %v804_v40 = vsel %vm782_vm12, %v2504_v38, 0.0 }
 0x3f5   : > { %805 = vadd.xlane.f32.xlu2 %v804_v40 }
 0x40d   : > { %1015 = vrot.lane.b32.xlu2 %v2744_v26, %s2592_s19 }
 0x437   : > { %v2797_v41 = vpop.f32.mrf.mxu1 }
 0x43f   : > { %v839_v42 = vpop.f32.mrf.mxu1 }
 0x447   : > { %v925_v43 = vpop.f32.mrf.mxu1 }
 0x448   : > { %v953_v44 = vmul.f32 0.25, %v925_v43 }
 0x44a   : > { %v956_v45 = vadd.f32 %v953_v44, %v2772_v49 }
 0x44c   : > { %v961_v46 = vsel %vm782_vm12, %v956_v45, -inf }
 0x44d   : > { %962 = vmax.xlane.f32.xlu0 %v961_v46 }
 0x44f   : > { %v927_v47 = vpop.f32.mrf.mxu1 }
 0x460   : > { %v978_v48 = vpop.xlane.xlu2 %977 }
 0x461   : > { %862 = vrot.lane.b32.xlu0 %v2736_v15, %s2591_s18 }
 0x468   : > { %v806_v50 = vpop.xlane.xlu2 %805 }
 0x469   : > { %841 = vrot.lane.b32.xlu0 %v2744_v26, %s2591_s18 }
 0x470   : > { %v1016_v51 = vpop.permute.xlu2 %1015 }
 0x471   : > { %v1021_v52 = vsel %vm824_vm13, %v1016_v51, 0  ;;  %931 = vrot.lane.b32.xlu0 %v2736_v15, %s2589_s28 }
 0x472   : > { %1030 = vmatpush.bf16.msra.mxu0 %v1021_v52 }
 0x479   : > { %929 = vrot.lane.b32.xlu0 %v2736_v15, %s2590_s29 }
 0x4c0   : > { %v963_v53 = vpop.xlane.xlu0 %962 }
 0x4c1   : > { %v968_v54 = vsub.f32 %v956_v45, %v963_v53  ;;  %v2424_v45 = vld [vmem:[%s3175_s6] sm:$0xff] }
 0x4c3   : > { %v972_v55 = vmul.f32 1.442695, %v968_v54 }
 0x4c5   : > { %2505 = vpow2.f32 %v972_v55 }
 0x4c6   : > { %2507 = vrcp.f32 %v809_v56 }
 0x4c7   : > { %2509 = vrcp.f32 %v806_v50 }
 0x4cb   : > { %v2506_v58 = vpop.eup %2505 }
 0x4cc   : > { %v979_v59 = vsel %vm782_vm12, %v2506_v58, 0.0  ;;  %v2508_v26 = vpop.eup %2507 }
 0x4cd   : > { %980 = vadd.xlane.f32.xlu1 %v979_v59  ;;  %v815_v60 = vmul.f32 %v2508_v26, %v2498_v17  ;;  %v2510_v1 = vpop.eup %2509 }
 0x4ce   : > { %v814_v2 = vmul.f32 %v2510_v1, %v2504_v38 }
 0x4cf   : > { %v818_v0 = vpack.c.bf16 %v815_v60, %v815_v60 }
 0x4d0   : > { %v817_v5 = vpack.c.bf16 %v814_v2, %v814_v2 }
 0x4d3   : > { %v863_v61 = vpop.permute.xlu0 %862 }
 0x4d4   : > { %v868_v62 = vsel %vm824_vm13, %v863_v61, 0 }
 0x4d5   : > { %877 = vmatpush.bf16.msrb.mxu3 %v868_v62 }
 0x4d8   : > { %2287 = vmatmul.msk.bf16.vlgmr.msrb.gmra.mxu3 %vm782_vm12, %v818_v0 }
 0x4db   : > { %v842_v3 = vpop.permute.xlu0 %841 }
 0x4dc   : > { %v847_v4 = vsel %vm824_vm13, %v842_v3, 0 }
 0x4dd   : > { %856 = vmatpush.bf16.msrb.mxu2 %v847_v4 }
 0x4e0   : > { %2286 = vmatmul.msk.bf16.vlgmr.msrb.gmra.mxu2 %vm782_vm12, %v817_v5 }
 0x4e3   : > { %v932_v8 = vpop.permute.xlu0 %931 }
 0x4e4   : > { %v937_v9 = vsel %vm699_vm11, %v932_v8, 0 }
 0x4e5   : > { %946 = vmatpush.bf16.xpose.msra.mxu2 %v937_v9 }
 0x4e6   : > { %994 = vrot.lane.b32.xlu1 %v2740_v21, %s2592_s19 }
 0x4eb   : > { %v930_v10 = vpop.permute.xlu0 %929 }
 0x4ed   : > { %1106 = vmatpush.bf16.msrb.mxu2 %v2425_v34 }
 0x4f0   : > { %2290 = vmatmul.msk.bf16.vlgmr.msra.gmra.mxu2 %vm699_vm11, %v930_v10 }
 0x4f1   : > { %1107 = vmatpush.bf16.msrb.mxu2 %v2424_v45 }
 0x540   : > { %v981_v11 = vpop.xlane.xlu1 %980 }
 0x541   : > { %2511 = vrcp.f32 %v981_v11 }
 0x542   : > { %2513 = vrcp.f32 %v978_v48 }
 0x547   : > { %v2512_v13 = vpop.eup %2511 }
 0x548   : > { %v989_v14 = vmul.f32 %v2512_v13, %v2506_v58  ;;  %v2514_v17 = vpop.eup %2513 }
 0x549   : > { %v988_v18 = vmul.f32 %v2514_v17, %v2790_v36  ;;  %v2427_v17 = vld [vmem:[%s3179_s10 + $0x8] sm:$0xff] }
 0x54a   : > { %v992_v16 = vpack.c.bf16 %v989_v14, %v989_v14 }
 0x54b   : > { %v991_v22 = vpack.c.bf16 %v988_v18, %v988_v18 }
 0x54c   : > { %2292 = vmatmul.msk.bf16.vlgmr.msra.gmra.mxu0 %vm782_vm12, %v992_v16 }
 0x558   : > { %v995_v19 = vpop.permute.xlu1 %994 }
 0x559   : > { %v1000_v20 = vsel %vm824_vm13, %v995_v19, 0 }
 0x55a   : > { %1009 = vmatpush.bf16.msra.mxu3 %v1000_v20 }
 0x55b   : > { %v2822_v21 = vpop.f32.mrf.mxu3 }
 0x55d   : > { %2291 = vmatmul.msk.bf16.vlgmr.msra.gmra.mxu3 %vm782_vm12, %v991_v22  ;;  %v2426_v22 = vld [vmem:[%s3179_s10] sm:$0xff] }
 0x55e   : > { %1235 = vmatpush.bf16.msrb.mxu3 %v2427_v17 }
 0x562   : > { %1236 = vmatpush.bf16.msrb.mxu3 %v2426_v22 }
 0x563   : > { %v858_v23 = vpop.f32.mrf.mxu2  ;;  %v881_v24 = vpop.f32.mrf.mxu3 }
 0x56b   : > { %v860_v25 = vpop.f32.mrf.mxu2 }
 0x573   : > { %v948_v27 = vpop.f32.mrf.mxu2 }
 0x574   : > { %v954_v28 = vmul.f32 0.25, %v948_v27 }
 0x576   : > { %v957_v29 = vadd.f32 %v954_v28, %v2768_v39 }
 0x578   : > { %v964_v30 = vsel %vm782_vm12, %v957_v29, -inf }
 0x579   : > { %965 = vmax.xlane.f32.xlu2 %v964_v30 }
 0x57b   : > { %v950_v31 = vpop.f32.mrf.mxu2 }
 0x5c9   : > { %v1032_v32 = vpop.f32.mrf.mxu0 }
 0x5d1   : > { %v1034_v33 = vpop.f32.mrf.mxu0 }
 0x5e0   : > { %v1011_v35 = vpop.f32.mrf.mxu3 }
 0x5e1   : > { %v2459_v36 = vpack.i.bf16 %v1032_v32, %v1011_v35 }
 0x5e3   : > { %2460 = vrot.lane.b32.xlu1 %v2459_v36, %s3187_s25 }
 0x5e8   : > { %v1013_v37 = vpop.f32.mrf.mxu3 }
 0x5eb   : > { %1036 = vrot.lane.b32.xlu1 %v2736_v15, %s2592_s19 }
 0x5ec   : > { %v966_v38 = vpop.xlane.xlu2 %965 }
 0x5ed   : > { %v969_v40 = vsub.f32 %v957_v29, %v966_v38 }
 0x5ef   : > { %v974_v42 = vmul.f32 1.442695, %v969_v40 }
 0x5f1   : > { %2515 = vpow2.f32 %v974_v42 }
 0x5f7   : > { %v2516_v43 = vpop.eup %2515 }
 0x5f8   : > { %v982_v44 = vsel %vm782_vm12, %v2516_v43, 0.0 }
 0x5f9   : > { %983 = vadd.xlane.f32.xlu0 %v982_v44  ;;  %v2873_v44 = vld [vmem:[%s3177_s8] ss:$0 sm:$0xff] }
 0x655   : > { %v2461_v46 = vpop.permute.xlu1 %2460 }
 0x656   : > { %v2463_v47 = vunpack.i.h.bf16 %v2461_v46  ;;  %v2462_v48 = vunpack.i.l.bf16 %v2461_v46 }
 0x658   : > { %v1069_v50 = vsel %vm699_vm11, %v2797_v41, %v2462_v48  ;;  %v1070_v15 = vsel %vm699_vm11, %v858_v23, %v2463_v47  ;;  %v2846_v41 = vld [vmem:[%s3176_s7] ss:$0 sm:$0xff] }
 0x659   : > { %v1072_v51 = vpack.c.bf16 %v1070_v15, %v1069_v50  ;;  %v2878_v47 = vld [vmem:[%s3178_s9] ss:$0 sm:$0xff] }
 0x65b   : > { %2302 = vmatmul.msk.bf16.vlgmr.msrb.gmra.mxu2 %vm559_vm0, %v1072_v51 }
 0x65d   : > { %v1037_v52 = vpop.permute.xlu1 %1036 }
 0x65e   : > { %v1042_v53 = vsel %vm824_vm13, %v1037_v52, 0 }
 0x65f   : > { %1051 = vmatpush.bf16.msra.mxu1 %v1042_v53 }
 0x66c   : > { %v984_v54 = vpop.xlane.xlu0 %983 }
 0x66d   : > { %2517 = vrcp.f32 %v984_v54 }
 0x673   : > { %v2518_v55 = vpop.eup %2517 }
 0x674   : > { %v990_v56 = vmul.f32 %v2518_v55, %v2516_v43 }
 0x676   : > { %v993_v58 = vpack.c.bf16 %v990_v56, %v990_v56 }
 0x678   : > { %2293 = vmatmul.msk.bf16.vlgmr.msra.gmra.mxu1 %vm782_vm12, %v993_v58  ;;  %v2431_v58 = vld [vmem:[%s3181_s12 + $0x18] sm:$0xff] }
 0x679   : > { %1323 = vmatpush.bf16.msrb.mxu0 %v2431_v58 }
 0x6de   : > { %v1109_v59 = vpop.f32.mrf.mxu2 }
 0x6df   : > { %v1110_v26 = vadd.f32 %v2846_v41, %v1109_v59 }
 0x6e1   : > { %v1118_v60 = vadd.f32 %v1110_v26, %v2726_v6 }
 0x6e3   : > { %v1123_v61 = vsel %vm559_vm0, %v1118_v60, 0.0 }
 0x6e4   : > { %1124 = vadd.xlane.f32.xlu1 %v1123_v61 }
 0x6e6   : > { %v1111_v62 = vpop.f32.mrf.mxu2 }
 0x6e7   : > { %v1112_v0 = vadd.f32 %v2846_v41, %v1111_v62  ;;  %v2428_v62 = vld [vmem:[%s3181_s12] sm:$0xff] }
 0x6e9   : > { %v1119_v1 = vadd.f32 %v1112_v0, %v2728_v7 }
 0x6eb   : > { %v1126_v2 = vsel %vm559_vm0, %v1119_v1, 0.0 }
 0x6ec   : > { %1127 = vadd.xlane.f32.xlu2 %v1126_v2 }
 0x6f5   : > { %v1053_v3 = vpop.f32.mrf.mxu1 }
 0x6fd   : > { %v1055_v4 = vpop.f32.mrf.mxu1 }
 0x757   : > { %v1125_v5 = vpop.xlane.xlu1 %1124 }
 0x758   : > { %v1132_v8 = vmul.f32 %v1125_v5, %v2698_v12 }
 0x75a   : > { %v1135_v9 = vsub.f32 %v1118_v60, %v1132_v8  ;;  %v2430_v60 = vld [vmem:[%s3181_s12 + $0x10] sm:$0xff] }
 0x75b   : > { %1324 = vmatpush.bf16.msrb.mxu0 %v2430_v60 }
 0x75c   : > { %v1138_v10 = vmul.f32 %v1135_v9, %v1135_v9 }
 0x75e   : > { %v1141_v6 = vsel %vm559_vm0, %v1138_v10, 0.0 }
 0x75f   : > { %v1128_v11 = vpop.xlane.xlu2 %1127  ;;  %1142 = vadd.xlane.f32.xlu0 %v1141_v6 }
 0x760   : > { %v1133_v13 = vmul.f32 %v1128_v11, %v2698_v12 }
 0x762   : > { %v1136_v14 = vsub.f32 %v1119_v1, %v1133_v13 }
 0x764   : > { %v1139_v16 = vmul.f32 %v1136_v14, %v1136_v14 }
 0x766   : > { %v1144_v7 = vsel %vm559_vm0, %v1139_v16, 0.0 }
 0x767   : > { %1145 = vadd.xlane.f32.xlu2 %v1144_v7 }
 0x773   : > { %1064 = vrot.lane.b32.xlu0 %v1053_v3, %s3187_s25 }
 0x7d2   : > { %v1143_v18 = vpop.xlane.xlu0 %1142 }
 0x7d3   : > { %v1150_v19 = vmul.f32 %v1143_v18, %v2698_v12 }
 0x7d5   : > { %v1153_v20 = vadd.f32 1e-12, %v1150_v19 }
 0x7d7   : > { %2519 = vrsqrt.f32 %v1153_v20  ;;  %vm1162_vm15 = vweird.f32 %v1153_v20 }
 0x7da   : > { %v1146_v23 = vpop.xlane.xlu2 %1145 }
 0x7db   : > { %v1151_v24 = vmul.f32 %v1146_v23, %v2698_v12 }
 0x7dd   : > { %v2520_v25 = vpop.eup %2519  ;;  %v1154_v27 = vadd.f32 1e-12, %v1151_v24 }
 0x7de   : > { %v1157_v28 = vmul.f32 %v2520_v25, %v1153_v20  ;;  %vm1163_vm14 = vweird.f32 %v2520_v25 }
 0x7df   : > { %2521 = vrsqrt.f32 %v1154_v27  ;;  %vm1164_vm1 = vmor %vm1162_vm15, %vm1163_vm14  ;;  %vm1172_vm3 = vweird.f32 %v1154_v27 }
 0x7e0   : > { %v1158_v29 = vmul.f32 %v2520_v25, %v1157_v28 }
 0x7e2   : > { %v1159_v30 = vmul.f32 0.5, %v1158_v29 }
 0x7e4   : > { %v1160_v31 = vsub.f32 1.5, %v1159_v30 }
 0x7e5   : > { %v2522_v32 = vpop.eup %2521  ;;  %v1065_v33 = vpop.permute.xlu0 %1064 }
 0x7e6   : > { %v1161_v34 = vmul.f32 %v2520_v25, %v1160_v31  ;;  %v1167_v35 = vmul.f32 %v2522_v32, %v1154_v27  ;;  %v1071_v36 = vsel %vm699_vm11, %v2822_v21, %v1065_v33  ;;  %vm1173_vm2 = vweird.f32 %v2522_v32  ;;  %v2913_v31 = vld [vmem:[%s3182_s13] ss:$0 sm:$0xff] }
 0x7e7   : > { %v1073_v37 = vpack.c.bf16 %v1071_v36, %v1071_v36  ;;  %vm1174_vm4 = vmor %vm1172_vm3, %vm1173_vm2 }
 0x7e8   : > { %v1168_v38 = vmul.f32 %v2522_v32, %v1167_v35  ;;  %v1165_v40 = vsel %vm1164_vm1, %v2520_v25, %v1161_v34 }
 0x7e9   : > { %2303 = vmatmul.msk.bf16.gmra.mxu2 %vm559_vm0, %v1073_v37  ;;  %v1186_v45 = vmul.f32 %v1165_v40, %v1135_v9 }
 0x7ea   : > { %v1169_v42 = vmul.f32 0.5, %v1168_v38 }
 0x7eb   : > { %v1192_v48 = vmul.f32 %v2873_v44, %v1186_v45 }
 0x7ec   : > { %v1170_v43 = vsub.f32 1.5, %v1169_v42 }
 0x7ed   : > { %v1198_v51 = vadd.f32 %v2878_v47, %v1192_v48 }
 0x7ee   : > { %v1171_v46 = vmul.f32 %v2522_v32, %v1170_v43 }
 0x7f0   : > { %v1175_v21 = vsel %vm1174_vm4, %v2522_v32, %v1171_v46 }
 0x7f1   : > { %v1187_v50 = vmul.f32 %v1175_v21, %v1136_v14 }
 0x7f3   : > { %v1193_v15 = vmul.f32 %v2873_v44, %v1187_v50 }
 0x7f5   : > { %v1199_v52 = vadd.f32 %v2878_v47, %v1193_v15 }
 0x7f7   : > { %v1201_v53 = vpack.c.bf16 %v1199_v52, %v1198_v51 }
 0x7f9   : > { %2312 = vmatmul.msk.bf16.vlgmr.msrb.gmra.mxu3 %vm559_vm0, %v1201_v53 }
 0x86c   : > { %v1114_v54 = vpop.f32.mrf.mxu2 }
 0x86d   : > { %v1115_v55 = vadd.f32 %v2846_v41, %v1114_v54  ;;  %v2429_v41 = vld [vmem:[%s3181_s12 + $0x8] sm:$0xff] }
 0x86e   : > { %1325 = vmatpush.bf16.msrb.mxu0 %v2429_v41 }
 0x86f   : > { %v1120_v56 = vadd.f32 %v1115_v55, %v2721_v63  ;;  %v2900_v63 = vld [vmem:[%s3180_s11] ss:$0 sm:$0xff] }
 0x871   : > { %v1129_v59 = vsel %vm559_vm0, %v1120_v56, 0.0 }
 0x872   : > { %1130 = vadd.xlane.f32.xlu1 %v1129_v59  ;;  %1326 = vmatpush.bf16.msrb.mxu0 %v2428_v62 }
 0x874   : > { %v1116_v26 = vpop.f32.mrf.mxu2 }
 0x87c   : > { %v1238_v61 = vpop.f32.mrf.mxu3 }
 0x87d   : > { %v1239_v0 = vadd.f32 %v2900_v63, %v1238_v61 }
 0x87f   : > { %v1247_v1 = vmul.f32 %v1239_v0, %v1239_v0 }
 0x881   : > { %v1250_v2 = vmul.f32 %v1247_v1, %v1239_v0 }
 0x883   : > { %v1253_v3 = vmul.f32 0.044715, %v1250_v2 }
 0x884   : > { %v1240_v4 = vpop.f32.mrf.mxu3 }
 0x885   : > { %v1256_v5 = vadd.f32 %v1253_v3, %v1239_v0  ;;  %v1241_v8 = vadd.f32 %v2900_v63, %v1240_v4 }
 0x887   : > { %v1259_v9 = vmul.f32 0.7978846, %v1256_v5  ;;  %v1248_v10 = vmul.f32 %v1241_v8, %v1241_v8 }
 0x889   : > { %v1251_v6 = vmul.f32 %v1248_v10, %v1241_v8  ;;  %2523 = vtanh.f32 %v1259_v9 }
 0x88b   : > { %v1254_v11 = vmul.f32 0.044715, %v1251_v6  ;;  %v2433_v6 = vld [vmem:[%s3173_s4 + $0x18] sm:$0xff] }
 0x88c   : > { %1456 = vmatpush.bf16.msrb.mxu1 %v2433_v6 }
 0x88d   : > { %v1257_v13 = vadd.f32 %v1254_v11, %v1241_v8 }
 0x88f   : > { %v1260_v14 = vmul.f32 0.7978846, %v1257_v13  ;;  %v2524_v16 = vpop.eup %2523 }
 0x890   : > { %v1265_v7 = vadd.f32 1.0, %v2524_v16 }
 0x891   : > { %2525 = vtanh.f32 %v1260_v14 }
 0x892   : > { %v1268_v18 = vmul.f32 0.5, %v1265_v7 }
 0x894   : > { %v1271_v22 = vmul.f32 %v1268_v18, %v1239_v0 }
 0x897   : > { %v2526_v17 = vpop.eup %2525 }
 0x898   : > { %v1266_v19 = vadd.f32 1.0, %v2526_v17 }
 0x89a   : > { %v1269_v20 = vmul.f32 0.5, %v1266_v19 }
 0x89c   : > { %v1272_v23 = vmul.f32 %v1269_v20, %v1241_v8 }
 0x89e   : > { %v1274_v24 = vpack.c.bf16 %v1272_v23, %v1271_v22 }
 0x8a0   : > { %2330 = vmatmul.msk.bf16.vlgmr.msrb.gmra.mxu0 %vm1312_vm5, %v1274_v24 }
 0x8e5   : > { %v1131_v25 = vpop.xlane.xlu1 %1130 }
 0x8e6   : > { %v1134_v27 = vmul.f32 %v1131_v25, %v2698_v12 }
 0x8e8   : > { %v1137_v28 = vsub.f32 %v1120_v56, %v1134_v27 }
 0x8ea   : > { %v1140_v29 = vmul.f32 %v1137_v28, %v1137_v28 }
 0x8ec   : > { %v1147_v30 = vsel %vm559_vm0, %v1140_v29, 0.0 }
 0x8ed   : > { %1148 = vadd.xlane.f32.xlu2 %v1147_v30 }
 0x91d   : > { %v1328_v32 = vpop.f32.mrf.mxu0 }
 0x91e   : > { %v1329_v33 = vadd.f32 %v2913_v31, %v1328_v32 }
 0x920   : > { %v1337_v34 = vadd.f32 %v1329_v33, %v1198_v51 }
 0x922   : > { %v1342_v35 = vsel %vm559_vm0, %v1337_v34, 0.0 }
 0x923   : > { %1343 = vadd.xlane.f32.xlu1 %v1342_v35 }
 0x925   : > { %v1330_v36 = vpop.f32.mrf.mxu0 }
 0x926   : > { %v1331_v37 = vadd.f32 %v2913_v31, %v1330_v36 }
 0x928   : > { %v1338_v38 = vadd.f32 %v1331_v37, %v1199_v52 }
 0x92a   : > { %v1345_v40 = vsel %vm559_vm0, %v1338_v38, 0.0 }
 0x92b   : > { %1346 = vadd.xlane.f32.xlu2 %v1345_v40 }
 0x960   : > { %v1149_v42 = vpop.xlane.xlu2 %1148 }
 0x961   : > { %v1152_v43 = vmul.f32 %v1149_v42, %v2698_v12 }
 0x963   : > { %v1155_v45 = vadd.f32 1e-12, %v1152_v43 }
 0x965   : > { %2527 = vrsqrt.f32 %v1155_v45  ;;  %vm1182_vm7 = vweird.f32 %v1155_v45 }
 0x96b   : > { %v2528_v46 = vpop.eup %2527 }
 0x96c   : > { %v1177_v21 = vmul.f32 %v2528_v46, %v1155_v45  ;;  %vm1183_vm6 = vweird.f32 %v2528_v46  ;;  %v2478_v45 = vld [vmem:[%s3184_s15] ss:$0 sm:$0xff] }
 0x96d   : > { %vm1184_vm8 = vmor %vm1182_vm7, %vm1183_vm6 }
 0x96e   : > { %v1178_v48 = vmul.f32 %v2528_v46, %v1177_v21 }
 0x970   : > { %v1179_v50 = vmul.f32 0.5, %v1178_v48 }
 0x972   : > { %v1180_v15 = vsub.f32 1.5, %v1179_v50 }
 0x974   : > { %v1181_v51 = vmul.f32 %v2528_v46, %v1180_v15 }
 0x976   : > { %v1185_v53 = vsel %vm1184_vm8, %v2528_v46, %v1181_v51 }
 0x977   : > { %v1188_v54 = vmul.f32 %v1185_v53, %v1137_v28 }
 0x979   : > { %v1194_v52 = vmul.f32 %v2873_v44, %v1188_v54 }
 0x97b   : > { %v2922_v55 = vadd.f32 %v2878_v47, %v1194_v52 }
 0x97d   : > { %v1202_v56 = vpack.c.bf16 %v2922_v55, %v2922_v55 }
 0x97f   : > { %2313 = vmatmul.msk.bf16.gmra.mxu3 %vm559_vm0, %v1202_v56 }
 0x996   : > { %v1344_v58 = vpop.xlane.xlu1 %1343 }
 0x997   : > { %v1351_v59 = vmul.f32 %v1344_v58, %v2698_v12 }
 0x999   : > { %v1354_v26 = vsub.f32 %v1337_v34, %v1351_v59  ;;  %v2964_v59 = vld [vmem:[%s3174_s5 + $0x1] ss:$0 sm:$0xff] }
 0x99b   : > { %v1357_v60 = vmul.f32 %v1354_v26, %v1354_v26 }
 0x99d   : > { %v1360_v41 = vsel %vm559_vm0, %v1357_v60, 0.0 }
 0x99e   : > { %v1347_v61 = vpop.xlane.xlu2 %1346  ;;  %1361 = vadd.xlane.f32.xlu1 %v1360_v41 }
 0x99f   : > { %v1352_v62 = vmul.f32 %v1347_v61, %v2698_v12 }
 0x9a1   : > { %v1355_v44 = vsub.f32 %v1338_v38, %v1352_v62  ;;  %v2944_v38 = vld [vmem:[%s3183_s14] ss:$0 sm:$0xff] }
 0x9a3   : > { %v1358_v0 = vmul.f32 %v1355_v44, %v1355_v44 }
 0x9a5   : > { %v1363_v47 = vsel %vm559_vm0, %v1358_v0, 0.0 }
 0x9a6   : > { %1364 = vadd.xlane.f32.xlu0 %v1363_v47 }
 0xa02   : > { %v1243_v1 = vpop.f32.mrf.mxu3 }
 0xa03   : > { %v1244_v2 = vadd.f32 %v2900_v63, %v1243_v1  ;;  %v2432_v63 = vld [vmem:[%s3173_s4 + $0x10] sm:$0xff] }
 0xa04   : > { %1457 = vmatpush.bf16.msrb.mxu1 %v2432_v63 }
 0xa05   : > { %v1249_v3 = vmul.f32 %v1244_v2, %v1244_v2 }
 0xa07   : > { %v1252_v4 = vmul.f32 %v1249_v3, %v1244_v2 }
 0xa09   : > { %v1255_v5 = vmul.f32 0.044715, %v1252_v4 }
 0xa0a   : > { %v1245_v8 = vpop.f32.mrf.mxu3 }
 0xa0b   : > { %v1258_v9 = vadd.f32 %v1255_v5, %v1244_v2 }
 0xa0d   : > { %v1261_v10 = vmul.f32 0.7978846, %v1258_v9 }
 0xa0f   : > { %2529 = vtanh.f32 %v1261_v10 }
 0xa11   : > { %v1362_v11 = vpop.xlane.xlu1 %1361 }
 0xa12   : > { %v1369_v13 = vmul.f32 %v1362_v11, %v2698_v12 }
 0xa14   : > { %v1372_v14 = vadd.f32 1e-12, %v1369_v13 }
 0xa15   : > { %v2530_v16 = vpop.eup %2529 }
 0xa16   : > { %2531 = vrsqrt.f32 %v1372_v14  ;;  %v1267_v7 = vadd.f32 1.0, %v2530_v16  ;;  %vm1381_vm10 = vweird.f32 %v1372_v14 }
 0xa18   : > { %v1270_v17 = vmul.f32 0.5, %v1267_v7 }
 0xa19   : > { %v1365_v18 = vpop.xlane.xlu0 %1364 }
 0xa1a   : > { %v1370_v19 = vmul.f32 %v1365_v18, %v2698_v12  ;;  %v1273_v20 = vmul.f32 %v1270_v17, %v1244_v2 }
 0xa1c   : > { %v2532_v22 = vpop.eup %2531  ;;  %v1373_v23 = vadd.f32 1e-12, %v1370_v19  ;;  %v1275_v24 = vpack.c.bf16 %v1273_v20, %v1273_v20 }
 0xa1d   : > { %v1376_v25 = vmul.f32 %v2532_v22, %v1372_v14  ;;  %vm1382_vm9 = vweird.f32 %v2532_v22 }
 0xa1e   : > { %2533 = vrsqrt.f32 %v1373_v23  ;;  %2331 = vmatmul.msk.bf16.gmra.mxu0 %vm1312_vm5, %v1275_v24  ;;  %vm1383_vm14 = vmor %vm1381_vm10, %vm1382_vm9  ;;  %vm1391_vm1 = vweird.f32 %v1373_v23 }
 0xa1f   : > { %v1377_v27 = vmul.f32 %v2532_v22, %v1376_v25 }
 0xa21   : > { %v1378_v28 = vmul.f32 0.5, %v1377_v27 }
 0xa23   : > { %v1379_v29 = vsub.f32 1.5, %v1378_v28 }
 0xa24   : > { %v2534_v30 = vpop.eup %2533 }
 0xa25   : > { %v1380_v32 = vmul.f32 %v2532_v22, %v1379_v29  ;;  %v1386_v33 = vmul.f32 %v2534_v30, %v1373_v23  ;;  %vm1392_vm15 = vweird.f32 %v2534_v30 }
 0xa26   : > { %vm1393_vm2 = vmor %vm1391_vm1, %vm1392_vm15 }
 0xa27   : > { %v1387_v34 = vmul.f32 %v2534_v30, %v1386_v33  ;;  %v1384_v35 = vsel %vm1383_vm14, %v2532_v22, %v1380_v32 }
 0xa28   : > { %v1405_v40 = vmul.f32 %v1384_v35, %v1354_v26 }
 0xa29   : > { %v1388_v36 = vmul.f32 0.5, %v1387_v34 }
 0xa2a   : > { %v1411_v46 = vmul.f32 %v2944_v38, %v1405_v40 }
 0xa2b   : > { %v1389_v37 = vsub.f32 1.5, %v1388_v36 }
 0xa2c   : > { %v2951_v50 = vadd.f32 %v2478_v45, %v1411_v46 }
 0xa2d   : > { %v1390_v42 = vmul.f32 %v2534_v30, %v1389_v37 }
 0xa2f   : > { %v1394_v43 = vsel %vm1393_vm2, %v2534_v30, %v1390_v42 }
 0xa30   : > { %v1406_v21 = vmul.f32 %v1394_v43, %v1355_v44 }
 0xa32   : > { %v1412_v48 = vmul.f32 %v2944_v38, %v1406_v21 }
 0xa34   : > { %v2953_v15 = vadd.f32 %v2478_v45, %v1412_v48 }
 0xa36   : > { %v1420_v51 = vpack.c.bf16 %v2953_v15, %v2951_v50 }
 0xa38   : > { %2345 = vmatmul.msk.bf16.vlgmr.msrb.gmra.mxu1 %vm559_vm0, %v1420_v51 }
 0xa9b   : > { %v1333_v53 = vpop.f32.mrf.mxu0 }
 0xa9c   : > { %v1334_v54 = vadd.f32 %v2913_v31, %v1333_v53 }
 0xa9e   : > { %v1339_v52 = vadd.f32 %v1334_v54, %v2922_v55 }
 0xaa0   : > { %v1348_v56 = vsel %vm559_vm0, %v1339_v52, 0.0 }
 0xaa1   : > { %1349 = vadd.xlane.f32.xlu2 %v1348_v56 }
 0xaa3   : > { %v1335_v58 = vpop.f32.mrf.mxu0 }
 0xab5   : > { %v1459_v26 = vpop.f32.mrf.mxu1 }
 0xab6   : > { %v1460_v60 = vadd.f32 %v2964_v59, %v1459_v26 }
 0xab8   : > { %v1468_v41 = vpack.c.bf16 %v1460_v60, %v1460_v60 }
 0xaba   : > { %v1472_v61 = vunpack.c.l.b16 %v1468_v41 }
 0xabc   : > { %v2967_v62 = vpack.c.b16 %v1472_v61, %v1472_v61 }
 0xabd   : > { %v1461_v44 = vpop.f32.mrf.mxu1 }
 0xabe   : > { %v1462_v31 = vadd.f32 %v2964_v59, %v1461_v44  ;;  %1474 = vrot.lane.b32.xlu1 %v2967_v62, %s2588_s27 }
 0xac0   : > { %v1469_v55 = vpack.c.bf16 %v1462_v31, %v1462_v31 }
 0xac2   : > { %v1496_v0 = vunpack.c.l.b16 %v1469_v55 }
 0xac4   : > { %v2972_v47 = vpack.c.b16 %v1496_v0, %v1496_v0 }
 0xac6   : > { %1498 = vrot.lane.b32.xlu2 %v2972_v47, %s2588_s27 }
 0xb14   : > { %v1350_v1 = vpop.xlane.xlu2 %1349 }
 0xb15   : > { %v1353_v2 = vmul.f32 %v1350_v1, %v2698_v12 }
 0xb17   : > { %v1356_v3 = vsub.f32 %v1339_v52, %v1353_v2 }
 0xb19   : > { %v1359_v4 = vmul.f32 %v1356_v3, %v1356_v3 }
 0xb1b   : > { %v1366_v5 = vsel %vm559_vm0, %v1359_v4, 0.0 }
 0xb1c   : > { %1367 = vadd.xlane.f32.xlu1 %v1366_v5 }
 0xb20   : > { %v1499_v8 = vpop.permute.xlu2 %1498 }
 0xb21   : > { %v1504_v9 = vsel %vm699_vm11, %v1499_v8, 0 }
 0xb22   : > { %1513 = vmatpush.bf16.xpose.msra.mxu3 %v1504_v9 }
 0xb29   : > { %2348 = vmatmul.msk.bf16.vlgmr.msra.gmra.mxu3 %vm699_vm11, %v1469_v55 }
 0xb30   : > { %v1475_v10 = vpop.permute.xlu1 %1474 }
 0xb31   : > { %v1480_v6 = vsel %vm699_vm11, %v1475_v10, 0 }
 0xb32   : > { %1489 = vmatpush.bf16.xpose.msra.mxu2 %v1480_v6 }
 0xb35   : > { %1585 = vrot.lane.b32.xlu1 %v2967_v62, %s2591_s18 }
 0xb39   : > { %2347 = vmatmul.msk.bf16.vlgmr.msra.gmra.mxu2 %vm699_vm11, %v1468_v41 }
 0xb3d   : > { %1673 = vrot.lane.b32.xlu1 %v2972_v47, %s2589_s28 }
 0xb8f   : > { %v1368_v11 = vpop.xlane.xlu1 %1367 }
 0xb90   : > { %v1371_v13 = vmul.f32 %v1368_v11, %v2698_v12 }
 0xb92   : > { %v1374_v14 = vadd.f32 1e-12, %v1371_v13 }
 0xb94   : > { %2535 = vrsqrt.f32 %v1374_v14  ;;  %vm1401_vm4 = vweird.f32 %v1374_v14 }
 0xb9a   : > { %v2536_v63 = vpop.eup %2535 }
 0xb9b   : > { %v1396_v16 = vmul.f32 %v2536_v63, %v1374_v14  ;;  %vm1402_vm3 = vweird.f32 %v2536_v63 }
 0xb9c   : > { %vm1403_vm6 = vmor %vm1401_vm4, %vm1402_vm3 }
 0xb9d   : > { %v1397_v7 = vmul.f32 %v2536_v63, %v1396_v16 }
 0xb9f   : > { %v1398_v17 = vmul.f32 0.5, %v1397_v7 }
 0xba1   : > { %v1399_v18 = vsub.f32 1.5, %v1398_v17 }
 0xba3   : > { %v1400_v19 = vmul.f32 %v2536_v63, %v1399_v18 }
 0xba5   : > { %v1404_v20 = vsel %vm1403_vm6, %v2536_v63, %v1400_v19 }
 0xba6   : > { %v1407_v22 = vmul.f32 %v1404_v20, %v1356_v3 }
 0xba7   : > { %v1586_v23 = vpop.permute.xlu1 %1585 }
 0xba8   : > { %v1591_v24 = vsel %vm824_vm13, %v1586_v23, 0  ;;  %v1413_v25 = vmul.f32 %v2944_v38, %v1407_v22 }
 0xba9   : > { %1600 = vmatpush.bf16.msra.mxu1 %v1591_v24 }
 0xbaa   : > { %v2989_v27 = vadd.f32 %v2478_v45, %v1413_v25 }
 0xbac   : > { %v1515_v28 = vpop.f32.mrf.mxu3  ;;  %v1421_v29 = vpack.c.bf16 %v2989_v27, %v2989_v27 }
 0xbad   : > { %v1544_v30 = vmul.f32 0.25, %v1515_v28 }
 0xbae   : > { %2346 = vmatmul.msk.bf16.gmra.mxu1 %vm559_vm0, %v1421_v29 }
 0xbaf   : > { %v1674_v32 = vpop.permute.xlu1 %1673  ;;  %v1547_v33 = vadd.f32 %v1544_v30, %v2772_v49 }
 0xbb0   : > { %v1679_v34 = vsel %vm699_vm11, %v1674_v32, 0 }
 0xbb1   : > { %1688 = vmatpush.bf16.xpose.msrb.mxu1 %v1679_v34  ;;  %v1552_v35 = vsel %vm782_vm12, %v1547_v33, -inf }
 0xbb2   : > { %1553 = vmax.xlane.f32.xlu0 %v1552_v35 }
 0xbb4   : > { %v1517_v36 = vpop.f32.mrf.mxu3 }
 0xbbc   : > { %v1491_v37 = vpop.f32.mrf.mxu2 }
 0xbbd   : > { %v1543_v38 = vmul.f32 0.25, %v1491_v37 }
 0xbbf   : > { %v1546_v40 = vadd.f32 %v1543_v38, %v2776_v57 }
 0xbc1   : > { %v1549_v42 = vsel %vm782_vm12, %v1546_v40, -inf }
 0xbc2   : > { %1550 = vmax.xlane.f32.xlu2 %v1549_v42 }
 0xbc4   : > { %v1493_v43 = vpop.f32.mrf.mxu2 }
 0xbda   : > { %1650 = vrot.lane.b32.xlu2 %v2967_v62, %s2589_s28 }
 0xbe2   : > { %1648 = vrot.lane.b32.xlu2 %v2967_v62, %s2590_s29 }
 0xbea   : > { %1671 = vrot.lane.b32.xlu2 %v2972_v47, %s2590_s29 }
 0xc25   : > { %v1554_v45 = vpop.xlane.xlu0 %1553 }
 0xc26   : > { %v1559_v46 = vsub.f32 %v1547_v33, %v1554_v45 }
 0xc28   : > { %v1563_v21 = vmul.f32 1.442695, %v1559_v46 }
 0xc2a   : > { %2537 = vpow2.f32 %v1563_v21 }
 0xc2b   : > { %v1464_v48 = vpop.f32.mrf.mxu1 }
 0xc2c   : > { %v1465_v51 = vadd.f32 %v2964_v59, %v1464_v48 }
 0xc2e   : > { %v1470_v53 = vpack.c.bf16 %v1465_v51, %v1465_v51 }
 0xc30   : > { %v2538_v54 = vpop.eup %2537  ;;  %v1520_v52 = vunpack.c.l.b16 %v1470_v53 }
 0xc31   : > { %v1570_v56 = vsel %vm782_vm12, %v2538_v54, 0.0 }
 0xc32   : > { %v3007_v58 = vpack.c.b16 %v1520_v52, %v1520_v52  ;;  %1571 = vadd.xlane.f32.xlu1 %v1570_v56 }
 0xc33   : > { %v1466_v26 = vpop.f32.mrf.mxu1 }
 0xc34   : > { %1696 = vrot.lane.b32.xlu2 %v3007_v58, %s2589_s28  ;;  %1522 = vrot.lane.b32.xlu0 %v3007_v58, %s2588_s27 }
 0xc35   : > { %v1551_v60 = vpop.xlane.xlu2 %1550 }
 0xc36   : > { %v1558_v59 = vsub.f32 %v1546_v40, %v1551_v60 }
 0xc38   : > { %v1561_v41 = vmul.f32 1.442695, %v1558_v59 }
 0xc3a   : > { %2539 = vpow2.f32 %v1561_v41 }
 0xc3c   : > { %1694 = vrot.lane.b32.xlu2 %v3007_v58, %s2590_s29  ;;  %s3191_s29 = smov 16  }
 0xc3d   : > { %v1651_v31 = vpop.permute.xlu2 %1650 }
 0xc3e   : > { %v1656_v1 = vsel %vm699_vm11, %v1651_v31, 0 }
 0xc40   : > { %v2540_v61 = vpop.eup %2539 }
 0xc41   : > { %v1567_v44 = vsel %vm782_vm12, %v2540_v61, 0.0 }
 0xc45   : > { %v1649_v2 = vpop.permute.xlu2 %1648 }
 0xc4d   : > { %v1672_v9 = vpop.permute.xlu2 %1671 }
 0xc5e   : > { %1568 = vadd.xlane.f32.xlu0 %v1567_v44 }
 0xc72   : > { %1606 = vrot.lane.b32.xlu0 %v2972_v47, %s2591_s18 }
 0xc8e   : > { %v1697_v11 = vpop.permute.xlu2 %1696 }
 0xc8f   : > { %v1702_v16 = vsel %vm699_vm11, %v1697_v11, 0 }
 0xc96   : > { %v1695_v17 = vpop.permute.xlu2 %1694 }
 0xca5   : > { %v1572_v4 = vpop.xlane.xlu1 %1571 }
 0xca6   : > { %v1523_v55 = vpop.permute.xlu0 %1522 }
 0xca7   : > { %v1528_v0 = vsel %vm699_vm11, %v1523_v55, 0 }
 0xca8   : > { %1537 = vmatpush.bf16.xpose.msra.mxu0 %v1528_v0 }
 0xcaf   : > { %2349 = vmatmul.msk.bf16.vlgmr.msra.gmra.mxu0 %vm699_vm11, %v1470_v53 }
 0xcb0   : > { %1665 = vmatpush.bf16.xpose.msrb.mxu0 %v1656_v1 }
 0xcbf   : > { %2353 = vmatmul.msk.bf16.vlgmr.msrb.gmra.mxu0 %vm699_vm11, %v1649_v2 }
 0xcd1   : > { %v1569_v3 = vpop.xlane.xlu0 %1568 }
 0xcd2   : > { %2541 = vrcp.f32 %v1569_v3 }
 0xcd3   : > { %2543 = vrcp.f32 %v1572_v4 }
 0xcd8   : > { %v2542_v5 = vpop.eup %2541 }
 0xcd9   : > { %v1579_v8 = vmul.f32 %v2542_v5, %v2540_v61  ;;  %v2544_v6 = vpop.eup %2543 }
 0xcda   : > { %v1580_v13 = vmul.f32 %v2544_v6, %v2538_v54 }
 0xcdb   : > { %v1582_v10 = vpack.c.bf16 %v1579_v8, %v1579_v8 }
 0xcdc   : > { %v1583_v7 = vpack.c.bf16 %v1580_v13, %v1580_v13 }
 0xcdd   : > { %2350 = vmatmul.msk.bf16.vlgmr.msra.gmra.mxu1 %vm782_vm12, %v1582_v10 }
 0xce4   : > { %v1607_v14 = vpop.permute.xlu0 %1606 }
 0xce5   : > { %v1612_v63 = vsel %vm824_vm13, %v1607_v14, 0 }
 0xce6   : > { %1621 = vmatpush.bf16.msrb.mxu2 %v1612_v63 }
 0xce9   : > { %2351 = vmatmul.msk.bf16.vlgmr.msrb.gmra.mxu2 %vm782_vm12, %v1583_v7 }
 0xcea   : > { %1711 = vmatpush.bf16.xpose.msra.mxu2 %v1702_v16 }
 0xced   : > { %2354 = vmatmul.msk.bf16.vlgmr.msrb.gmra.mxu1 %vm699_vm11, %v1672_v9 }
 0xcf9   : > { %2355 = vmatmul.msk.bf16.vlgmr.msra.gmra.mxu2 %vm699_vm11, %v1695_v17 }
 0xd2c   : > { %v1539_v18 = vpop.f32.mrf.mxu0 }
 0xd2d   : > { %v1545_v19 = vmul.f32 0.25, %v1539_v18 }
 0xd2f   : > { %v1548_v20 = vadd.f32 %v1545_v19, %v2768_v39 }
 0xd31   : > { %v1555_v22 = vsel %vm782_vm12, %v1548_v20, -inf }
 0xd32   : > { %1556 = vmax.xlane.f32.xlu2 %v1555_v22 }
 0xd34   : > { %v1541_v23 = vpop.f32.mrf.mxu0 }
 0xd3c   : > { %v1667_v24 = vpop.f32.mrf.mxu0 }
 0xd3d   : > { %v1717_v25 = vmul.f32 0.25, %v1667_v24 }
 0xd3f   : > { %v1720_v28 = vadd.f32 %v1717_v25, %v2776_v57 }
 0xd41   : > { %v1723_v29 = vsel %vm782_vm12, %v1720_v28, -inf }
 0xd42   : > { %1724 = vmax.xlane.f32.xlu0 %v1723_v29 }
 0xd44   : > { %v1669_v30 = vpop.f32.mrf.mxu0 }
 0xd56   : > { %1780 = vrot.lane.b32.xlu0 %v2972_v47, %s2592_s19 }
 0xd5a   : > { %v3034_v32 = vpop.f32.mrf.mxu1 }
 0xd62   : > { %v1604_v33 = vpop.f32.mrf.mxu1 }
 0xd6a   : > { %v1690_v34 = vpop.f32.mrf.mxu1 }
 0xd6b   : > { %v1718_v46 = vmul.f32 0.25, %v1690_v34 }
 0xd6c   : > { %v3036_v35 = vpop.f32.mrf.mxu2 }
 0xd6d   : > { %v1721_v48 = vadd.f32 %v1718_v46, %v2772_v49 }
 0xd6f   : > { %v1726_v52 = vsel %vm782_vm12, %v1721_v48, -inf }
 0xd72   : > { %v1692_v36 = vpop.f32.mrf.mxu1 }
 0xd73   : > { %v2435_v36 = vld [vmem:[%s3175_s6 + $0x18] sm:$0xff] }
 0xd74   : > { %v1625_v37 = vpop.f32.mrf.mxu2  ;;  %1873 = vmatpush.bf16.msrb.mxu2 %v2435_v36 }
 0xd7c   : > { %v1713_v38 = vpop.f32.mrf.mxu2 }
 0xd7d   : > { %v1719_v54 = vmul.f32 0.25, %v1713_v38 }
 0xd7f   : > { %v1722_v56 = vadd.f32 %v1719_v54, %v2768_v39 }
 0xd81   : > { %v1729_v59 = vsel %vm782_vm12, %v1722_v56, -inf }
 0xd84   : > { %v1715_v40 = vpop.f32.mrf.mxu2 }
 0xda5   : > { %v1557_v42 = vpop.xlane.xlu2 %1556 }
 0xda6   : > { %v1560_v43 = vsub.f32 %v1548_v20, %v1557_v42 }
 0xda8   : > { %v1565_v57 = vmul.f32 1.442695, %v1560_v43 }
 0xdaa   : > { %2545 = vpow2.f32 %v1565_v57  ;;  %v2434_v57 = vld [vmem:[%s3175_s6 + $0x10] sm:$0xff] }
 0xdab   : > { %1874 = vmatpush.bf16.msrb.mxu2 %v2434_v57  ;;  %v2482_v57 = vld [vmem:[%s3178_s9 + $0x1] ss:$0 sm:$0xff] }
 0xdb0   : > { %v2546_v45 = vpop.eup %2545 }
 0xdb1   : > { %v1573_v21 = vsel %vm782_vm12, %v2546_v45, 0.0 }
 0xdb2   : > { %1574 = vadd.xlane.f32.xlu1 %v1573_v21 }
 0xdb5   : > { %v1725_v47 = vpop.xlane.xlu0 %1724 }
 0xdb6   : > { %v1732_v51 = vsub.f32 %v1720_v28, %v1725_v47 }
 0xdb8   : > { %v1735_v53 = vmul.f32 1.442695, %v1732_v51 }
 0xdba   : > { %2547 = vpow2.f32 %v1735_v53  ;;  %1727 = vmax.xlane.f32.xlu1 %v1726_v52 }
 0xdc0   : > { %v2548_v26 = vpop.eup %2547 }
 0xdc1   : > { %v1741_v60 = vsel %vm782_vm12, %v2548_v26, 0.0 }
 0xdc2   : > { %1742 = vadd.xlane.f32.xlu2 %v1741_v60  ;;  %1730 = vmax.xlane.f32.xlu1 %v1729_v59 }
 0xdc8   : > { %v1781_v41 = vpop.permute.xlu0 %1780 }
 0xdc9   : > { %v1786_v61 = vsel %vm824_vm13, %v1781_v41, 0 }
 0xdca   : > { %1795 = vmatpush.bf16.msra.mxu0 %v1786_v61 }
 0xdda   : > { %1759 = vrot.lane.b32.xlu2 %v2967_v62, %s2592_s19 }
 0xddb   : > { %1627 = vrot.lane.b32.xlu1 %v3007_v58, %s2591_s18 }
 0xe25   : > { %v1575_v49 = vpop.xlane.xlu1 %1574 }
 0xe2d   : > { %v1728_v44 = vpop.xlane.xlu1 %1727 }
 0xe2e   : > { %v1733_v39 = vsub.f32 %v1721_v48, %v1728_v44 }
 0xe30   : > { %v1737_v31 = vmul.f32 1.442695, %v1733_v39 }
 0xe32   : > { %2549 = vpow2.f32 %v1737_v31 }
 0xe35   : > { %v1731_v55 = vpop.xlane.xlu1 %1730  ;;  %v1743_v62 = vpop.xlane.xlu2 %1742 }
 0xe36   : > { %v1734_v0 = vsub.f32 %v1722_v56, %v1731_v55  ;;  %v2480_v56 = vld [vmem:[%s3176_s7 + $0x1] ss:$0 sm:$0xff] }
 0xe38   : > { %v2550_v1 = vpop.eup %2549  ;;  %v1739_v2 = vmul.f32 1.442695, %v1734_v0 }
 0xe39   : > { %v1744_v3 = vsel %vm782_vm12, %v2550_v1, 0.0 }
 0xe3a   : > { %2551 = vpow2.f32 %v1739_v2  ;;  %1745 = vadd.xlane.f32.xlu0 %v1744_v3 }
 0xe3b   : > { %2553 = vrcp.f32 %v1575_v49 }
 0xe3c   : > { %2555 = vrcp.f32 %v1743_v62 }
 0xe3d   : > { %v1760_v10 = vpop.permute.xlu2 %1759 }
 0xe3e   : > { %v1765_v13 = vsel %vm824_vm13, %v1760_v10, 0 }
 0xe40   : > { %v2552_v4 = vpop.eup %2551 }
 0xe41   : > { %v1747_v5 = vsel %vm782_vm12, %v2552_v4, 0.0  ;;  %v2554_v8 = vpop.eup %2553 }
 0xe42   : > { %1748 = vadd.xlane.f32.xlu1 %v1747_v5  ;;  %v1581_v9 = vmul.f32 %v2554_v8, %v2546_v45  ;;  %v2556_v63 = vpop.eup %2555 }
 0xe43   : > { %v1753_v16 = vmul.f32 %v2556_v63, %v2548_v26 }
 0xe44   : > { %v1584_v14 = vpack.c.bf16 %v1581_v9, %v1581_v9 }
 0xe45   : > { %v1756_v7 = vpack.c.bf16 %v1753_v16, %v1753_v16 }
 0xe4d   : > { %v1628_v6 = vpop.permute.xlu1 %1627 }
 0xe4e   : > { %v1633_v11 = vsel %vm824_vm13, %v1628_v6, 0  ;;  %1801 = vrot.lane.b32.xlu0 %v3007_v58, %s2592_s19 }
 0xe4f   : > { %1642 = vmatpush.bf16.msrb.mxu3 %v1633_v11 }
 0xe52   : > { %2352 = vmatmul.msk.bf16.vlgmr.msrb.gmra.mxu3 %vm782_vm12, %v1584_v14  ;;  %v2437_v14 = vld [vmem:[%s3179_s10 + $0x18] sm:$0xff] }
 0xe53   : > { %1774 = vmatpush.bf16.msra.mxu3 %v1765_v13 }
 0xe57   : > { %2006 = vmatpush.bf16.msrb.mxu3 %v2437_v14 }
 0xe62   : > { %2356 = vmatmul.msk.bf16.vlgmr.msra.gmra.mxu3 %vm782_vm12, %v1756_v7 }
 0xead   : > { %v1746_v17 = vpop.xlane.xlu0 %1745 }
 0xeae   : > { %2557 = vrcp.f32 %v1746_v17  ;;  %v2436_v17 = vld [vmem:[%s3179_s10 + $0x10] sm:$0xff] }
 0xeaf   : > { %2007 = vmatpush.bf16.msrb.mxu3 %v2436_v17 }
 0xeb4   : > { %v2558_v18 = vpop.eup %2557 }
 0xeb5   : > { %v1754_v19 = vmul.f32 %v2558_v18, %v2550_v1  ;;  %v1749_v20 = vpop.xlane.xlu1 %1748 }
 0xeb6   : > { %2559 = vrcp.f32 %v1749_v20 }
 0xeb7   : > { %v1757_v58 = vpack.c.bf16 %v1754_v19, %v1754_v19 }
 0xeb9   : > { %2357 = vmatmul.msk.bf16.vlgmr.msra.gmra.mxu0 %vm782_vm12, %v1757_v58 }
 0xebc   : > { %v2560_v22 = vpop.eup %2559 }
 0xebd   : > { %v1755_v23 = vmul.f32 %v2560_v22, %v2552_v4 }
 0xebf   : > { %v1758_v28 = vpack.c.bf16 %v1755_v23, %v1755_v23 }
 0xec0   : > { %v1802_v24 = vpop.permute.xlu0 %1801 }
 0xec1   : > { %v1807_v25 = vsel %vm824_vm13, %v1802_v24, 0 }
 0xec2   : > { %1816 = vmatpush.bf16.msra.mxu1 %v1807_v25 }
 0xec5   : > { %2358 = vmatmul.msk.bf16.vlgmr.msra.gmra.mxu1 %vm782_vm12, %v1758_v28 }
 0xed5   : > { %v1644_v29 = vpop.f32.mrf.mxu3 }
 0xedd   : > { %v1646_v30 = vpop.f32.mrf.mxu3 }
 0xee5   : > { %v1776_v33 = vpop.f32.mrf.mxu3 }
 0xeed   : > { %v1778_v34 = vpop.f32.mrf.mxu3 }
 0xf36   : > { %v1797_v37 = vpop.f32.mrf.mxu0 }
 0xf37   : > { %v2464_v38 = vpack.i.bf16 %v1797_v37, %v1776_v33 }
 0xf39   : > { %2465 = vrot.lane.b32.xlu2 %v2464_v38, %s3191_s29  ;;  %v2481_v38 = vld [vmem:[%s3177_s8 + $0x1] ss:$0 sm:$0xff] }
 0xf3e   : > { %v1799_v40 = vpop.f32.mrf.mxu0 }
 0xf42   : > { %v1818_v42 = vpop.f32.mrf.mxu1 }
 0xf43   : > { %1829 = vrot.lane.b32.xlu0 %v1818_v42, %s3191_s29 }
 0xf4a   : > { %v1820_v43 = vpop.f32.mrf.mxu1 }
 0xf93   : > { %v2466_v45 = vpop.permute.xlu2 %2465 }
 0xf94   : > { %v2468_v46 = vunpack.i.h.bf16 %v2466_v45  ;;  %v2467_v21 = vunpack.i.l.bf16 %v2466_v45 }
 0xf96   : > { %v1835_v47 = vsel %vm699_vm11, %v3036_v35, %v2468_v46  ;;  %v1834_v48 = vsel %vm699_vm11, %v3034_v32, %v2467_v21 }
 0xf97   : > { %v1837_v51 = vpack.c.bf16 %v1835_v47, %v1834_v48 }
 0xf99   : > { %2372 = vmatmul.msk.bf16.vlgmr.msrb.gmra.mxu2 %vm559_vm0, %v1837_v51 }
 0xfb5   : > { %v1830_v53 = vpop.permute.xlu0 %1829 }
 0xfb6   : > { %v1836_v54 = vsel %vm699_vm11, %v1644_v29, %v1830_v53 }
 0xfb7   : > { %v1838_v52 = vpack.c.bf16 %v1836_v54, %v1836_v54 }
 0xfb9   : > { %2373 = vmatmul.msk.bf16.gmra.mxu2 %vm559_vm0, %v1838_v52 }
0x101c   : > { %v1876_v26 = vpop.f32.mrf.mxu2 }
0x101d   : > { %v1877_v60 = vadd.f32 %v2480_v56, %v1876_v26 }
0x101f   : > { %v1885_v35 = vadd.f32 %v1877_v60, %v2951_v50 }
0x1021   : > { %v1892_v59 = vsel %vm559_vm0, %v1885_v35, 0.0 }
0x1022   : > { %1893 = vadd.xlane.f32.xlu2 %v1892_v59 }
0x1024   : > { %v1878_v32 = vpop.f32.mrf.mxu2 }
0x1025   : > { %v1879_v41 = vadd.f32 %v2480_v56, %v1878_v32 }
0x1027   : > { %v1886_v61 = vadd.f32 %v1879_v41, %v2953_v15 }
0x1029   : > { %v1895_v49 = vsel %vm559_vm0, %v1886_v61, 0.0 }
0x102a   : > { %1896 = vadd.xlane.f32.xlu0 %v1895_v49 }
0x103c   : > { %v1881_v44 = vpop.f32.mrf.mxu2 }
0x103d   : > { %v1882_v39 = vadd.f32 %v2480_v56, %v1881_v44 }
0x103f   : > { %v1887_v31 = vadd.f32 %v1882_v39, %v2989_v27 }
0x1041   : > { %v1898_v55 = vsel %vm559_vm0, %v1887_v31, 0.0 }
0x1042   : > { %1899 = vadd.xlane.f32.xlu1 %v1898_v55  ;;  %v2440_v55 = vld [vmem:[%s3181_s12 + $0x30] sm:$0xff] }
0x1044   : > { %v1883_v0 = vpop.f32.mrf.mxu2 }
0x1045   : > { %v2439_v0 = vld [vmem:[%s3181_s12 + $0x28] sm:$0xff] }
0x1095   : > { %v1894_v1 = vpop.xlane.xlu2 %1893 }
0x1096   : > { %v1901_v50 = vmul.f32 %v1894_v1, %v2698_v12  ;;  %v2483_v1 = vld [vmem:[%s3180_s11 + $0x1] ss:$0 sm:$0xff] }
0x1098   : > { %v1904_v2 = vsub.f32 %v1885_v35, %v1901_v50 }
0x109a   : > { %v1907_v3 = vmul.f32 %v1904_v2, %v1904_v2 }
0x109c   : > { %v1910_v4 = vsel %vm559_vm0, %v1907_v3, 0.0 }
0x109d   : > { %1911 = vadd.xlane.f32.xlu1 %v1910_v4  ;;  %v1897_v15 = vpop.xlane.xlu0 %1896 }
0x109e   : > { %v1902_v5 = vmul.f32 %v1897_v15, %v2698_v12 }
0x10a0   : > { %v1905_v62 = vsub.f32 %v1886_v61, %v1902_v5 }
0x10a2   : > { %v1908_v8 = vmul.f32 %v1905_v62, %v1905_v62 }
0x10a4   : > { %v1913_v9 = vsel %vm559_vm0, %v1908_v8, 0.0 }
0x10a5   : > { %1914 = vadd.xlane.f32.xlu2 %v1913_v9 }
0x10b5   : > { %v1900_v27 = vpop.xlane.xlu1 %1899 }
0x10b6   : > { %v1903_v10 = vmul.f32 %v1900_v27, %v2698_v12 }
0x10b8   : > { %v1906_v6 = vsub.f32 %v1887_v31, %v1903_v10  ;;  %v2441_v31 = vld [vmem:[%s3181_s12 + $0x38] sm:$0xff] }
0x10b9   : > { %2095 = vmatpush.bf16.msrb.mxu0 %v2441_v31 }
0x10ba   : > { %v1909_v11 = vmul.f32 %v1906_v6, %v1906_v6 }
0x10bc   : > { %v1916_v13 = vsel %vm559_vm0, %v1909_v11, 0.0 }
0x10bd   : > { %1917 = vadd.xlane.f32.xlu1 %v1916_v13  ;;  %2096 = vmatpush.bf16.msrb.mxu0 %v2440_v55 }
0x10c1   : > { %2097 = vmatpush.bf16.msrb.mxu0 %v2439_v0 }
0x1110   : > { %v1912_v63 = vpop.xlane.xlu1 %1911 }
0x1111   : > { %v1919_v16 = vmul.f32 %v1912_v63, %v2698_v12 }
0x1113   : > { %v1922_v7 = vadd.f32 1e-12, %v1919_v16 }
0x1115   : > { %2561 = vrsqrt.f32 %v1922_v7  ;;  %vm1931_vm12 = vweird.f32 %v1922_v7 }
0x1118   : > { %v1915_v18 = vpop.xlane.xlu2 %1914 }
0x1119   : > { %v1920_v19 = vmul.f32 %v1915_v18, %v2698_v12 }
0x111b   : > { %v2562_v20 = vpop.eup %2561  ;;  %v1923_v58 = vadd.f32 1e-12, %v1920_v19 }
0x111c   : > { %v1926_v22 = vmul.f32 %v2562_v20, %v1922_v7  ;;  %vm1932_vm11 = vweird.f32 %v2562_v20 }
0x111d   : > { %2563 = vrsqrt.f32 %v1923_v58  ;;  %vm1933_vm13 = vmor %vm1931_vm12, %vm1932_vm11  ;;  %vm1941_vm8 = vweird.f32 %v1923_v58 }
0x111e   : > { %v1927_v23 = vmul.f32 %v2562_v20, %v1926_v22 }
0x1120   : > { %v1928_v24 = vmul.f32 0.5, %v1927_v23 }
0x1122   : > { %v1929_v25 = vsub.f32 1.5, %v1928_v24 }
0x1123   : > { %v2564_v28 = vpop.eup %2563 }
0x1124   : > { %v1930_v29 = vmul.f32 %v2562_v20, %v1929_v25  ;;  %v1936_v30 = vmul.f32 %v2564_v28, %v1923_v58  ;;  %vm1942_vm7 = vweird.f32 %v2564_v28 }
0x1125   : > { %vm1943_vm9 = vmor %vm1941_vm8, %vm1942_vm7 }
0x1126   : > { %v1937_v33 = vmul.f32 %v2564_v28, %v1936_v30  ;;  %v1934_v34 = vsel %vm1933_vm13, %v2562_v20, %v1930_v29 }
0x1127   : > { %v1955_v40 = vmul.f32 %v1934_v34, %v1904_v2  ;;  %v2438_v2 = vld [vmem:[%s3181_s12 + $0x20] sm:$0xff] }
0x1128   : > { %v1938_v36 = vmul.f32 0.5, %v1937_v33  ;;  %2098 = vmatpush.bf16.msrb.mxu0 %v2438_v2 }
0x1129   : > { %v1961_v45 = vmul.f32 %v2481_v38, %v1955_v40 }
0x112a   : > { %v1939_v37 = vsub.f32 1.5, %v1938_v36 }
0x112b   : > { %v3105_v51 = vadd.f32 %v2482_v57, %v1961_v45 }
0x112c   : > { %v1940_v42 = vmul.f32 %v2564_v28, %v1939_v37 }
0x112e   : > { %v1944_v43 = vsel %vm1943_vm9, %v2564_v28, %v1940_v42 }
0x112f   : > { %v1956_v46 = vmul.f32 %v1944_v43, %v1905_v62  ;;  %v2484_v43 = vld [vmem:[%s3182_s13 + $0x1] ss:$0 sm:$0xff] }
0x1130   : > { %v1918_v21 = vpop.xlane.xlu1 %1917 }
0x1131   : > { %v1962_v47 = vmul.f32 %v2481_v38, %v1956_v46  ;;  %v1921_v48 = vmul.f32 %v1918_v21, %v2698_v12 }
0x1133   : > { %v3107_v53 = vadd.f32 %v2482_v57, %v1962_v47  ;;  %v1924_v54 = vadd.f32 1e-12, %v1921_v48 }
0x1135   : > { %2565 = vrsqrt.f32 %v1924_v54  ;;  %v1970_v52 = vpack.c.bf16 %v3107_v53, %v3105_v51  ;;  %vm1951_vm14 = vweird.f32 %v1924_v54 }
0x1137   : > { %2389 = vmatmul.msk.bf16.vlgmr.msrb.gmra.mxu3 %vm559_vm0, %v1970_v52 }
0x113b   : > { %v2566_v56 = vpop.eup %2565 }
0x113c   : > { %v1946_v26 = vmul.f32 %v2566_v56, %v1924_v54  ;;  %vm1952_vm10 = vweird.f32 %v2566_v56 }
0x113d   : > { %vm1953_vm15 = vmor %vm1951_vm14, %vm1952_vm10 }
0x113e   : > { %v1947_v60 = vmul.f32 %v2566_v56, %v1946_v26 }
0x1140   : > { %v1948_v35 = vmul.f32 0.5, %v1947_v60 }
0x1142   : > { %v1949_v59 = vsub.f32 1.5, %v1948_v35 }
0x1144   : > { %v1950_v32 = vmul.f32 %v2566_v56, %v1949_v59 }
0x1146   : > { %v1954_v41 = vsel %vm1953_vm15, %v2566_v56, %v1950_v32 }
0x1147   : > { %v1957_v61 = vmul.f32 %v1954_v41, %v1906_v6 }
0x1149   : > { %v1963_v49 = vmul.f32 %v2481_v38, %v1957_v61 }
0x114b   : > { %v3112_v44 = vadd.f32 %v2482_v57, %v1963_v49 }
0x114d   : > { %v1971_v39 = vpack.c.bf16 %v3112_v44, %v3112_v44 }
0x114f   : > { %2390 = vmatmul.msk.bf16.gmra.mxu3 %vm559_vm0, %v1971_v39 }
0x11ba   : > { %v2009_v50 = vpop.f32.mrf.mxu3 }
0x11bb   : > { %v2010_v3 = vadd.f32 %v2483_v1, %v2009_v50 }
0x11bd   : > { %v2018_v4 = vmul.f32 %v2010_v3, %v2010_v3 }
0x11bf   : > { %v2021_v15 = vmul.f32 %v2018_v4, %v2010_v3 }
0x11c1   : > { %v2024_v5 = vmul.f32 0.044715, %v2021_v15 }
0x11c2   : > { %v2011_v62 = vpop.f32.mrf.mxu3 }
0x11c3   : > { %v2027_v8 = vadd.f32 %v2024_v5, %v2010_v3  ;;  %v2012_v9 = vadd.f32 %v2483_v1, %v2011_v62 }
0x11c5   : > { %v2030_v27 = vmul.f32 0.7978846, %v2027_v8  ;;  %v2019_v10 = vmul.f32 %v2012_v9, %v2012_v9 }
0x11c7   : > { %v2022_v6 = vmul.f32 %v2019_v10, %v2012_v9  ;;  %2567 = vtanh.f32 %v2030_v27 }
0x11c9   : > { %v2025_v11 = vmul.f32 0.044715, %v2022_v6 }
0x11cb   : > { %v2028_v13 = vadd.f32 %v2025_v11, %v2012_v9 }
0x11cd   : > { %v2031_v14 = vmul.f32 0.7978846, %v2028_v13  ;;  %v2568_v63 = vpop.eup %2567 }
0x11ce   : > { %v2036_v16 = vadd.f32 1.0, %v2568_v63 }
0x11cf   : > { %2569 = vtanh.f32 %v2031_v14 }
0x11d0   : > { %v2039_v20 = vmul.f32 0.5, %v2036_v16 }
0x11d2   : > { %v2014_v7 = vpop.f32.mrf.mxu3  ;;  %v2042_v25 = vmul.f32 %v2039_v20, %v2010_v3 }
0x11d3   : > { %v2015_v17 = vadd.f32 %v2483_v1, %v2014_v7 }
0x11d5   : > { %v2570_v18 = vpop.eup %2569  ;;  %v2020_v19 = vmul.f32 %v2015_v17, %v2015_v17 }
0x11d6   : > { %v2037_v58 = vadd.f32 1.0, %v2570_v18 }
0x11d7   : > { %v2023_v22 = vmul.f32 %v2020_v19, %v2015_v17  ;;  %v2485_v19 = vld [vmem:[%s3183_s14 + $0x1] ss:$0 sm:$0xff] }
0x11d8   : > { %v2040_v23 = vmul.f32 0.5, %v2037_v58 }
0x11d9   : > { %v2026_v24 = vmul.f32 0.044715, %v2023_v22 }
0x11da   : > { %v2043_v28 = vmul.f32 %v2040_v23, %v2012_v9  ;;  %v2016_v29 = vpop.f32.mrf.mxu3 }
0x11db   : > { %v2029_v30 = vadd.f32 %v2026_v24, %v2015_v17 }
0x11dc   : > { %v2045_v33 = vpack.c.bf16 %v2043_v28, %v2042_v25 }
0x11dd   : > { %v2032_v34 = vmul.f32 0.7978846, %v2029_v30 }
0x11de   : > { %2416 = vmatmul.msk.bf16.vlgmr.msrb.gmra.mxu0 %vm1312_vm5, %v2045_v33 }
0x11df   : > { %2571 = vtanh.f32 %v2032_v34 }
0x11e5   : > { %v2572_v36 = vpop.eup %2571 }
0x11e6   : > { %v2038_v37 = vadd.f32 1.0, %v2572_v36 }
0x11e8   : > { %v2041_v38 = vmul.f32 0.5, %v2038_v37 }
0x11ea   : > { %v2044_v40 = vmul.f32 %v2041_v38, %v2015_v17 }
0x11ec   : > { %v2046_v42 = vpack.c.bf16 %v2044_v40, %v2044_v40 }
0x11ee   : > { %2417 = vmatmul.msk.bf16.gmra.mxu0 %vm1312_vm5, %v2046_v42 }
0x125b   : > { %v2100_v57 = vpop.f32.mrf.mxu0 }
0x125c   : > { %v2101_v45 = vadd.f32 %v2484_v43, %v2100_v57 }
0x125e   : > { %v2109_v46 = vadd.f32 %v2101_v45, %v3105_v51 }
0x1260   : > { %v2116_v21 = vsel %vm559_vm0, %v2109_v46, 0.0 }
0x1261   : > { %2117 = vadd.xlane.f32.xlu0 %v2116_v21 }
0x1263   : > { %v2102_v47 = vpop.f32.mrf.mxu0 }
0x1264   : > { %v2103_v48 = vadd.f32 %v2484_v43, %v2102_v47 }
0x1266   : > { %v2110_v54 = vadd.f32 %v2103_v48, %v3107_v53 }
0x1268   : > { %v2119_v52 = vsel %vm559_vm0, %v2110_v54, 0.0 }
0x1269   : > { %2120 = vadd.xlane.f32.xlu2 %v2119_v52 }
0x126b   : > { %v2105_v56 = vpop.f32.mrf.mxu0 }
0x126c   : > { %v2106_v26 = vadd.f32 %v2484_v43, %v2105_v56 }
0x126e   : > { %v2111_v60 = vadd.f32 %v2106_v26, %v3112_v44 }
0x1270   : > { %v2122_v35 = vsel %vm559_vm0, %v2111_v60, 0.0 }
0x1271   : > { %2123 = vadd.xlane.f32.xlu1 %v2122_v35 }
0x1273   : > { %v2107_v59 = vpop.f32.mrf.mxu0 }
0x12d4   : > { %v2118_v32 = vpop.xlane.xlu0 %2117 }
0x12d5   : > { %v2125_v51 = vmul.f32 %v2118_v32, %v2698_v12 }
0x12d7   : > { %v2128_v41 = vsub.f32 %v2109_v46, %v2125_v51 }
0x12d9   : > { %v2131_v61 = vmul.f32 %v2128_v41, %v2128_v41 }
0x12db   : > { %v2134_v49 = vsel %vm559_vm0, %v2131_v61, 0.0 }
0x12dc   : > { %v2121_v39 = vpop.xlane.xlu2 %2120  ;;  %2135 = vadd.xlane.f32.xlu0 %v2134_v49 }
0x12dd   : > { %v2126_v53 = vmul.f32 %v2121_v39, %v2698_v12 }
0x12df   : > { %v2129_v31 = vsub.f32 %v2110_v54, %v2126_v53 }
0x12e1   : > { %v2132_v55 = vmul.f32 %v2129_v31, %v2129_v31 }
0x12e3   : > { %v2137_v0 = vsel %vm559_vm0, %v2132_v55, 0.0 }
0x12e4   : > { %v2124_v44 = vpop.xlane.xlu1 %2123  ;;  %2138 = vadd.xlane.f32.xlu2 %v2137_v0 }
0x12e5   : > { %v2127_v1 = vmul.f32 %v2124_v44, %v2698_v12 }
0x12e7   : > { %v2130_v50 = vsub.f32 %v2111_v60, %v2127_v1 }
0x12e9   : > { %v2133_v2 = vmul.f32 %v2130_v50, %v2130_v50 }
0x12eb   : > { %v2140_v3 = vsel %vm559_vm0, %v2133_v2, 0.0 }
0x12ec   : > { %2141 = vadd.xlane.f32.xlu1 %v2140_v3 }
0x134f   : > { %v2136_v4 = vpop.xlane.xlu0 %2135 }
0x1350   : > { %v2143_v15 = vmul.f32 %v2136_v4, %v2698_v12 }
0x1352   : > { %v2146_v5 = vadd.f32 1e-12, %v2143_v15 }
0x1354   : > { %2573 = vrsqrt.f32 %v2146_v5  ;;  %vm2155_vm1 = vweird.f32 %v2146_v5 }
0x1357   : > { %v2139_v62 = vpop.xlane.xlu2 %2138 }
0x1358   : > { %v2144_v8 = vmul.f32 %v2139_v62, %v2698_v12 }
0x135a   : > { %v2574_v9 = vpop.eup %2573  ;;  %v2147_v27 = vadd.f32 1e-12, %v2144_v8 }
0x135b   : > { %v2150_v10 = vmul.f32 %v2574_v9, %v2146_v5  ;;  %vm2156_vm5 = vweird.f32 %v2574_v9 }
0x135c   : > { %2575 = vrsqrt.f32 %v2147_v27  ;;  %vm2157_vm2 = vmor %vm2155_vm1, %vm2156_vm5  ;;  %vm2165_vm4 = vweird.f32 %v2147_v27 }
0x135d   : > { %v2151_v6 = vmul.f32 %v2574_v9, %v2150_v10 }
0x135f   : > { %v2152_v11 = vmul.f32 0.5, %v2151_v6  ;;  %v2142_v13 = vpop.xlane.xlu1 %2141 }
0x1360   : > { %v2145_v14 = vmul.f32 %v2142_v13, %v2698_v12  ;;  %v2486_v12 = vld [vmem:[%s3184_s15 + $0x1] ss:$0 sm:$0xff] }
0x1361   : > { %v2153_v63 = vsub.f32 1.5, %v2152_v11 }
0x1362   : > { %v2576_v16 = vpop.eup %2575  ;;  %v2148_v7 = vadd.f32 1e-12, %v2145_v14 }
0x1363   : > { %v2154_v17 = vmul.f32 %v2574_v9, %v2153_v63  ;;  %v2160_v18 = vmul.f32 %v2576_v16, %v2147_v27  ;;  %vm2166_vm3 = vweird.f32 %v2576_v16 }
0x1364   : > { %2577 = vrsqrt.f32 %v2148_v7  ;;  %vm2167_vm6 = vmor %vm2165_vm4, %vm2166_vm3  ;;  %vm2175_vm12 = vweird.f32 %v2148_v7 }
0x1365   : > { %v2158_v20 = vsel %vm2157_vm2, %v2574_v9, %v2154_v17  ;;  %v2161_v58 = vmul.f32 %v2576_v16, %v2160_v18 }
0x1366   : > { %v2179_v22 = vmul.f32 %v2158_v20, %v2128_v41 }
0x1367   : > { %v2162_v23 = vmul.f32 0.5, %v2161_v58 }
0x1368   : > { %v2185_v24 = vmul.f32 %v2485_v19, %v2179_v22 }
0x1369   : > { %v2163_v25 = vsub.f32 1.5, %v2162_v23 }
0x136a   : > { %v2578_v28 = vpop.eup %2577  ;;  %v2191_v29 = vadd.f32 %v2486_v12, %v2185_v24 }
0x136b   : > { %v2164_v30 = vmul.f32 %v2576_v16, %v2163_v25  ;;  %v2170_v33 = vmul.f32 %v2578_v28, %v2148_v7  ;;  %vm2176_vm11 = vweird.f32 %v2578_v28 }
0x136c   : > { %2194 = vst.msk [vmem:[%s542_s30] sm:$0xff] %vm559_vm0, %v2191_v29  ;;  %vm2177_vm13 = vmor %vm2175_vm12, %vm2176_vm11 }
0x136d   : > { %v2168_v34 = vsel %vm2167_vm6, %v2576_v16, %v2164_v30  ;;  %v2171_v36 = vmul.f32 %v2578_v28, %v2170_v33 }
0x136e   : > { %v2180_v37 = vmul.f32 %v2168_v34, %v2129_v31 }
0x136f   : > { %v2172_v38 = vmul.f32 0.5, %v2171_v36 }
0x1370   : > { %v2186_v40 = vmul.f32 %v2485_v19, %v2180_v37 }
0x1371   : > { %v2173_v42 = vsub.f32 1.5, %v2172_v38 }
0x1372   : > { %v2192_v43 = vadd.f32 %v2486_v12, %v2186_v40 }
0x1373   : > { %v2174_v57 = vmul.f32 %v2578_v28, %v2173_v42 }
0x1374   : > { %2195 = vst.msk [vmem:[%s542_s30 + $0x8] sm:$0xff] %vm559_vm0, %v2192_v43 }
0x1375   : > { %v2178_v45 = vsel %vm2177_vm13, %v2578_v28, %v2174_v57 }
0x1376   : > { %v2181_v46 = vmul.f32 %v2178_v45, %v2130_v50 }
0x1378   : > { %v2187_v21 = vmul.f32 %v2485_v19, %v2181_v46 }
0x137a   : > { %v2193_v47 = vadd.f32 %v2486_v12, %v2187_v21 }
0x137c   : > { %2196 = vst.msk [vmem:[%s542_s30 + $0x10] sm:$0xff] %vm559_vm0, %v2193_v47 }
0x137d PF: > { %s26_s21 = sadd.s32 1, %s2585_s21  }
0x137e   : > { %p23_p4 = scmp.ge.s32.totalorder %s26_s21, 4  }
0x1380   :  { %25 = sbr.rel (!%p23_p4) target bundleno = 2 (0x2), region = 129 }

</bundles_post_ra>
